<compile_context>
chip_gen: v5e
topology: v5e:2x2
jax: 0.10.0
libtpu: 0.0.40
codegen_flags: <defaults>
</compile_context>

<pallas_src>
import functools

import jax
import jax.numpy as jnp
from jax.experimental import pallas as pl
from jax.experimental.pallas import tpu as pltpu

# ----- config (mirrors the PyTorch module ctor args / cfg['variance']) -----
NUM_CLASSES = 4
OVERLAP_THRESH = 0.5
NEGPOS_RATIO = 3
VARIANCE = (0.1, 0.2)
LANES = 128
BATCH_TILE = 8        # images per grid step -> the 8 vreg sublanes
MINE_CHUNK = 512      # k-chunk for the O(P^2) hard-negative ranking


# ---------------------------------------------------------------------------
# plain-JAX glue: per-image ground-truth matching (data dependent, tiny).
# TODO(synk): box_utils.match_only_four_corners source not provided; a faithful
# standard SSD/TextBoxes++ matching (jaccard + best-prior forcing + quad
# encoding, gt box kept in corner form for the CIoU branch) is used here.
# ---------------------------------------------------------------------------
def _point_form(priors):
    return jnp.concatenate([priors[:, :2] - priors[:, 2:] / 2.0,
                            priors[:, :2] + priors[:, 2:] / 2.0], axis=1)


def _jaccard(box_a, box_b):
    max_xy = jnp.minimum(box_a[:, None, 2:], box_b[None, :, 2:])
    min_xy = jnp.maximum(box_a[:, None, :2], box_b[None, :, :2])
    inter = jnp.maximum(max_xy - min_xy, 0.0)
    inter_area = inter[..., 0] * inter[..., 1]
    area_a = ((box_a[:, 2] - box_a[:, 0]) * (box_a[:, 3] - box_a[:, 1]))[:, None]
    area_b = ((box_b[:, 2] - box_b[:, 0]) * (box_b[:, 3] - box_b[:, 1]))[None, :]
    return inter_area / (area_a + area_b - inter_area)


def _match_one(target, priors):
    truths = target[:, :-1]                                   # (T, 12)
    labels = target[:, -1]                                    # (T,)
    num_t = truths.shape[0]
    overlaps = _jaccard(truths[:, :4], _point_form(priors))   # (T, P)
    best_prior_idx = jnp.argmax(overlaps, axis=1)             # (T,)
    best_truth_overlap = jnp.max(overlaps, axis=0)            # (P,)
    best_truth_idx = jnp.argmax(overlaps, axis=0)             # (P,)
    # sequential writes -> last-write-wins for duplicate best_prior indices,
    # matching the PyTorch reference loop semantics exactly.
    for j in range(num_t):
        bpj = best_prior_idx[j]
        best_truth_overlap = best_truth_overlap.at[bpj].set(2.0)
        best_truth_idx = best_truth_idx.at[bpj].set(j)
    matches = truths[best_truth_idx]                          # (P, 12)
    conf = labels[best_truth_idx].astype(jnp.int32) + 1
    conf = jnp.where(best_truth_overlap < OVERLAP_THRESH, 0, conf)
    loc_t = matches[:, :4]                                    # corner-form gt box
    cx, cy = priors[:, 0:1], priors[:, 1:2]
    w, h = priors[:, 2:3], priors[:, 3:4]
    qx = (matches[:, 4:12:2] - cx) / (VARIANCE[0] * w)        # (P, 4)
    qy = (matches[:, 5:12:2] - cy) / (VARIANCE[0] * h)        # (P, 4)
    quad = jnp.stack([qx, qy], axis=-1).reshape(-1, 8)        # (P, 8)
    return loc_t, conf, quad


# ---------------------------------------------------------------------------
# in-kernel helpers
# ---------------------------------------------------------------------------
def _atan(x):
    """float32 arctan from VPU/EUP-friendly ops (Cephes-style); inverse trig is
    not guaranteed to lower in Mosaic.  Divisions go through the EUP."""
    sign = jnp.where(x < 0.0, -1.0, 1.0)
    ax = jnp.abs(x)
    big = ax > 2.414213562373095
    mid = jnp.logical_and(ax > 0.4142135623730950, jnp.logical_not(big))
    inv_ax = pl.reciprocal(jnp.maximum(ax, 1e-30), approx=True)
    inv_ax1 = pl.reciprocal(ax + 1.0, approx=True)
    xr = jnp.where(big, -inv_ax, jnp.where(mid, (ax - 1.0) * inv_ax1, ax))
    y0 = jnp.where(big, jnp.float32(jnp.pi / 2.0),
                   jnp.where(mid, jnp.float32(jnp.pi / 4.0), jnp.float32(0.0)))
    z = xr * xr
    poly = (((8.05374449538e-2 * z - 1.38776856032e-1) * z
             + 1.99777106478e-1) * z - 3.33329491539e-1) * z * xr + xr
    return sign * (y0 + poly)


# ---------------------------------------------------------------------------
# Fused kernel: cross-entropy + hard-neg mining, smooth-L1, CIoU border loss.
# Layout: (feature, batch_tile=8 sublanes, P on lanes).
# ---------------------------------------------------------------------------
def _fused_loss_kernel(cl_ref, conft_ref, fcp_ref, fct_ref, priors_ref,
                       out_ref, *, num_classes, real_num_priors):
    C = num_classes
    cl = cl_ref[...]                 # (C+4, Bt, P): conf classes then gt box
    conf_t = conft_ref[...]          # (Bt, P) int32, -1 = padding
    fcp = fcp_ref[...]               # (8, Bt, P): x1..x4 then y1..y4 (pred)
    fct = fct_ref[...]               # (8, Bt, P): encoded gt, same order
    pr = priors_ref[...]             # (4, P): cx, cy, w, h
    Bt, P = conf_t.shape

    valid = conf_t >= 0
    pos = conf_t > 0
    posf = pos.astype(jnp.float32)

    # ---- per-prior softmax cross-entropy (dense (8,128) vregs) -------------
    conf = cl[:C]                                           # (C, Bt, P)
    m = jnp.max(conf, axis=0)                               # (Bt, P)
    lse = jnp.log(jnp.sum(jnp.exp(conf - m[None]), axis=0)) + m
    gathered = jnp.zeros((Bt, P), jnp.float32)
    for c in range(C):                                      # C tiny & static
        gathered = gathered + jnp.where(conf_t == c, conf[c], 0.0)
    ce = lse - gathered                                     # (Bt, P)

    # ---- hard-negative mining ----------------------------------------------
    lc = jnp.where(pos, 0.0, ce)                            # zero out positives
    lc = jnp.where(valid, lc, jnp.float32(-1e30))           # padding ranks last
    # tiny index bias = deterministic tie-break without (P,P) int32 iotas
    idx = jax.lax.broadcasted_iota(jnp.int32, (Bt, P), 1).astype(jnp.float32)
    lc_b = lc - idx * jnp.float32(1e-6)
    # rank[b,p] = #{k : lc_b[b,k] > lc_b[b,p]} reduced on the MXU (bf16 0/1
    # operands, f32 accumulation), chunked along k so the (Bt, chunk, P)
    # compare tile stays small in VMEM.  The 8-row ones LHS keeps a native
    # MXU tile; all rows are identical and row 0 is taken afterwards.
    rank3 = jnp.zeros((Bt, 8, P), jnp.float32)
    for start in range(0, P, MINE_CHUNK):
        pkc = min(MINE_CHUNK, P - start)
        lc_k = lc_b[:, start:start + pkc]                   # (Bt, pkc)
        before = jnp.where(lc_k[:, :, None] > lc_b[:, None, :],
                           1.0, 0.0).astype(jnp.bfloat16)   # (Bt, pkc, P)
        ones_lhs = jnp.ones((Bt, 8, pkc), jnp.bfloat16)
        rank3 = rank3 + jnp.einsum('bqk,bkp->bqp', ones_lhs, before,
                                   preferred_element_type=jnp.float32)
    rank = rank3[:, 0, :]                                   # (Bt, P)
    # TODO(synk): for real SSD prior counts (P~8732) also chunk the p axis so
    # the (Bt, chunk, P) compare tile stays under VMEM on v7x.

    num_pos = jnp.sum(posf, axis=1, keepdims=True)          # (Bt, 1)
    num_neg = jnp.minimum(jnp.float32(NEGPOS_RATIO) * num_pos,
                          jnp.float32(real_num_priors - 1))
    neg = jnp.logical_and(rank < num_neg, valid)
    selected = jnp.logical_or(pos, neg)
    loss_c = jnp.sum(jnp.where(selected, ce, 0.0))

    # ---- smooth-L1 on encoded four corners (positives only) ----------------
    diff = fcp - fct
    ad = jnp.abs(diff)
    huber = jnp.where(ad < 1.0, 0.5 * diff * diff, ad - 0.5)
    loss_l1 = jnp.sum(jnp.where(pos, jnp.sum(huber, axis=0), 0.0))

    # ---- decode_four_corners_TextBoxesPlusPlus + CIoU border loss ----------
    v0 = jnp.float32(VARIANCE[0])
    pcx = jnp.broadcast_to(pr[0:1, :], (Bt, P))             # hoisted broadcasts
    pcy = jnp.broadcast_to(pr[1:2, :], (Bt, P))
    sw = jnp.broadcast_to(v0 * pr[2:3, :], (Bt, P))
    sh = jnp.broadcast_to(v0 * pr[3:4, :], (Bt, P))
    xs = pcx[None] + fcp[0:4] * sw[None]                    # (4, Bt, P): x1..x4
    ys = pcy[None] + fcp[4:8] * sh[None]                    # (4, Bt, P): y1..y4
    left, right = jnp.minimum(xs[0], xs[3]), jnp.maximum(xs[1], xs[2])
    top, bottom = jnp.minimum(ys[0], ys[1]), jnp.maximum(ys[2], ys[3])

    eps = jnp.float32(1e-9)
    gx1, gy1, gx2, gy2 = cl[C], cl[C + 1], cl[C + 2], cl[C + 3]
    w1, h1 = right - left, bottom - top
    w2, h2 = gx2 - gx1, gy2 - gy1
    area1, area2 = w1 * h1, w2 * h2
    cpx, cpy = (left + right) * 0.5, (top + bottom) * 0.5
    cgx, cgy = (gx1 + gx2) * 0.5, (gy1 + gy2) * 0.5
    inter_w = jnp.maximum(jnp.minimum(right, gx2) - jnp.maximum(left, gx1), 0.0)
    inter_h = jnp.maximum(jnp.minimum(bottom, gy2) - jnp.maximum(top, gy1), 0.0)
    inter = inter_w * inter_h
    enc_w = jnp.maximum(jnp.maximum(right, gx2) - jnp.minimum(left, gx1), 0.0)
    enc_h = jnp.maximum(jnp.maximum(bottom, gy2) - jnp.minimum(top, gy1), 0.0)
    inter_diag = (cgx - cpx) ** 2 + (cgy - cpy) ** 2
    c_diag = enc_w * enc_w + enc_h * enc_h
    union = area1 + area2 - inter
    iou = inter * pl.reciprocal(union + eps, approx=True)       # EUP, not VALU
    u = inter_diag * pl.reciprocal(c_diag + eps, approx=True)
    at_g = _atan(w2 * pl.reciprocal(h2 + eps, approx=True))
    at_p = _atan(w1 * pl.reciprocal(h1 + eps, approx=True))
    v = jnp.float32(4.0 / (jnp.pi ** 2)) * (at_g - at_p) ** 2
    # TODO(synk): reference computes S/alpha under torch.no_grad(); forward
    # value is identical, exact grads would need a custom_vjp.
    s = (iou > 0.5).astype(jnp.float32)
    alpha = s * v * pl.reciprocal(1.0 - iou + v + eps, approx=True)
    ciou = jnp.clip(iou - u - alpha * v, -1.0, 1.0)
    loss_border = jnp.sum(jnp.where(pos, 1.0 - ciou, 0.0))

    # ---- pack the three partial sums into one lane-dense (1,8,128) block ----
    lane = jax.lax.broadcasted_iota(jnp.int32, (1, 8, LANES), 2)
    out_ref[...] = jnp.where(lane == 0, loss_c,
                    jnp.where(lane == 1, loss_l1,
                     jnp.where(lane == 2, loss_border, jnp.float32(0.0))))


def _round_up(x, m):
    return ((x + m - 1) // m) * m


def _fused_losses(conf_data, conf_t, four_corners_p, four_corners_t,
                  loc_t, priors):
    B, P, C = conf_data.shape
    P_pad = _round_up(P, LANES)
    bt = BATCH_TILE
    num_steps = -(-B // bt)
    if num_steps > 1 and num_steps % 2 == 1:
        num_steps += 1                      # even step count -> clean v7x 2-TC split
    B_pad = num_steps * bt
    pad_b, pad_p = B_pad - B, P_pad - P

    f32 = jnp.float32
    # feature-major layout: (feature, batch, prior); batch rides the 8 sublanes,
    # priors ride the 128 lanes -> every per-coordinate slice is a dense vreg.
    conf_f = jnp.transpose(conf_data.astype(f32), (2, 0, 1))          # (C, B, P)
    loct_f = jnp.transpose(loc_t.astype(f32), (2, 0, 1))              # (4, B, P)
    cl = jnp.concatenate([conf_f, loct_f], axis=0)                    # (C+4, B, P)
    order = jnp.array([0, 2, 4, 6, 1, 3, 5, 7])                       # x1..x4,y1..y4
    fcp_f = jnp.transpose(four_corners_p.astype(f32)[..., order], (2, 0, 1))
    fct_f = jnp.transpose(four_corners_t.astype(f32)[..., order], (2, 0, 1))
    conft = conf_t.astype(jnp.int32)                                  # (B, P)
    priors_f = priors.astype(f32).T                                   # (4, P)

    def pad_f(x):                                                     # (F, B, P)
        return jnp.pad(x, ((0, 0), (0, pad_b), (0, pad_p)))

    cl = pad_f(cl)
    fcp_f = pad_f(fcp_f)
    fct_f = pad_f(fct_f)
    conft = jnp.pad(conft, ((0, pad_b), (0, pad_p)), constant_values=-1)
    priors_f = jnp.pad(priors_f, ((0, 0), (0, pad_p)))

    # explicit VMEM budget: double-buffered input blocks + mining chunk + slack
    pk = min(P_pad, MINE_CHUNK)
    in_block = 4 * P_pad * bt * (C + 4 + 8 + 8) + 4 * P_pad * (bt + 4)
    mining = bt * pk * P_pad * 2 + bt * 8 * P_pad * 4
    vmem_limit = int(min(48 << 20,
                         max(16 << 20, 2 * in_block + 2 * mining + (4 << 20))))

    kernel = functools.partial(_fused_loss_kernel, num_classes=C,
                               real_num_priors=P)
    out = pl.pallas_call(
        kernel,
        out_shape=jax.ShapeDtypeStruct((num_steps, 8, LANES), jnp.float32),
        grid=(num_steps,),
        in_specs=[
            pl.BlockSpec((C + 4, bt, P_pad), lambda b: (0, b, 0)),
            pl.BlockSpec((bt, P_pad), lambda b: (b, 0)),
            pl.BlockSpec((8, bt, P_pad), lambda b: (0, b, 0)),
            pl.BlockSpec((8, bt, P_pad), lambda b: (0, b, 0)),
            pl.BlockSpec((4, P_pad), lambda b: (0, 0)),
        ],
        out_specs=pl.BlockSpec((1, 8, LANES), lambda b: (b, 0, 0)),
        compiler_params=pltpu.CompilerParams(
            dimension_semantics=("parallel",),
            vmem_limit_bytes=vmem_limit),
    )(cl, conft, fcp_f, fct_f, priors_f)

    sums = jnp.sum(out[:, 0, :3], axis=0)
    return sums[0], sums[1], sums[2]


# ---------------------------------------------------------------------------
# forward (mirrors MultiBoxLoss_only_four_corners_with_CIoU.forward)
# ---------------------------------------------------------------------------
def multibox_loss_forward(conf_data, priors, four_corners_data, targets):
    priors = priors[:conf_data.shape[1], :]
    loc_t, conf_t, four_corners_t = jax.vmap(_match_one, in_axes=(0, None))(
        targets, priors)
    pos = conf_t > 0                                        # (B, P)
    # guard: reference divides by num_pos and NaNs on 0 positives; clamp to 1.
    N = jnp.maximum(jnp.sum(pos.astype(jnp.float32)), 1.0)

    loss_c, loss_four_corners, loss_border = _fused_losses(
        conf_data, conf_t, four_corners_data, four_corners_t, loc_t, priors)

    # TODO(synk): PyTorch casts the final losses to float64; TPU keeps float32.
    loss_c = loss_c / N
    loss_four_corners = loss_four_corners / N
    loss_border = 16.0 * loss_border / N
    return loss_c, loss_four_corners, loss_border


if __name__ == "__main__":
    key = jax.random.PRNGKey(0)
    B, P, C, T = 2, 128, NUM_CLASSES, 3
    k1, k2, k3, k4, k5 = jax.random.split(key, 5)

    # priors: 8x8 grid of centers x 2 scales -> 128 priors in (cx, cy, w, h)
    gx, gy = jnp.meshgrid(jnp.linspace(0.0625, 0.9375, 8),
                          jnp.linspace(0.0625, 0.9375, 8), indexing="ij")
    centers = jnp.stack([gx.ravel(), gy.ravel()], axis=1)
    priors = jnp.concatenate(
        [jnp.concatenate([centers, jnp.full((64, 2), 0.20)], 1),
         jnp.concatenate([centers, jnp.full((64, 2), 0.35)], 1)], 0
    ).astype(jnp.float32)                                    # (128, 4)

    # targets: (B, T, 13) = [xmin, ymin, xmax, ymax, quad(8), label]
    ctr = jax.random.uniform(k1, (B, T, 2), minval=0.25, maxval=0.75)
    sz = jax.random.uniform(k2, (B, T, 2), minval=0.15, maxval=0.35)
    box = jnp.concatenate([ctr - sz / 2, ctr + sz / 2], axis=-1)
    quad = jnp.stack([box[..., 0], box[..., 1],
                      box[..., 2], box[..., 1],
                      box[..., 2], box[..., 3],
                      box[..., 0], box[..., 3]], axis=-1)
    quad = quad + 0.02 * jax.random.normal(k3, (B, T, 8))
    labels = jax.random.randint(k4, (B, T, 1), 0, NUM_CLASSES - 1).astype(jnp.float32)
    targets = jnp.concatenate([box, quad, labels], axis=-1).astype(jnp.float32)

    conf_data = jax.random.normal(k5, (B, P, C), dtype=jnp.float32)
    four_corners_data = 0.5 * jax.random.normal(
        jax.random.fold_in(key, 7), (B, P, 8), dtype=jnp.float32)

    out = jax.jit(multibox_loss_forward)(conf_data, priors,
                                         four_corners_data, targets)
    out = jax.block_until_ready(out)
    loss_c, loss_fc, loss_border = out
    print("KERNEL_OK")
</pallas_src>

<mosaic_0001>
module attributes {stable_mosaic.version = 11 : i64} {
  func.func @_fused_loss_kernel(%arg0: i32, %arg1: memref<8x8x128xf32, #tpu.memory_space<vmem>>, %arg2: memref<8x128xi32, #tpu.memory_space<vmem>>, %arg3: memref<8x8x128xf32, #tpu.memory_space<vmem>>, %arg4: memref<8x8x128xf32, #tpu.memory_space<vmem>>, %arg5: memref<4x128xf32, #tpu.memory_space<vmem>>, %arg6: memref<1x8x128xf32, #tpu.memory_space<vmem>>) attributes {dimension_semantics = [#tpu.dimension_semantics<parallel>], iteration_bounds = array<i64: 1>, scalar_prefetch = 0 : i64, scratch_operands = 0 : i64, tpu.core_type = #tpu.core_type<tc>, window_params = [{transform_indices = @transform_0, window_bounds = array<i64: 8, 8, 128>}, {transform_indices = @transform_1, window_bounds = array<i64: 8, 128>}, {transform_indices = @transform_2, window_bounds = array<i64: 8, 8, 128>}, {transform_indices = @transform_3, window_bounds = array<i64: 8, 8, 128>}, {pipeline_mode = #tpu.pipeline_mode<synchronous>, transform_indices = @transform_4, window_bounds = array<i64: 4, 128>}, {transform_indices = @transform_5, window_bounds = array<i64: 1, 8, 128>}]} {
    %c0 = arith.constant 0 : index
    %c0_0 = arith.constant 0 : index
    %c0_1 = arith.constant 0 : index
    %0 = vector.load %arg1[%c0, %c0_0, %c0_1] : memref<8x8x128xf32, #tpu.memory_space<vmem>>, vector<8x8x128xf32>
    %c0_2 = arith.constant 0 : index
    %c0_3 = arith.constant 0 : index
    %1 = vector.load %arg2[%c0_2, %c0_3] : memref<8x128xi32, #tpu.memory_space<vmem>>, vector<8x128xi32>
    %c0_4 = arith.constant 0 : index
    %c0_5 = arith.constant 0 : index
    %c0_6 = arith.constant 0 : index
    %2 = vector.load %arg3[%c0_4, %c0_5, %c0_6] : memref<8x8x128xf32, #tpu.memory_space<vmem>>, vector<8x8x128xf32>
    %c0_7 = arith.constant 0 : index
    %c0_8 = arith.constant 0 : index
    %c0_9 = arith.constant 0 : index
    %3 = vector.load %arg4[%c0_7, %c0_8, %c0_9] : memref<8x8x128xf32, #tpu.memory_space<vmem>>, vector<8x8x128xf32>
    %c0_10 = arith.constant 0 : index
    %c0_11 = arith.constant 0 : index
    %4 = vector.load %arg5[%c0_10, %c0_11] : memref<4x128xf32, #tpu.memory_space<vmem>>, vector<4x128xf32>
    %c0_i32 = arith.constant 0 : i32
    %5 = vector.broadcast %c0_i32 : i32 to vector<8x128xi32>
    %6 = arith.cmpi sge, %1, %5 : vector<8x128xi32>
    %c0_i32_12 = arith.constant 0 : i32
    %7 = vector.broadcast %c0_i32_12 : i32 to vector<8x128xi32>
    %8 = arith.cmpi sgt, %1, %7 : vector<8x128xi32>
    %9 = arith.extui %8 : vector<8x128xi1> to vector<8x128xi32>
    %10 = arith.sitofp %9 : vector<8x128xi32> to vector<8x128xf32>
    %11 = vector.extract_strided_slice %0 {offsets = [0, 0, 0], sizes = [4, 8, 128], strides = [1, 1, 1]} : vector<8x8x128xf32> to vector<4x8x128xf32>
    %cst = arith.constant dense<0xFF800000> : vector<8x128xf32>
    %12 = vector.multi_reduction <maximumf>, %11, %cst [0] : vector<4x8x128xf32> to vector<8x128xf32>
    %13 = vector.shape_cast %12 : vector<8x128xf32> to vector<1x8x128xf32>
    %14 = vector.broadcast %13 : vector<1x8x128xf32> to vector<4x8x128xf32>
    %15 = arith.subf %11, %14 : vector<4x8x128xf32>
    %16 = math.exp %15 : vector<4x8x128xf32>
    %cst_13 = arith.constant dense<0.000000e+00> : vector<8x128xf32>
    %17 = vector.multi_reduction <add>, %16, %cst_13 [0] : vector<4x8x128xf32> to vector<8x128xf32>
    %18 = math.log %17 : vector<8x128xf32>
    %19 = arith.addf %18, %12 : vector<8x128xf32>
    %cst_14 = arith.constant 0.000000e+00 : f32
    %20 = vector.broadcast %cst_14 : f32 to vector<8x128xf32>
    %c0_i32_15 = arith.constant 0 : i32
    %21 = vector.broadcast %c0_i32_15 : i32 to vector<8x128xi32>
    %22 = arith.cmpi eq, %1, %21 : vector<8x128xi32>
    %23 = vector.extract_strided_slice %11 {offsets = [0, 0, 0], sizes = [1, 8, 128], strides = [1, 1, 1]} : vector<4x8x128xf32> to vector<1x8x128xf32>
    %24 = vector.shape_cast %23 : vector<1x8x128xf32> to vector<8x128xf32>
    %cst_16 = arith.constant 0.000000e+00 : f32
    %25 = vector.broadcast %cst_16 : f32 to vector<8x128xf32>
    %26 = arith.select %22, %24, %25 : vector<8x128xi1>, vector<8x128xf32>
    %27 = arith.addf %20, %26 : vector<8x128xf32>
    %c1_i32 = arith.constant 1 : i32
    %28 = vector.broadcast %c1_i32 : i32 to vector<8x128xi32>
    %29 = arith.cmpi eq, %1, %28 : vector<8x128xi32>
    %30 = vector.extract_strided_slice %11 {offsets = [1, 0, 0], sizes = [1, 8, 128], strides = [1, 1, 1]} : vector<4x8x128xf32> to vector<1x8x128xf32>
    %31 = vector.shape_cast %30 : vector<1x8x128xf32> to vector<8x128xf32>
    %cst_17 = arith.constant 0.000000e+00 : f32
    %32 = vector.broadcast %cst_17 : f32 to vector<8x128xf32>
    %33 = arith.select %29, %31, %32 : vector<8x128xi1>, vector<8x128xf32>
    %34 = arith.addf %27, %33 : vector<8x128xf32>
    %c2_i32 = arith.constant 2 : i32
    %35 = vector.broadcast %c2_i32 : i32 to vector<8x128xi32>
    %36 = arith.cmpi eq, %1, %35 : vector<8x128xi32>
    %37 = vector.extract_strided_slice %11 {offsets = [2, 0, 0], sizes = [1, 8, 128], strides = [1, 1, 1]} : vector<4x8x128xf32> to vector<1x8x128xf32>
    %38 = vector.shape_cast %37 : vector<1x8x128xf32> to vector<8x128xf32>
    %cst_18 = arith.constant 0.000000e+00 : f32
    %39 = vector.broadcast %cst_18 : f32 to vector<8x128xf32>
    %40 = arith.select %36, %38, %39 : vector<8x128xi1>, vector<8x128xf32>
    %41 = arith.addf %34, %40 : vector<8x128xf32>
    %c3_i32 = arith.constant 3 : i32
    %42 = vector.broadcast %c3_i32 : i32 to vector<8x128xi32>
    %43 = arith.cmpi eq, %1, %42 : vector<8x128xi32>
    %44 = vector.extract_strided_slice %11 {offsets = [3, 0, 0], sizes = [1, 8, 128], strides = [1, 1, 1]} : vector<4x8x128xf32> to vector<1x8x128xf32>
    %45 = vector.shape_cast %44 : vector<1x8x128xf32> to vector<8x128xf32>
    %cst_19 = arith.constant 0.000000e+00 : f32
    %46 = vector.broadcast %cst_19 : f32 to vector<8x128xf32>
    %47 = arith.select %43, %45, %46 : vector<8x128xi1>, vector<8x128xf32>
    %48 = arith.addf %41, %47 : vector<8x128xf32>
    %49 = arith.subf %19, %48 : vector<8x128xf32>
    %cst_20 = arith.constant 0.000000e+00 : f32
    %50 = vector.broadcast %cst_20 : f32 to vector<8x128xf32>
    %51 = arith.select %8, %50, %49 : vector<8x128xi1>, vector<8x128xf32>
    %cst_21 = arith.constant -1.000000e+30 : f32
    %52 = vector.broadcast %cst_21 : f32 to vector<8x128xf32>
    %53 = arith.select %6, %51, %52 : vector<8x128xi1>, vector<8x128xf32>
    %54 = tpu.iota {dimensions = array<i32: 1>} : vector<8x128xi32>
    %55 = arith.sitofp %54 : vector<8x128xi32> to vector<8x128xf32>
    %cst_22 = arith.constant 9.99999997E-7 : f32
    %56 = vector.broadcast %cst_22 : f32 to vector<8x128xf32>
    %57 = arith.mulf %55, %56 : vector<8x128xf32>
    %58 = arith.subf %53, %57 : vector<8x128xf32>
    %cst_23 = arith.constant 0.000000e+00 : f32
    %59 = vector.broadcast %cst_23 : f32 to vector<8x8x128xf32>
    %60 = vector.shape_cast %58 : vector<8x128xf32> to vector<8x128x1xf32>
    %61 = vector.shape_cast %58 : vector<8x128xf32> to vector<8x1x128xf32>
    %62 = vector.broadcast %60 : vector<8x128x1xf32> to vector<8x128x128xf32>
    %63 = vector.broadcast %61 : vector<8x1x128xf32> to vector<8x128x128xf32>
    %64 = arith.cmpf ogt, %62, %63 : vector<8x128x128xf32>
    %cst_24 = arith.constant 1.000000e+00 : f32
    %cst_25 = arith.constant 0.000000e+00 : f32
    %65 = vector.broadcast %cst_24 : f32 to vector<8x128x128xf32>
    %66 = vector.broadcast %cst_25 : f32 to vector<8x128x128xf32>
    %67 = arith.select %64, %65, %66 : vector<8x128x128xi1>, vector<8x128x128xf32>
    %68 = arith.truncf %67 : vector<8x128x128xf32> to vector<8x128x128xbf16>
    %cst_26 = arith.constant 1.000000e+00 : bf16
    %69 = vector.broadcast %cst_26 : bf16 to vector<8x8x128xbf16>
    "tpu.trace_start"() <{level = 10 : i32, message = "bqk,bkp->bqp"}> : () -> ()
    %cst_27 = arith.constant dense<0.000000e+00> : vector<8x8x128xf32>
    %70 = tpu.matmul %69, %68, %cst_27 {dimension_numbers = #tpu.dot_dimension_numbers<[2], [1], [1], [2], [0, 0, 0, 1, 1, 2], [0], [0]>} : vector<8x8x128xbf16>, vector<8x128x128xbf16>, vector<8x8x128xf32> -> vector<8x8x128xf32>
    "tpu.trace_stop"() : () -> ()
    %71 = arith.addf %59, %70 : vector<8x8x128xf32>
    %72 = vector.extract_strided_slice %71 {offsets = [0, 0, 0], sizes = [8, 1, 128], strides = [1, 1, 1]} : vector<8x8x128xf32> to vector<8x1x128xf32>
    %73 = vector.shape_cast %72 : vector<8x1x128xf32> to vector<8x128xf32>
    %cst_28 = arith.constant dense<0.000000e+00> : vector<8xf32>
    %74 = vector.multi_reduction <add>, %10, %cst_28 [1] : vector<8x128xf32> to vector<8xf32>
    %75 = vector.shape_cast %74 : vector<8xf32> to vector<8x1xf32>
    %cst_29 = arith.constant 3.000000e+00 : f32
    %76 = vector.broadcast %cst_29 : f32 to vector<8x1xf32>
    %77 = arith.mulf %76, %75 : vector<8x1xf32>
    %cst_30 = arith.constant 1.270000e+02 : f32
    %78 = vector.broadcast %cst_30 : f32 to vector<8x1xf32>
    %79 = arith.minimumf %77, %78 : vector<8x1xf32>
    %80 = vector.broadcast %79 : vector<8x1xf32> to vector<8x128xf32>
    %81 = arith.cmpf olt, %73, %80 : vector<8x128xf32>
    %82 = arith.andi %81, %6 : vector<8x128xi1>
    %83 = arith.ori %8, %82 : vector<8x128xi1>
    %cst_31 = arith.constant 0.000000e+00 : f32
    %84 = vector.broadcast %cst_31 : f32 to vector<8x128xf32>
    %85 = arith.select %83, %49, %84 : vector<8x128xi1>, vector<8x128xf32>
    %86 = vector.shape_cast %85 : vector<8x128xf32> to vector<1x8x128xf32>
    %cst_32 = arith.constant dense<0.000000e+00> : vector<1xf32>
    %87 = vector.multi_reduction <add>, %86, %cst_32 [1, 2] : vector<1x8x128xf32> to vector<1xf32>
    %88 = vector.shape_cast %87 : vector<1xf32> to vector<1x1x1xf32>
    %89 = vector.extract %88[0, 0, 0] : f32 from vector<1x1x1xf32>
    %90 = arith.subf %2, %3 : vector<8x8x128xf32>
    %91 = math.absf %90 : vector<8x8x128xf32>
    %cst_33 = arith.constant 1.000000e+00 : f32
    %92 = vector.broadcast %cst_33 : f32 to vector<8x8x128xf32>
    %93 = arith.cmpf olt, %91, %92 : vector<8x8x128xf32>
    %cst_34 = arith.constant 5.000000e-01 : f32
    %94 = vector.broadcast %cst_34 : f32 to vector<8x8x128xf32>
    %95 = arith.mulf %94, %90 : vector<8x8x128xf32>
    %96 = arith.mulf %95, %90 : vector<8x8x128xf32>
    %cst_35 = arith.constant 5.000000e-01 : f32
    %97 = vector.broadcast %cst_35 : f32 to vector<8x8x128xf32>
    %98 = arith.subf %91, %97 : vector<8x8x128xf32>
    %99 = arith.select %93, %96, %98 : vector<8x8x128xi1>, vector<8x8x128xf32>
    %cst_36 = arith.constant dense<0.000000e+00> : vector<8x128xf32>
    %100 = vector.multi_reduction <add>, %99, %cst_36 [0] : vector<8x8x128xf32> to vector<8x128xf32>
    %cst_37 = arith.constant 0.000000e+00 : f32
    %101 = vector.broadcast %cst_37 : f32 to vector<8x128xf32>
    %102 = arith.select %8, %100, %101 : vector<8x128xi1>, vector<8x128xf32>
    %103 = vector.shape_cast %102 : vector<8x128xf32> to vector<1x8x128xf32>
    %cst_38 = arith.constant dense<0.000000e+00> : vector<1xf32>
    %104 = vector.multi_reduction <add>, %103, %cst_38 [1, 2] : vector<1x8x128xf32> to vector<1xf32>
    %105 = vector.shape_cast %104 : vector<1xf32> to vector<1x1x1xf32>
    %106 = vector.extract %105[0, 0, 0] : f32 from vector<1x1x1xf32>
    %107 = vector.extract_strided_slice %4 {offsets = [0, 0], sizes = [1, 128], strides = [1, 1]} : vector<4x128xf32> to vector<1x128xf32>
    %108 = vector.shape_cast %107 : vector<1x128xf32> to vector<1x128xf32>
    %109 = vector.broadcast %108 : vector<1x128xf32> to vector<8x128xf32>
    %110 = vector.extract_strided_slice %4 {offsets = [1, 0], sizes = [1, 128], strides = [1, 1]} : vector<4x128xf32> to vector<1x128xf32>
    %111 = vector.shape_cast %110 : vector<1x128xf32> to vector<1x128xf32>
    %112 = vector.broadcast %111 : vector<1x128xf32> to vector<8x128xf32>
    %113 = vector.extract_strided_slice %4 {offsets = [2, 0], sizes = [1, 128], strides = [1, 1]} : vector<4x128xf32> to vector<1x128xf32>
    %cst_39 = arith.constant 1.000000e-01 : f32
    %114 = vector.broadcast %cst_39 : f32 to vector<1x128xf32>
    %115 = arith.mulf %114, %113 : vector<1x128xf32>
    %116 = vector.shape_cast %115 : vector<1x128xf32> to vector<1x128xf32>
    %117 = vector.broadcast %116 : vector<1x128xf32> to vector<8x128xf32>
    %118 = vector.extract_strided_slice %4 {offsets = [3, 0], sizes = [1, 128], strides = [1, 1]} : vector<4x128xf32> to vector<1x128xf32>
    %cst_40 = arith.constant 1.000000e-01 : f32
    %119 = vector.broadcast %cst_40 : f32 to vector<1x128xf32>
    %120 = arith.mulf %119, %118 : vector<1x128xf32>
    %121 = vector.shape_cast %120 : vector<1x128xf32> to vector<1x128xf32>
    %122 = vector.broadcast %121 : vector<1x128xf32> to vector<8x128xf32>
    %123 = vector.shape_cast %109 : vector<8x128xf32> to vector<1x8x128xf32>
    %124 = vector.extract_strided_slice %2 {offsets = [0, 0, 0], sizes = [4, 8, 128], strides = [1, 1, 1]} : vector<8x8x128xf32> to vector<4x8x128xf32>
    %125 = vector.shape_cast %117 : vector<8x128xf32> to vector<1x8x128xf32>
    %126 = vector.broadcast %125 : vector<1x8x128xf32> to vector<4x8x128xf32>
    %127 = arith.mulf %124, %126 : vector<4x8x128xf32>
    %128 = vector.broadcast %123 : vector<1x8x128xf32> to vector<4x8x128xf32>
    %129 = arith.addf %128, %127 : vector<4x8x128xf32>
    %130 = vector.shape_cast %112 : vector<8x128xf32> to vector<1x8x128xf32>
    %131 = vector.extract_strided_slice %2 {offsets = [4, 0, 0], sizes = [4, 8, 128], strides = [1, 1, 1]} : vector<8x8x128xf32> to vector<4x8x128xf32>
    %132 = vector.shape_cast %122 : vector<8x128xf32> to vector<1x8x128xf32>
    %133 = vector.broadcast %132 : vector<1x8x128xf32> to vector<4x8x128xf32>
    %134 = arith.mulf %131, %133 : vector<4x8x128xf32>
    %135 = vector.broadcast %130 : vector<1x8x128xf32> to vector<4x8x128xf32>
    %136 = arith.addf %135, %134 : vector<4x8x128xf32>
    %137 = vector.extract_strided_slice %129 {offsets = [0, 0, 0], sizes = [1, 8, 128], strides = [1, 1, 1]} : vector<4x8x128xf32> to vector<1x8x128xf32>
    %138 = vector.shape_cast %137 : vector<1x8x128xf32> to vector<8x128xf32>
    %139 = vector.extract_strided_slice %129 {offsets = [3, 0, 0], sizes = [1, 8, 128], strides = [1, 1, 1]} : vector<4x8x128xf32> to vector<1x8x128xf32>
    %140 = vector.shape_cast %139 : vector<1x8x128xf32> to vector<8x128xf32>
    %141 = arith.minimumf %138, %140 : vector<8x128xf32>
    %142 = vector.extract_strided_slice %129 {offsets = [1, 0, 0], sizes = [1, 8, 128], strides = [1, 1, 1]} : vector<4x8x128xf32> to vector<1x8x128xf32>
    %143 = vector.shape_cast %142 : vector<1x8x128xf32> to vector<8x128xf32>
    %144 = vector.extract_strided_slice %129 {offsets = [2, 0, 0], sizes = [1, 8, 128], strides = [1, 1, 1]} : vector<4x8x128xf32> to vector<1x8x128xf32>
    %145 = vector.shape_cast %144 : vector<1x8x128xf32> to vector<8x128xf32>
    %146 = arith.maximumf %143, %145 : vector<8x128xf32>
    %147 = vector.extract_strided_slice %136 {offsets = [0, 0, 0], sizes = [1, 8, 128], strides = [1, 1, 1]} : vector<4x8x128xf32> to vector<1x8x128xf32>
    %148 = vector.shape_cast %147 : vector<1x8x128xf32> to vector<8x128xf32>
    %149 = vector.extract_strided_slice %136 {offsets = [1, 0, 0], sizes = [1, 8, 128], strides = [1, 1, 1]} : vector<4x8x128xf32> to vector<1x8x128xf32>
    %150 = vector.shape_cast %149 : vector<1x8x128xf32> to vector<8x128xf32>
    %151 = arith.minimumf %148, %150 : vector<8x128xf32>
    %152 = vector.extract_strided_slice %136 {offsets = [2, 0, 0], sizes = [1, 8, 128], strides = [1, 1, 1]} : vector<4x8x128xf32> to vector<1x8x128xf32>
    %153 = vector.shape_cast %152 : vector<1x8x128xf32> to vector<8x128xf32>
    %154 = vector.extract_strided_slice %136 {offsets = [3, 0, 0], sizes = [1, 8, 128], strides = [1, 1, 1]} : vector<4x8x128xf32> to vector<1x8x128xf32>
    %155 = vector.shape_cast %154 : vector<1x8x128xf32> to vector<8x128xf32>
    %156 = arith.maximumf %153, %155 : vector<8x128xf32>
    %157 = vector.extract_strided_slice %0 {offsets = [4, 0, 0], sizes = [1, 8, 128], strides = [1, 1, 1]} : vector<8x8x128xf32> to vector<1x8x128xf32>
    %158 = vector.shape_cast %157 : vector<1x8x128xf32> to vector<8x128xf32>
    %159 = vector.extract_strided_slice %0 {offsets = [5, 0, 0], sizes = [1, 8, 128], strides = [1, 1, 1]} : vector<8x8x128xf32> to vector<1x8x128xf32>
    %160 = vector.shape_cast %159 : vector<1x8x128xf32> to vector<8x128xf32>
    %161 = vector.extract_strided_slice %0 {offsets = [6, 0, 0], sizes = [1, 8, 128], strides = [1, 1, 1]} : vector<8x8x128xf32> to vector<1x8x128xf32>
    %162 = vector.shape_cast %161 : vector<1x8x128xf32> to vector<8x128xf32>
    %163 = vector.extract_strided_slice %0 {offsets = [7, 0, 0], sizes = [1, 8, 128], strides = [1, 1, 1]} : vector<8x8x128xf32> to vector<1x8x128xf32>
    %164 = vector.shape_cast %163 : vector<1x8x128xf32> to vector<8x128xf32>
    %165 = arith.subf %146, %141 : vector<8x128xf32>
    %166 = arith.subf %156, %151 : vector<8x128xf32>
    %167 = arith.subf %162, %158 : vector<8x128xf32>
    %168 = arith.subf %164, %160 : vector<8x128xf32>
    %169 = arith.mulf %165, %166 : vector<8x128xf32>
    %170 = arith.mulf %167, %168 : vector<8x128xf32>
    %171 = arith.addf %141, %146 : vector<8x128xf32>
    %cst_41 = arith.constant 5.000000e-01 : f32
    %172 = vector.broadcast %cst_41 : f32 to vector<8x128xf32>
    %173 = arith.mulf %171, %172 : vector<8x128xf32>
    %174 = arith.addf %151, %156 : vector<8x128xf32>
    %cst_42 = arith.constant 5.000000e-01 : f32
    %175 = vector.broadcast %cst_42 : f32 to vector<8x128xf32>
    %176 = arith.mulf %174, %175 : vector<8x128xf32>
    %177 = arith.addf %158, %162 : vector<8x128xf32>
    %cst_43 = arith.constant 5.000000e-01 : f32
    %178 = vector.broadcast %cst_43 : f32 to vector<8x128xf32>
    %179 = arith.mulf %177, %178 : vector<8x128xf32>
    %180 = arith.addf %160, %164 : vector<8x128xf32>
    %cst_44 = arith.constant 5.000000e-01 : f32
    %181 = vector.broadcast %cst_44 : f32 to vector<8x128xf32>
    %182 = arith.mulf %180, %181 : vector<8x128xf32>
    %183 = arith.minimumf %146, %162 : vector<8x128xf32>
    %184 = arith.maximumf %141, %158 : vector<8x128xf32>
    %185 = arith.subf %183, %184 : vector<8x128xf32>
    %cst_45 = arith.constant 0.000000e+00 : f32
    %186 = vector.broadcast %cst_45 : f32 to vector<8x128xf32>
    %187 = arith.maximumf %185, %186 : vector<8x128xf32>
    %188 = arith.minimumf %156, %164 : vector<8x128xf32>
    %189 = arith.maximumf %151, %160 : vector<8x128xf32>
    %190 = arith.subf %188, %189 : vector<8x128xf32>
    %cst_46 = arith.constant 0.000000e+00 : f32
    %191 = vector.broadcast %cst_46 : f32 to vector<8x128xf32>
    %192 = arith.maximumf %190, %191 : vector<8x128xf32>
    %193 = arith.mulf %187, %192 : vector<8x128xf32>
    %194 = arith.maximumf %146, %162 : vector<8x128xf32>
    %195 = arith.minimumf %141, %158 : vector<8x128xf32>
    %196 = arith.subf %194, %195 : vector<8x128xf32>
    %cst_47 = arith.constant 0.000000e+00 : f32
    %197 = vector.broadcast %cst_47 : f32 to vector<8x128xf32>
    %198 = arith.maximumf %196, %197 : vector<8x128xf32>
    %199 = arith.maximumf %156, %164 : vector<8x128xf32>
    %200 = arith.minimumf %151, %160 : vector<8x128xf32>
    %201 = arith.subf %199, %200 : vector<8x128xf32>
    %cst_48 = arith.constant 0.000000e+00 : f32
    %202 = vector.broadcast %cst_48 : f32 to vector<8x128xf32>
    %203 = arith.maximumf %201, %202 : vector<8x128xf32>
    %204 = arith.subf %179, %173 : vector<8x128xf32>
    %205 = arith.mulf %204, %204 : vector<8x128xf32>
    %206 = arith.subf %182, %176 : vector<8x128xf32>
    %207 = arith.mulf %206, %206 : vector<8x128xf32>
    %208 = arith.addf %205, %207 : vector<8x128xf32>
    %209 = arith.mulf %198, %198 : vector<8x128xf32>
    %210 = arith.mulf %203, %203 : vector<8x128xf32>
    %211 = arith.addf %209, %210 : vector<8x128xf32>
    %212 = arith.addf %169, %170 : vector<8x128xf32>
    %213 = arith.subf %212, %193 : vector<8x128xf32>
    %cst_49 = arith.constant 9.99999971E-10 : f32
    %214 = vector.broadcast %cst_49 : f32 to vector<8x128xf32>
    %215 = arith.addf %213, %214 : vector<8x128xf32>
    %216 = tpu.reciprocal %215 {approx = true} : vector<8x128xf32> -> vector<8x128xf32>
    %217 = arith.mulf %193, %216 : vector<8x128xf32>
    %cst_50 = arith.constant 9.99999971E-10 : f32
    %218 = vector.broadcast %cst_50 : f32 to vector<8x128xf32>
    %219 = arith.addf %211, %218 : vector<8x128xf32>
    %220 = tpu.reciprocal %219 {approx = true} : vector<8x128xf32> -> vector<8x128xf32>
    %221 = arith.mulf %208, %220 : vector<8x128xf32>
    %cst_51 = arith.constant 9.99999971E-10 : f32
    %222 = vector.broadcast %cst_51 : f32 to vector<8x128xf32>
    %223 = arith.addf %168, %222 : vector<8x128xf32>
    %224 = tpu.reciprocal %223 {approx = true} : vector<8x128xf32> -> vector<8x128xf32>
    %225 = arith.mulf %167, %224 : vector<8x128xf32>
    %cst_52 = arith.constant 0.000000e+00 : f32
    %226 = vector.broadcast %cst_52 : f32 to vector<8x128xf32>
    %227 = arith.cmpf olt, %225, %226 : vector<8x128xf32>
    %cst_53 = arith.constant -1.000000e+00 : f32
    %cst_54 = arith.constant 1.000000e+00 : f32
    %228 = vector.broadcast %cst_53 : f32 to vector<8x128xf32>
    %229 = vector.broadcast %cst_54 : f32 to vector<8x128xf32>
    %230 = arith.select %227, %228, %229 : vector<8x128xi1>, vector<8x128xf32>
    %231 = math.absf %225 : vector<8x128xf32>
    %cst_55 = arith.constant 2.41421366 : f32
    %232 = vector.broadcast %cst_55 : f32 to vector<8x128xf32>
    %233 = arith.cmpf ogt, %231, %232 : vector<8x128xf32>
    %cst_56 = arith.constant 0.414213568 : f32
    %234 = vector.broadcast %cst_56 : f32 to vector<8x128xf32>
    %235 = arith.cmpf ogt, %231, %234 : vector<8x128xf32>
    %cst_57 = arith.constant dense<true> : vector<8x128xi1>
    %236 = arith.xori %233, %cst_57 : vector<8x128xi1>
    %237 = arith.andi %235, %236 : vector<8x128xi1>
    %cst_58 = arith.constant 1.000000e-30 : f32
    %238 = vector.broadcast %cst_58 : f32 to vector<8x128xf32>
    %239 = arith.maximumf %231, %238 : vector<8x128xf32>
    %240 = tpu.reciprocal %239 {approx = true} : vector<8x128xf32> -> vector<8x128xf32>
    %cst_59 = arith.constant 1.000000e+00 : f32
    %241 = vector.broadcast %cst_59 : f32 to vector<8x128xf32>
    %242 = arith.addf %231, %241 : vector<8x128xf32>
    %243 = tpu.reciprocal %242 {approx = true} : vector<8x128xf32> -> vector<8x128xf32>
    %cst_60 = arith.constant 0.000000e+00 : f32
    %244 = vector.broadcast %cst_60 : f32 to vector<8x128xf32>
    %245 = arith.subf %244, %240 : vector<8x128xf32>
    %cst_61 = arith.constant 1.000000e+00 : f32
    %246 = vector.broadcast %cst_61 : f32 to vector<8x128xf32>
    %247 = arith.subf %231, %246 : vector<8x128xf32>
    %248 = arith.mulf %247, %243 : vector<8x128xf32>
    %249 = arith.select %237, %248, %231 : vector<8x128xi1>, vector<8x128xf32>
    %250 = arith.select %233, %245, %249 : vector<8x128xi1>, vector<8x128xf32>
    %cst_62 = arith.constant 0.785398185 : f32
    %cst_63 = arith.constant 0.000000e+00 : f32
    %251 = vector.broadcast %cst_62 : f32 to vector<8x128xf32>
    %252 = vector.broadcast %cst_63 : f32 to vector<8x128xf32>
    %253 = arith.select %237, %251, %252 : vector<8x128xi1>, vector<8x128xf32>
    %cst_64 = arith.constant 1.57079637 : f32
    %254 = vector.broadcast %cst_64 : f32 to vector<8x128xf32>
    %255 = arith.select %233, %254, %253 : vector<8x128xi1>, vector<8x128xf32>
    %256 = arith.mulf %250, %250 : vector<8x128xf32>
    %cst_65 = arith.constant 0.0805374458 : f32
    %257 = vector.broadcast %cst_65 : f32 to vector<8x128xf32>
    %258 = arith.mulf %257, %256 : vector<8x128xf32>
    %cst_66 = arith.constant 0.138776854 : f32
    %259 = vector.broadcast %cst_66 : f32 to vector<8x128xf32>
    %260 = arith.subf %258, %259 : vector<8x128xf32>
    %261 = arith.mulf %260, %256 : vector<8x128xf32>
    %cst_67 = arith.constant 0.199777111 : f32
    %262 = vector.broadcast %cst_67 : f32 to vector<8x128xf32>
    %263 = arith.addf %261, %262 : vector<8x128xf32>
    %264 = arith.mulf %263, %256 : vector<8x128xf32>
    %cst_68 = arith.constant 0.333329499 : f32
    %265 = vector.broadcast %cst_68 : f32 to vector<8x128xf32>
    %266 = arith.subf %264, %265 : vector<8x128xf32>
    %267 = arith.mulf %266, %256 : vector<8x128xf32>
    %268 = arith.mulf %267, %250 : vector<8x128xf32>
    %269 = arith.addf %268, %250 : vector<8x128xf32>
    %270 = arith.addf %255, %269 : vector<8x128xf32>
    %271 = arith.mulf %230, %270 : vector<8x128xf32>
    %cst_69 = arith.constant 9.99999971E-10 : f32
    %272 = vector.broadcast %cst_69 : f32 to vector<8x128xf32>
    %273 = arith.addf %166, %272 : vector<8x128xf32>
    %274 = tpu.reciprocal %273 {approx = true} : vector<8x128xf32> -> vector<8x128xf32>
    %275 = arith.mulf %165, %274 : vector<8x128xf32>
    %cst_70 = arith.constant 0.000000e+00 : f32
    %276 = vector.broadcast %cst_70 : f32 to vector<8x128xf32>
    %277 = arith.cmpf olt, %275, %276 : vector<8x128xf32>
    %cst_71 = arith.constant -1.000000e+00 : f32
    %cst_72 = arith.constant 1.000000e+00 : f32
    %278 = vector.broadcast %cst_71 : f32 to vector<8x128xf32>
    %279 = vector.broadcast %cst_72 : f32 to vector<8x128xf32>
    %280 = arith.select %277, %278, %279 : vector<8x128xi1>, vector<8x128xf32>
    %281 = math.absf %275 : vector<8x128xf32>
    %cst_73 = arith.constant 2.41421366 : f32
    %282 = vector.broadcast %cst_73 : f32 to vector<8x128xf32>
    %283 = arith.cmpf ogt, %281, %282 : vector<8x128xf32>
    %cst_74 = arith.constant 0.414213568 : f32
    %284 = vector.broadcast %cst_74 : f32 to vector<8x128xf32>
    %285 = arith.cmpf ogt, %281, %284 : vector<8x128xf32>
    %cst_75 = arith.constant dense<true> : vector<8x128xi1>
    %286 = arith.xori %283, %cst_75 : vector<8x128xi1>
    %287 = arith.andi %285, %286 : vector<8x128xi1>
    %cst_76 = arith.constant 1.000000e-30 : f32
    %288 = vector.broadcast %cst_76 : f32 to vector<8x128xf32>
    %289 = arith.maximumf %281, %288 : vector<8x128xf32>
    %290 = tpu.reciprocal %289 {approx = true} : vector<8x128xf32> -> vector<8x128xf32>
    %cst_77 = arith.constant 1.000000e+00 : f32
    %291 = vector.broadcast %cst_77 : f32 to vector<8x128xf32>
    %292 = arith.addf %281, %291 : vector<8x128xf32>
    %293 = tpu.reciprocal %292 {approx = true} : vector<8x128xf32> -> vector<8x128xf32>
    %cst_78 = arith.constant 0.000000e+00 : f32
    %294 = vector.broadcast %cst_78 : f32 to vector<8x128xf32>
    %295 = arith.subf %294, %290 : vector<8x128xf32>
    %cst_79 = arith.constant 1.000000e+00 : f32
    %296 = vector.broadcast %cst_79 : f32 to vector<8x128xf32>
    %297 = arith.subf %281, %296 : vector<8x128xf32>
    %298 = arith.mulf %297, %293 : vector<8x128xf32>
    %299 = arith.select %287, %298, %281 : vector<8x128xi1>, vector<8x128xf32>
    %300 = arith.select %283, %295, %299 : vector<8x128xi1>, vector<8x128xf32>
    %cst_80 = arith.constant 0.785398185 : f32
    %cst_81 = arith.constant 0.000000e+00 : f32
    %301 = vector.broadcast %cst_80 : f32 to vector<8x128xf32>
    %302 = vector.broadcast %cst_81 : f32 to vector<8x128xf32>
    %303 = arith.select %287, %301, %302 : vector<8x128xi1>, vector<8x128xf32>
    %cst_82 = arith.constant 1.57079637 : f32
    %304 = vector.broadcast %cst_82 : f32 to vector<8x128xf32>
    %305 = arith.select %283, %304, %303 : vector<8x128xi1>, vector<8x128xf32>
    %306 = arith.mulf %300, %300 : vector<8x128xf32>
    %cst_83 = arith.constant 0.0805374458 : f32
    %307 = vector.broadcast %cst_83 : f32 to vector<8x128xf32>
    %308 = arith.mulf %307, %306 : vector<8x128xf32>
    %cst_84 = arith.constant 0.138776854 : f32
    %309 = vector.broadcast %cst_84 : f32 to vector<8x128xf32>
    %310 = arith.subf %308, %309 : vector<8x128xf32>
    %311 = arith.mulf %310, %306 : vector<8x128xf32>
    %cst_85 = arith.constant 0.199777111 : f32
    %312 = vector.broadcast %cst_85 : f32 to vector<8x128xf32>
    %313 = arith.addf %311, %312 : vector<8x128xf32>
    %314 = arith.mulf %313, %306 : vector<8x128xf32>
    %cst_86 = arith.constant 0.333329499 : f32
    %315 = vector.broadcast %cst_86 : f32 to vector<8x128xf32>
    %316 = arith.subf %314, %315 : vector<8x128xf32>
    %317 = arith.mulf %316, %306 : vector<8x128xf32>
    %318 = arith.mulf %317, %300 : vector<8x128xf32>
    %319 = arith.addf %318, %300 : vector<8x128xf32>
    %320 = arith.addf %305, %319 : vector<8x128xf32>
    %321 = arith.mulf %280, %320 : vector<8x128xf32>
    %322 = arith.subf %271, %321 : vector<8x128xf32>
    %323 = arith.mulf %322, %322 : vector<8x128xf32>
    %cst_87 = arith.constant 0.405284733 : f32
    %324 = vector.broadcast %cst_87 : f32 to vector<8x128xf32>
    %325 = arith.mulf %324, %323 : vector<8x128xf32>
    %cst_88 = arith.constant 5.000000e-01 : f32
    %326 = vector.broadcast %cst_88 : f32 to vector<8x128xf32>
    %327 = arith.cmpf ogt, %217, %326 : vector<8x128xf32>
    %328 = arith.extui %327 : vector<8x128xi1> to vector<8x128xi32>
    %329 = arith.sitofp %328 : vector<8x128xi32> to vector<8x128xf32>
    %330 = arith.mulf %329, %325 : vector<8x128xf32>
    %cst_89 = arith.constant 1.000000e+00 : f32
    %331 = vector.broadcast %cst_89 : f32 to vector<8x128xf32>
    %332 = arith.subf %331, %217 : vector<8x128xf32>
    %333 = arith.addf %332, %325 : vector<8x128xf32>
    %cst_90 = arith.constant 9.99999971E-10 : f32
    %334 = vector.broadcast %cst_90 : f32 to vector<8x128xf32>
    %335 = arith.addf %333, %334 : vector<8x128xf32>
    %336 = tpu.reciprocal %335 {approx = true} : vector<8x128xf32> -> vector<8x128xf32>
    %337 = arith.mulf %330, %336 : vector<8x128xf32>
    %338 = arith.subf %217, %221 : vector<8x128xf32>
    %339 = arith.mulf %337, %325 : vector<8x128xf32>
    %340 = arith.subf %338, %339 : vector<8x128xf32>
    %cst_91 = arith.constant -1.000000e+00 : f32
    %cst_92 = arith.constant 1.000000e+00 : f32
    %341 = vector.broadcast %cst_91 : f32 to vector<8x128xf32>
    %342 = arith.maximumf %341, %340 : vector<8x128xf32>
    %343 = vector.broadcast %cst_92 : f32 to vector<8x128xf32>
    %344 = arith.minimumf %343, %342 : vector<8x128xf32>
    %cst_93 = arith.constant 1.000000e+00 : f32
    %345 = vector.broadcast %cst_93 : f32 to vector<8x128xf32>
    %346 = arith.subf %345, %344 : vector<8x128xf32>
    %cst_94 = arith.constant 0.000000e+00 : f32
    %347 = vector.broadcast %cst_94 : f32 to vector<8x128xf32>
    %348 = arith.select %8, %346, %347 : vector<8x128xi1>, vector<8x128xf32>
    %349 = vector.shape_cast %348 : vector<8x128xf32> to vector<1x8x128xf32>
    %cst_95 = arith.constant dense<0.000000e+00> : vector<1xf32>
    %350 = vector.multi_reduction <add>, %349, %cst_95 [1, 2] : vector<1x8x128xf32> to vector<1xf32>
    %351 = vector.shape_cast %350 : vector<1xf32> to vector<1x1x1xf32>
    %352 = vector.extract %351[0, 0, 0] : f32 from vector<1x1x1xf32>
    %353 = tpu.iota {dimensions = array<i32: 2>} : vector<1x8x128xi32>
    %c0_i32_96 = arith.constant 0 : i32
    %354 = vector.broadcast %c0_i32_96 : i32 to vector<1x8x128xi32>
    %355 = arith.cmpi eq, %353, %354 : vector<1x8x128xi32>
    %c1_i32_97 = arith.constant 1 : i32
    %356 = vector.broadcast %c1_i32_97 : i32 to vector<1x8x128xi32>
    %357 = arith.cmpi eq, %353, %356 : vector<1x8x128xi32>
    %c2_i32_98 = arith.constant 2 : i32
    %358 = vector.broadcast %c2_i32_98 : i32 to vector<1x8x128xi32>
    %359 = arith.cmpi eq, %353, %358 : vector<1x8x128xi32>
    %cst_99 = arith.constant 0.000000e+00 : f32
    %360 = vector.broadcast %352 : f32 to vector<1x8x128xf32>
    %361 = vector.broadcast %cst_99 : f32 to vector<1x8x128xf32>
    %362 = arith.select %359, %360, %361 : vector<1x8x128xi1>, vector<1x8x128xf32>
    %363 = vector.broadcast %106 : f32 to vector<1x8x128xf32>
    %364 = arith.select %357, %363, %362 : vector<1x8x128xi1>, vector<1x8x128xf32>
    %365 = vector.broadcast %89 : f32 to vector<1x8x128xf32>
    %366 = arith.select %355, %365, %364 : vector<1x8x128xi1>, vector<1x8x128xf32>
    %c0_100 = arith.constant 0 : index
    %c0_101 = arith.constant 0 : index
    %c0_102 = arith.constant 0 : index
    %367 = vector.load %arg6[%c0_100, %c0_101, %c0_102] : memref<1x8x128xf32, #tpu.memory_space<vmem>>, vector<1x8x128xf32>
    tpu.vector_store %arg6[%c0_100, %c0_101, %c0_102], %366 {strides = array<i32>} : memref<1x8x128xf32, #tpu.memory_space<vmem>>, vector<1x8x128xf32>,
    return
  }
  func.func @transform_0(%arg0: i32) -> (i32, i32, i32) {
    %c0_i32 = arith.constant 0 : i32
    %c0_i32_0 = arith.constant 0 : i32
    %c0_i32_1 = arith.constant 0 : i32
    return %c0_i32, %arg0, %c0_i32_0 : i32, i32, i32
  }
  func.func @transform_1(%arg0: i32) -> (i32, i32) {
    %c0_i32 = arith.constant 0 : i32
    %c0_i32_0 = arith.constant 0 : i32
    return %arg0, %c0_i32 : i32, i32
  }
  func.func @transform_2(%arg0: i32) -> (i32, i32, i32) {
    %c0_i32 = arith.constant 0 : i32
    %c0_i32_0 = arith.constant 0 : i32
    %c0_i32_1 = arith.constant 0 : i32
    return %c0_i32, %arg0, %c0_i32_0 : i32, i32, i32
  }
  func.func @transform_3(%arg0: i32) -> (i32, i32, i32) {
    %c0_i32 = arith.constant 0 : i32
    %c0_i32_0 = arith.constant 0 : i32
    %c0_i32_1 = arith.constant 0 : i32
    return %c0_i32, %arg0, %c0_i32_0 : i32, i32, i32
  }
  func.func @transform_4(%arg0: i32) -> (i32, i32) {
    %c0_i32 = arith.constant 0 : i32
    %c0_i32_0 = arith.constant 0 : i32
    %c0_i32_1 = arith.constant 0 : i32
    return %c0_i32, %c0_i32_0 : i32, i32
  }
  func.func @transform_5(%arg0: i32) -> (i32, i32, i32) {
    %c0_i32 = arith.constant 0 : i32
    %c0_i32_0 = arith.constant 0 : i32
    %c0_i32_1 = arith.constant 0 : i32
    return %arg0, %c0_i32, %c0_i32_0 : i32, i32, i32
  }
}

</mosaic_0001>

<bundles_post_ra>
// kernel: multibox_loss_forward.1
= control target key start
LH: loop header
LB: loop body
LE: loop exit
PB: predicated region body
PF: predicated region fallthrough
CT: control target
= control target key end

     0   :  { %v87_v0 = vlaneseq  ;;  %s3605_s0 = inlined_call_operand.vmem [shape: f32[8,8,128], index: 0, kind: input, shape index: {}]   ;;  %s3606_s1 = inlined_call_operand.vmem [shape: s32[8,128], index: 1, kind: input, shape index: {}]   ;;  %s3607_s4 = inlined_call_operand.vmem [shape: f32[4,128], index: 4, kind: input, shape index: {}]   ;;  %s3608_s2 = inlined_call_operand.vmem [shape: f32[8,8,128], index: 2, kind: input, shape index: {}]   ;;  %s3609_s3 = inlined_call_operand.vmem [shape: f32[8,8,128], index: 3, kind: input, shape index: {}]   ;;  %s3610_s5 = inlined_call_operand.vmem [shape: f32[1,8,128], index: 5, kind: output, shape index: {}]  }
   0x1   :  { %v21_v1 = vld [vmem:[%s3605_s0] sm:$0xff]  ;;  %v22_v2 = vld [vmem:[%s3605_s0 + $0x8] sm:$0xff]  ;;  %v23_v3 = vld [vmem:[%s3605_s0 + $0x10] sm:$0xff] }
   0x2   :  { %v2326_v4 = vshrl.u32 %v87_v0, 7  ;;  %v24_v5 = vld [vmem:[%s3605_s0 + $0x18] sm:$0xff]  ;;  %v51_v6 = vmax.f32 %v21_v1, %v22_v2  ;;  %v2346_v20 = vld [vmem:[%s3606_s1] sm:$0xff]  ;;  %v2352_v33 = vand.u32 127, %v87_v0 }
   0x3   :  { %v52_v7 = vmax.f32 %v23_v3, %v24_v5  ;;  %3619 = vst [vmem:[#allocation2_spill] sm:$0xff] %v2346_v20  ;;  %vm72_vm0 = vcmp.eq.s32.totalorder %v2346_v20, 0  ;;  %vm75_vm1 = vcmp.eq.s32.totalorder %v2346_v20, 1  ;;  %vm78_vm2 = vcmp.eq.s32.totalorder %v2346_v20, 2 }
   0x4   :  { %v2332_v8 = vadd.s32 32, %v2326_v4  ;;  %v2336_v10 = vadd.s32 16, %v2326_v4  ;;  %v2340_v15 = vadd.s32 8, %v2326_v4  ;;  %v73_v27 = vsel %vm72_vm0, %v21_v1, 0.0  ;;  %3620 = vst [vmem:[#allocation3_spill] sm:$0xff] %v2352_v33 }
   0x5   :  { %v53_v9 = vmax.f32 %v51_v6, %v52_v7  ;;  %v76_v28 = vsel %vm75_vm1, %v22_v2, 0.0  ;;  %v79_v31 = vsel %vm78_vm2, %v23_v3, 0.0  ;;  %vm81_vm3 = vcmp.eq.s32.totalorder %v2346_v20, 3 }
   0x6   :  { %2141 = vset.pattern.permute.xlu2 %v2332_v8  ;;  %2139 = vset.pattern.permute.xlu1 %v2336_v10  ;;  %v77_v30 = vadd.f32 %v76_v28, %v73_v27  ;;  %v82_v34 = vsel %vm81_vm3, %v24_v5, 0.0  ;;  %v89_v38 = vcvt.s32.f32 %v2352_v33  ;;  %vm48_vm4 = vcmp.gt.s32.totalorder %v2346_v20, 0 }
   0x7   :  { %v54_v11 = vsub.f32 %v21_v1, %v53_v9  ;;  %v55_v12 = vsub.f32 %v22_v2, %v53_v9  ;;  %v56_v13 = vsub.f32 %v23_v3, %v53_v9  ;;  %v57_v14 = vsub.f32 %v24_v5, %v53_v9  ;;  %2138 = vset.pattern.permute.xlu0 %v2340_v15 }
   0x8   :  { %v80_v32 = vadd.f32 %v79_v31, %v77_v30  ;;  %vm47_vm5 = vcmp.ge.s32.totalorder %v2346_v20, 0  ;;  %v90_v41 = vmul.f32 1e-06, %v89_v38  ;;  %v2373_v46 = vadd.s32 40, %v2326_v4 }
   0x9   :  { %v58_v16 = vmul.f32 1.442695, %v54_v11  ;;  %v60_v17 = vmul.f32 1.442695, %v55_v12  ;;  %v62_v18 = vmul.f32 1.442695, %v56_v13 }
   0xa   :  { %v64_v19 = vmul.f32 1.442695, %v57_v14  ;;  %v83_v37 = vadd.f32 %v82_v34, %v80_v32  ;;  %v2376_v47 = vadd.s32 24, %v2326_v4  ;;  %v2379_v48 = vadd.s32 64, %v2326_v4 }
   0xb   :  { %2254 = vpow2.f32 %v58_v16  ;;  %v2388_v49 = vadd.s32 56, %v2326_v4  ;;  %v2391_v50 = vadd.s32 48, %v2326_v4  ;;  %v2403_v52 = vadd.s32 80, %v2326_v4 }
   0xc   :  { %2256 = vpow2.f32 %v60_v17  ;;  %v2406_v53 = vadd.s32 72, %v2326_v4  ;;  %v2415_v54 = vadd.s32 96, %v2326_v4  ;;  %v2418_v55 = vadd.s32 88, %v2326_v4 }
   0xd   :  { %2258 = vpow2.f32 %v62_v18  ;;  %v2427_v56 = vadd.s32 120, %v2326_v4  ;;  %v2430_v57 = vadd.s32 112, %v2326_v4  ;;  %v2282_v6 = vmov 0.0  }
   0xe   :  { %2260 = vpow2.f32 %v64_v19  ;;  %v2499_v14 = vadd.s32 104, %v2326_v4 }
  0x11   :  { %v2255_v21 = vpop.eup %2254 }
  0x12   :  { %v2257_v22 = vpop.eup %2256 }
  0x13   :  { %v2259_v23 = vpop.eup %2258  ;;  %v66_v24 = vadd.f32 %v2257_v22, %v2255_v21 }
  0x14   :  { %v2261_v25 = vpop.eup %2260 }
  0x15   :  { %v67_v26 = vadd.f32 %v2259_v23, %v66_v24 }
  0x17   :  { %v68_v29 = vadd.f32 %v2261_v25, %v67_v26 }
  0x19   :  { %2262 = vlog2.f32 %v68_v29 }
  0x1f   :  { %v2263_v35 = vpop.eup %2262 }
  0x20   :  { %v70_v36 = vmul.f32 0.6931472, %v2263_v35 }
  0x22   :  { %v71_v39 = vadd.f32 %v70_v36, %v53_v9 }
  0x24   :  { %v2357_v40 = vsub.f32 %v71_v39, %v83_v37 }
  0x26   :  { %3621 = vst [vmem:[#allocation4_spill] sm:$0xff] %v2357_v40  ;;  %v85_v42 = vsel %vm48_vm4, 0.0, %v2357_v40 }
  0x27   :  { %v86_v43 = vsel %vm47_vm5, %v85_v42, -1e+30 }
  0x28   :  { %v2364_v44 = vsub.f32 %v86_v43, %v90_v41 }
  0x2a   :  { %v2367_v45 = vperm.slane %v2364_v44, 0  ;;  %v2397_v51 = vperm.slane %v2364_v44, 2  ;;  %v2439_v58 = vperm.slane %v2364_v44, 3  ;;  %v2445_v59 = vperm.slane %v2364_v44, 1 }
  0x2b   :  { %v2451_v60 = vperm.slane %v2364_v44, 4  ;;  %v2460_v61 = vperm.slane %v2364_v44, 6  ;;  %v2504_v18 = vperm.slane %v2364_v44, 7  ;;  %v2527_v26 = vperm.slane %v2364_v44, 5 }
  0x2c   :  { %121 = vperm.xlu2 %2141, %v2367_v45   ;;  %109 = vperm.xlu1 %2139, %v2367_v45   ;;  %v869_v31 = vrot.slane %v2364_v44, 1 }
  0x2d   :  { %103 = vperm.xlu0 %2138, %v2367_v45   ;;  %3622 = vst [vmem:[#allocation5_spill] sm:$0xff] %v2460_v61 }
  0x2e   :  { %v2538_v37 = vperm.slane %v869_v31, 0 }
  0x34   :  { %2142 = vset.pattern.permute.xlu2 %v2373_v46  ;;  %2140 = vset.pattern.permute.xlu1 %v2376_v47 }
  0x35   :  { %2145 = vset.pattern.permute.xlu0 %v2379_v48 }
  0x3c   :  { %127 = vperm.xlu2 %2142, %v2367_v45   ;;  %115 = vperm.xlu1 %2140, %v2367_v45  }
  0x3d   :  { %145 = vperm.xlu0 %2145, %v2367_v45  }
  0x44   :  { %2144 = vset.pattern.permute.xlu2 %v2388_v49  ;;  %2143 = vset.pattern.permute.xlu1 %v2391_v50 }
  0x45   :  { %2166 = vset.pattern.permute.xlu0 %v2340_v15 }
  0x4c   :  { %139 = vperm.xlu2 %2144, %v2367_v45   ;;  %133 = vperm.xlu1 %2143, %v2367_v45  }
  0x4d   :  { %297 = vperm.xlu0 %2166, %v2397_v51  }
  0x54   :  { %2147 = vset.pattern.permute.xlu2 %v2403_v52  ;;  %2146 = vset.pattern.permute.xlu1 %v2406_v53 }
  0x55   :  { %2171 = vset.pattern.permute.xlu0 %v2391_v50 }
  0x5c   :  { %157 = vperm.xlu2 %2147, %v2367_v45   ;;  %151 = vperm.xlu1 %2146, %v2367_v45  }
  0x5d   :  { %327 = vperm.xlu0 %2171, %v2397_v51  }
  0x64   :  { %2149 = vset.pattern.permute.xlu2 %v2415_v54  ;;  %2148 = vset.pattern.permute.xlu1 %v2418_v55 }
  0x65   :  { %2176 = vset.pattern.permute.xlu0 %v2418_v55 }
  0x6c   :  { %169 = vperm.xlu2 %2149, %v2367_v45   ;;  %163 = vperm.xlu1 %2148, %v2367_v45  }
  0x6d   :  { %357 = vperm.xlu0 %2176, %v2397_v51  }
  0x74   :  { %2151 = vset.pattern.permute.xlu2 %v2427_v56  ;;  %2150 = vset.pattern.permute.xlu1 %v2430_v57 }
  0x75   :  { %2177 = vset.pattern.permute.xlu0 %v2326_v4 }
  0x7c   :  { %187 = vperm.xlu2 %2151, %v2367_v45   ;;  %181 = vperm.xlu1 %2150, %v2367_v45  }
  0x7d   :  { %97 = vperm.xlu0 %2177, %v2367_v45  }
  0x84   :  { %2153 = vset.pattern.permute.xlu2 %v2340_v15  ;;  %2152 = vset.pattern.permute.xlu1 %v2326_v4 }
  0x85   :  { %388 = vperm.xlu0 %2177, %v2439_v58  }
  0x86   :  { %v2473_v63 = vpop.permute.xlu2 %121 }
  0x87   :  { %vm896_vm3 = vcmp.gt.f32.partialorder %v2473_v63, %v2367_v45 }
  0x8c   :  { %200 = vperm.xlu2 %2153, %v2445_v59   ;;  %194 = vperm.xlu1 %2152, %v2445_v59  }
  0x8d   :  { %2202 = vset.pattern.permute.xlu0 %v2406_v53 }
  0x94   :  { %2155 = vset.pattern.permute.xlu2 %v2332_v8  ;;  %2154 = vset.pattern.permute.xlu1 %v2376_v47 }
  0x95   :  { %539 = vperm.xlu0 %2202, %v2451_v60  }
  0x96   :  { %v2482_v2 = vpop.permute.xlu2 %127 }
  0x9c   :  { %218 = vperm.xlu2 %2155, %v2445_v59   ;;  %212 = vperm.xlu1 %2154, %v2445_v59  }
  0x9d   :  { %2207 = vset.pattern.permute.xlu0 %v2430_v57 }
  0x9e   :  { %v2471_v62 = vpop.permute.xlu1 %109 }
  0x9f   :  { %v2475_v0 = vpop.permute.xlu0 %103 }
  0xa0   :  { %3623 = vst [vmem:[#allocation6_spill] sm:$0xff] %v2475_v0 }
  0xa4   :  { %2157 = vset.pattern.permute.xlu2 %v2391_v50  ;;  %2156 = vset.pattern.permute.xlu1 %v2373_v46 }
  0xa5   :  { %763 = vperm.xlu0 %2207, %v2460_v61  }
  0xa6   :  { %v2491_v9 = vpop.permute.xlu2 %139 }
  0xac   :  { %230 = vperm.xlu2 %2157, %v2445_v59   ;;  %224 = vperm.xlu1 %2156, %v2445_v59  }
  0xad   :  { %2208 = vset.pattern.permute.xlu0 %v2427_v56 }
  0xae   :  { %v2480_v1 = vpop.permute.xlu1 %115 }
  0xaf   :  { %v146_v3 = vpop.permute.xlu0 %145 }
  0xb0   :  { %vm900_vm6 = vcmp.gt.f32.partialorder %v146_v3, %v2367_v45 }
  0xb1   :  { %v1028_v7 = vsel %vm900_vm6, 1.0, %v2282_v6 }
  0xb2   :  { %v1156_v11 = vpack.c.bf16 %v1028_v7, %v1028_v7 }
  0xb4   :  { %2159 = vset.pattern.permute.xlu2 %v2406_v53  ;;  %2158 = vset.pattern.permute.xlu1 %v2379_v48  ;;  %v2501_v17 = vunpack.c.l.b16 %v1156_v11 }
  0xb5   :  { %478 = vperm.xlu0 %2208, %v2439_v58  }
  0xb6   :  { %v2508_v21 = vpop.permute.xlu2 %157 }
  0xb7   :  { %vm902_vm2 = vcmp.gt.f32.partialorder %v2508_v21, %v2367_v45 }
  0xbc   :  { %248 = vperm.xlu2 %2159, %v2445_v59   ;;  %242 = vperm.xlu1 %2158, %v2445_v59  }
  0xbd   :  { %575 = vperm.xlu0 %2208, %v2451_v60  }
  0xbe   :  { %v2487_v5 = vpop.permute.xlu1 %133 }
  0xbf   :  { %v2529_v27 = vpop.permute.xlu0 %297 }
  0xc4   :  { %2161 = vset.pattern.permute.xlu2 %v2418_v55  ;;  %2160 = vset.pattern.permute.xlu1 %v2403_v52 }
  0xc5   :  { %2211 = vset.pattern.permute.xlu0 %v2415_v54 }
  0xc6   :  { %v2517_v23 = vpop.permute.xlu2 %169 }
  0xc7   :  { %vm904_vm0 = vcmp.gt.f32.partialorder %v2517_v23, %v2367_v45  ;;  %v1030_v23 = vsel %vm902_vm2, 1.0, %v2282_v6  ;;  %vm894_vm2 = vcmp.gt.f32.partialorder %v2471_v62, %v2367_v45 }
  0xc8   :  { %v1158_v0 = vpack.c.bf16 %v1030_v23, %v1030_v23 }
  0xcc   :  { %260 = vperm.xlu2 %2161, %v2445_v59   ;;  %254 = vperm.xlu1 %2160, %v2445_v59  }
  0xcd   :  { %266 = vperm.xlu0 %2211, %v2445_v59  }
  0xce   :  { %v152_v12 = vpop.permute.xlu1 %151 }
  0xcf   :  { %vm901_vm7 = vcmp.gt.f32.partialorder %v152_v12, %v2367_v45  ;;  %v2540_v38 = vpop.permute.xlu0 %327 }
  0xd0   :  { %v1029_v13 = vsel %vm901_vm7, 1.0, %v2282_v6 }
  0xd1   :  { %v1157_v16 = vpack.c.bf16 %v1029_v13, %v1029_v13 }
  0xd3   :  { %v2506_v19 = vunpack.c.l.b16 %v1157_v16 }
  0xd4   :  { %2163 = vset.pattern.permute.xlu2 %v2430_v57  ;;  %2162 = vset.pattern.permute.xlu1 %v2499_v14 }
  0xd5   :  { %848 = vperm.xlu0 %2211, %v2504_v18  }
  0xd6   :  { %v188_v24 = vpop.permute.xlu2 %187 }
  0xd7   :  { %vm907_vm8 = vcmp.gt.f32.partialorder %v188_v24, %v2367_v45 }
  0xd8   :  { %v1035_v28 = vsel %vm907_vm8, 1.0, %v2282_v6  ;;  %vm899_vm8 = vcmp.gt.f32.partialorder %v2491_v9, %v2367_v45 }
  0xd9   :  { %v1163_v29 = vpack.c.bf16 %v1035_v28, %v1035_v28 }
  0xdb   :  { %v1307_v35 = vunpack.c.l.b16 %v1163_v29 }
  0xdc   :  { %278 = vperm.xlu2 %2163, %v2445_v59   ;;  %272 = vperm.xlu1 %2162, %v2445_v59  }
  0xdd   :  { %2216 = vset.pattern.permute.xlu0 %v2499_v14 }
  0xde   :  { %v2523_v25 = vpop.permute.xlu1 %163 }
  0xdf   :  { %v2550_v3 = vpop.permute.xlu0 %357  ;;  %vm903_vm1 = vcmp.gt.f32.partialorder %v2523_v25, %v2367_v45 }
  0xe4   :  { %2165 = vset.pattern.permute.xlu2 %v2326_v4  ;;  %2164 = vset.pattern.permute.xlu1 %v2427_v56 }
  0xe5   :  { %175 = vperm.xlu0 %2216, %v2367_v45  }
  0xe6   :  { %v201_v39 = vpop.permute.xlu2 %200 }
  0xe7   :  { %vm909_vm10 = vcmp.gt.f32.partialorder %v201_v39, %v2538_v37 }
  0xe8   :  { %v1037_v42 = vsel %vm909_vm10, 1.0, %v2282_v6 }
  0xe9   :  { %v1165_v43 = vpack.c.bf16 %v1037_v42, %v1037_v42 }
  0xeb   :  { %v2554_v12 = vunpack.c.l.b16 %v1165_v43 }
  0xec   :  { %291 = vperm.xlu2 %2165, %v2397_v51   ;;  %284 = vperm.xlu1 %2164, %v2445_v59  }
  0xed   :  { %660 = vperm.xlu0 %2216, %v2527_v26  }
  0xee   :  { %v182_v30 = vpop.permute.xlu1 %181 }
  0xef   :  { %vm906_vm9 = vcmp.gt.f32.partialorder %v182_v30, %v2367_v45  ;;  %v2563_v28 = vpop.permute.xlu0 %97 }
  0xf0   :  { %v1034_v32 = vsel %vm906_vm9, 1.0, %v2282_v6  ;;  %3624 = vst [vmem:[#allocation7_spill] sm:$0xff] %v2563_v28 }
  0xf1   :  { %v1162_v34 = vpack.c.bf16 %v1034_v32, %v1034_v32 }
  0xf3   :  { %v1306_v36 = vunpack.c.l.b16 %v1162_v34 }
  0xf4   :  { %2168 = vset.pattern.permute.xlu2 %v2376_v47  ;;  %2167 = vset.pattern.permute.xlu1 %v2336_v10 }
  0xf5   :  { %2221 = vset.pattern.permute.xlu0 %v2403_v52  ;;  %v1315_v41 = vpack.c.b16 %v1307_v35, %v1306_v36 }
  0xf6   :  { %v219_v30 = vpop.permute.xlu2 %218 }
  0xf7   :  { %1324 = vmatpush.bf16.msra.mxu0 %v1315_v41  ;;  %v2568_v29 = vpop.permute.xlu0 %388  ;;  %vm912_vm12 = vcmp.gt.f32.partialorder %v219_v30, %v2538_v37 }
  0xf8   :  { %v1040_v34 = vsel %vm912_vm12, 1.0, %v2282_v6 }
  0xf9   :  { %v1168_v36 = vpack.c.bf16 %v1040_v34, %v1040_v34 }
  0xfb   :  { %v2584_v42 = vunpack.c.l.b16 %v1168_v36  ;;  %v870_v36 = vrot.slane %v2364_v44, 2 }
  0xfc   :  { %309 = vperm.xlu2 %2168, %v2397_v51   ;;  %303 = vperm.xlu1 %2167, %v2397_v51  }
  0xfd   :  { %448 = vperm.xlu0 %2221, %v2439_v58  }
  0xfe   :  { %v195_v7 = vpop.permute.xlu1 %194 }
  0xff   :  { %vm908_vm11 = vcmp.gt.f32.partialorder %v195_v7, %v2538_v37 }
 0x100   :  { %v1036_v11 = vsel %vm908_vm11, 1.0, %v2282_v6  ;;  %vm898_vm11 = vcmp.gt.f32.partialorder %v2487_v5, %v2367_v45 }
 0x101   :  { %v1164_v13 = vpack.c.bf16 %v1036_v11, %v1036_v11  ;;  %v1026_v23 = vsel %vm898_vm11, 1.0, %v2282_v6 }
 0x103   :  { %v2556_v16 = vunpack.c.l.b16 %v1164_v13 }
 0x104   :  { %2170 = vset.pattern.permute.xlu2 %v2373_v46  ;;  %2169 = vset.pattern.permute.xlu1 %v2332_v8 }
 0x105   :  { %642 = vperm.xlu0 %2221, %v2527_v26  }
 0x106   :  { %v2595_v13 = vpop.permute.xlu2 %230 }
 0x107   :  { %v2576_v32 = vpop.permute.xlu0 %539 }
 0x108   :  { %3625 = vst [vmem:[#allocation8_spill] sm:$0xff] %v2576_v32 }
 0x10c   :  { %321 = vperm.xlu2 %2170, %v2397_v51   ;;  %315 = vperm.xlu1 %2169, %v2397_v51  }
 0x10d   :  { %2226 = vset.pattern.permute.xlu0 %v2388_v49 }
 0x10e   :  { %v2573_v31 = vpop.permute.xlu1 %212 }
 0x114   :  { %2173 = vset.pattern.permute.xlu2 %v2379_v48  ;;  %2172 = vset.pattern.permute.xlu1 %v2388_v49 }
 0x115   :  { %236 = vperm.xlu0 %2226, %v2445_v59  }
 0x116   :  { %v2600_v30 = vpop.permute.xlu2 %248 }
 0x117   :  { %v2591_v7 = vpop.permute.xlu0 %763 }
 0x118   :  { %3626 = vst [vmem:[#allocation9_spill] sm:$0xff] %v2591_v7 }
 0x11c   :  { %339 = vperm.xlu2 %2173, %v2397_v51   ;;  %333 = vperm.xlu1 %2172, %v2397_v51  }
 0x11d   :  { %721 = vperm.xlu0 %2226, %v2460_v61  }
 0x11e   :  { %v225_v35 = vpop.permute.xlu1 %224 }
 0x11f   :  { %vm913_vm13 = vcmp.gt.f32.partialorder %v225_v35, %v2538_v37 }
 0x120   :  { %v1041_v39 = vsel %vm913_vm13, 1.0, %v2282_v6 }
 0x121   :  { %v1169_v41 = vpack.c.bf16 %v1041_v39, %v1041_v39 }
 0x123   :  { %v2586_v43 = vunpack.c.l.b16 %v1169_v41  ;;  %v2612_v41 = vperm.slane %v870_v36, 0 }
 0x124   :  { %2175 = vset.pattern.permute.xlu2 %v2403_v52  ;;  %2174 = vset.pattern.permute.xlu1 %v2406_v53 }
 0x125   :  { %2231 = vset.pattern.permute.xlu0 %v2332_v8  ;;  %vm925_vm14 = vcmp.gt.f32.partialorder %v2529_v27, %v2612_v41 }
 0x126   :  { %v2607_v35 = vpop.permute.xlu2 %260  ;;  %v1053_v11 = vsel %vm925_vm14, 1.0, %v2282_v6 }
 0x127   :  { %v2602_v34 = vpop.permute.xlu0 %478  ;;  %v1181_v33 = vpack.c.bf16 %v1053_v11, %v1053_v11  ;;  %vm919_vm12 = vcmp.gt.f32.partialorder %v2607_v35, %v2538_v37  ;;  %v1302_v35 = vunpack.c.l.b16 %v1158_v0 }
 0x128   :  { %3627 = vst [vmem:[#allocation10_spill] sm:$0xff] %v2602_v34 }
 0x129   :  { %v2627_v7 = vunpack.c.l.b16 %v1181_v33  ;;  %v1031_v33 = vsel %vm903_vm1, 1.0, %v2282_v6 }
 0x12c   :  { %351 = vperm.xlu2 %2175, %v2397_v51   ;;  %345 = vperm.xlu1 %2174, %v2397_v51  }
 0x12d   :  { %509 = vperm.xlu0 %2231, %v2451_v60  }
 0x12e   :  { %v2623_v36 = vpop.permute.xlu1 %242 }
 0x12f   :  { %v2610_v39 = vpop.permute.xlu0 %575  ;;  %vm916_vm1 = vcmp.gt.f32.partialorder %v2623_v36, %v2538_v37  ;;  %v3630_v36 = vpack.c.b16 %v2506_v19, %v2501_v17 }
 0x130   :  { %3628 = vst [vmem:[#allocation11_spill] sm:$0xff] %v2610_v39  ;;  %v2656_v39 = vsel %vm896_vm3, 1.0, %v2282_v6  ;;  %vm895_vm3 = vcmp.gt.f32.partialorder %v2480_v1, %v2367_v45 }
 0x131   :  { %v1152_v9 = vpack.c.bf16 %v2656_v39, %v2656_v39  ;;  %v1047_v39 = vsel %vm919_vm12, 1.0, %v2282_v6 }
 0x134   :  { %2179 = vset.pattern.permute.xlu2 %v2499_v14  ;;  %2178 = vset.pattern.permute.xlu1 %v2415_v54 }
 0x135   :  { %703 = vperm.xlu0 %2231, %v2460_v61  }
 0x136   :  { %v279_v24 = vpop.permute.xlu2 %278 }
 0x137   :  { %vm922_vm7 = vcmp.gt.f32.partialorder %v279_v24, %v2538_v37 }
 0x138   :  { %v1050_v24 = vsel %vm922_vm7, 1.0, %v2282_v6 }
 0x13c   :  { %369 = vperm.xlu2 %2179, %v2397_v51   ;;  %363 = vperm.xlu1 %2178, %v2397_v51  }
 0x13d   :  { %2236 = vset.pattern.permute.xlu0 %v2373_v46 }
 0x13e   :  { %v255_v28 = vpop.permute.xlu1 %254 }
 0x13f   :  { %v267_v22 = vpop.permute.xlu0 %266  ;;  %vm918_vm13 = vcmp.gt.f32.partialorder %v255_v28, %v2538_v37  ;;  %v1154_v28 = vpack.c.bf16 %v1026_v23, %v1026_v23 }
 0x140   :  { %vm920_vm9 = vcmp.gt.f32.partialorder %v267_v22, %v2538_v37 }
 0x141   :  { %v1048_v5 = vsel %vm920_vm9, 1.0, %v2282_v6 }
 0x144   :  { %2181 = vset.pattern.permute.xlu2 %v2427_v56  ;;  %2180 = vset.pattern.permute.xlu1 %v2430_v57 }
 0x145   :  { %418 = vperm.xlu0 %2236, %v2439_v58  }
 0x146   :  { %v292_v40 = vpop.permute.xlu2 %291 }
 0x147   :  { %vm924_vm15 = vcmp.gt.f32.partialorder %v292_v40, %v2612_v41  ;;  %v2634_v11 = vpop.permute.xlu0 %848 }
 0x148   :  { %v1052_v20 = vsel %vm924_vm15, 1.0, %v2282_v6  ;;  %3629 = vst [vmem:[#allocation12_spill] sm:$0xff] %v2634_v11  ;;  %vm897_vm15 = vcmp.gt.f32.partialorder %v2482_v2, %v2367_v45 }
 0x149   :  { %v1180_v27 = vpack.c.bf16 %v1052_v20, %v1052_v20  ;;  %v1032_v20 = vsel %vm904_vm0, 1.0, %v2282_v6  ;;  %vm917_vm0 = vcmp.gt.f32.partialorder %v2600_v30, %v2538_v37  ;;  %v1025_v61 = vsel %vm897_vm15, 1.0, %v2282_v6 }
 0x14a   :  { %v1160_v25 = vpack.c.bf16 %v1032_v20, %v1032_v20  ;;  %v1045_v0 = vsel %vm917_vm0, 1.0, %v2282_v6  ;;  %v1044_v30 = vsel %vm916_vm1, 1.0, %v2282_v6  ;;  %vm930_vm1 = vcmp.gt.f32.partialorder %v2540_v38, %v2612_v41 }
 0x14b   :  { %v2629_v32 = vunpack.c.l.b16 %v1180_v27  ;;  %v1159_v27 = vpack.c.bf16 %v1031_v33, %v1031_v33  ;;  %v1027_v33 = vsel %vm899_vm8, 1.0, %v2282_v6  ;;  %vm914_vm8 = vcmp.gt.f32.partialorder %v2595_v13, %v2538_v37 }
 0x14c   :  { %381 = vperm.xlu2 %2181, %v2397_v51   ;;  %375 = vperm.xlu1 %2180, %v2397_v51   ;;  %v1304_v63 = vunpack.c.l.b16 %v1160_v25  ;;  %v1178_v25 = vpack.c.bf16 %v1050_v24, %v1050_v24  ;;  %v1046_v24 = vsel %vm918_vm13, 1.0, %v2282_v6  ;;  %vm935_vm13 = vcmp.gt.f32.partialorder %v2550_v3, %v2612_v41 }
 0x14d   :  { %806 = vperm.xlu0 %2236, %v2504_v18  }
 0x14e   :  { %v273_v40 = vpop.permute.xlu1 %272  ;;  %v1367_v2 = vunpack.c.l.b16 %v1178_v25  ;;  %v1153_v25 = vpack.c.bf16 %v1025_v61, %v1025_v61  ;;  %v1022_v61 = vsel %vm894_vm2, 1.0, %v2282_v6 }
 0x14f   :  { %vm921_vm10 = vcmp.gt.f32.partialorder %v273_v40, %v2538_v37  ;;  %v1150_v62 = vpack.c.bf16 %v1022_v61, %v1022_v61 }
 0x150   :  { %v1049_v22 = vsel %vm921_vm10, 1.0, %v2282_v6 }
 0x154   :  { %2183 = vset.pattern.permute.xlu2 %v2336_v10  ;;  %2182 = vset.pattern.permute.xlu1 %v2340_v15 }
 0x155   :  { %2241 = vset.pattern.permute.xlu0 %v2336_v10 }
 0x157   :  { %v176_v51 = vpop.permute.xlu0 %175 }
 0x158   :  { %vm905_vm6 = vcmp.gt.f32.partialorder %v176_v51, %v2367_v45  ;;  %v1303_v51 = vunpack.c.l.b16 %v1159_v27  ;;  %v1176_v27 = vpack.c.bf16 %v1048_v5, %v1048_v5  ;;  %v1174_v5 = vpack.c.bf16 %v1046_v24, %v1046_v24 }
 0x159   :  { %v1033_v21 = vsel %vm905_vm6, 1.0, %v2282_v6 }
 0x15a   :  { %v1161_v11 = vpack.c.bf16 %v1033_v21, %v1033_v21  ;;  %v1177_v21 = vpack.c.bf16 %v1049_v22, %v1049_v22  ;;  %v1365_v22 = vunpack.c.l.b16 %v1176_v27  ;;  %v1296_v27 = vunpack.c.l.b16 %v1152_v9 }
 0x15c   :  { %v1305_v20 = vunpack.c.l.b16 %v1161_v11  ;;  %400 = vperm.xlu2 %2183, %v2439_v58   ;;  %394 = vperm.xlu1 %2182, %v2439_v58  }
 0x15d   :  { %206 = vperm.xlu0 %2241, %v2445_v59  }
 0x15e   :  { %v285_v11 = vpop.permute.xlu1 %284  ;;  %v1314_v40 = vpack.c.b16 %v1305_v20, %v1304_v63  ;;  %v1155_v20 = vpack.c.bf16 %v1027_v33, %v1027_v33  ;;  %v1175_v33 = vpack.c.bf16 %v1047_v39, %v1047_v39  ;;  %v1023_v39 = vsel %vm895_vm3, 1.0, %v2282_v6 }
 0x15f   :  { %vm923_vm14 = vcmp.gt.f32.partialorder %v285_v11, %v2538_v37  ;;  %v1313_v11 = vpack.c.b16 %v1303_v51, %v1302_v35  ;;  %v310_v51 = vpop.permute.xlu2 %309  ;;  %v2715_v1 = vpop.permute.xlu0 %660  ;;  %v1151_v24 = vpack.c.bf16 %v1023_v39, %v1023_v39 }
 0x160   :  { %v1051_v59 = vsel %vm923_vm14, 1.0, %v2282_v6  ;;  %1325 = vmatpush.bf16.msra.mxu0 %v1314_v40  ;;  %v1366_v40 = vunpack.c.l.b16 %v1177_v21  ;;  %v1299_v35 = vunpack.c.l.b16 %v1155_v20  ;;  %vm927_vm6 = vcmp.gt.f32.partialorder %v310_v51, %v2612_v41 }
 0x161   :  { %v1179_v63 = vpack.c.bf16 %v1051_v59, %v1051_v59  ;;  %v1298_v59 = vunpack.c.l.b16 %v1154_v28  ;;  %v1172_v21 = vpack.c.bf16 %v1044_v30, %v1044_v30  ;;  %v1363_v20 = vunpack.c.l.b16 %v1174_v5 }
 0x162   :  { %v1375_v28 = vpack.c.b16 %v1366_v40, %v1365_v22  ;;  %v1297_v51 = vunpack.c.l.b16 %v1153_v25  ;;  %v1295_v22 = vunpack.c.l.b16 %v1151_v24 }
 0x163   :  { %v1368_v34 = vunpack.c.l.b16 %v1179_v63  ;;  %v1364_v63 = vunpack.c.l.b16 %v1175_v33  ;;  %v1361_v17 = vunpack.c.l.b16 %v1172_v21 }
 0x164   :  { %1326 = vmatpush.bf16.msra.mxu0 %v1313_v11  ;;  %2185 = vset.pattern.permute.xlu2 %v2332_v8  ;;  %v1311_v11 = vpack.c.b16 %v1299_v35, %v1298_v59  ;;  %v1310_v5 = vpack.c.b16 %v1297_v51, %v1296_v27  ;;  %v1042_v27 = vsel %vm914_vm8, 1.0, %v2282_v6  ;;  %v3631_v51 = vpack.c.b16 %v2586_v43, %v2584_v42 }
 0x165   :  { %2184 = vset.pattern.permute.xlu1 %v2376_v47  ;;  %v1376_v23 = vpack.c.b16 %v1368_v34, %v1367_v2  ;;  %788 = vperm.xlu0 %2241, %v2504_v18   ;;  %v1173_v34 = vpack.c.bf16 %v1045_v0, %v1045_v0  ;;  %v1055_v2 = vsel %vm927_vm6, 1.0, %v2282_v6  ;;  %v1374_v9 = vpack.c.b16 %v1364_v63, %v1363_v20 }
 0x166   :  { %v1183_v19 = vpack.c.bf16 %v1055_v2, %v1055_v2  ;;  %v1170_v63 = vpack.c.bf16 %v1042_v27, %v1042_v27 }
 0x167   :  { %1385 = vmatpush.bf16.msra.mxu1 %v1376_v23  ;;  %v1362_v0 = vunpack.c.l.b16 %v1173_v34  ;;  %v1294_v23 = vunpack.c.l.b16 %v1150_v62  ;;  %v2748_v2 = vpop.permute.xlu2 %321 }
 0x168   :  { %1327 = vmatpush.bf16.msra.mxu0 %v3630_v36  ;;  %v2723_v25 = vunpack.c.l.b16 %v1183_v19  ;;  %v1359_v24 = vunpack.c.l.b16 %v1170_v63  ;;  %vm929_vm8 = vcmp.gt.f32.partialorder %v2748_v2, %v2612_v41 }
 0x169   :  { %v1373_v59 = vpack.c.b16 %v1362_v0, %v1361_v17  ;;  %v1309_v35 = vpack.c.b16 %v1295_v22, %v1294_v23  ;;  %v871_v23 = vrot.slane %v2364_v44, 3 }
 0x16b   :  { %1386 = vmatpush.bf16.msra.mxu1 %v1375_v28 }
 0x16c   :  { %1328 = vmatpush.bf16.msra.mxu0 %v1311_v11  ;;  %412 = vperm.xlu2 %2185, %v2439_v58  }
 0x16d   :  { %406 = vperm.xlu1 %2184, %v2439_v58   ;;  %2250 = vset.pattern.permute.xlu0 %v2376_v47 }
 0x16e   :  { %v304_v33 = vpop.permute.xlu1 %303 }
 0x16f   :  { %vm926_vm7 = vcmp.gt.f32.partialorder %v304_v33, %v2612_v41  ;;  %1387 = vmatpush.bf16.msra.mxu1 %v1374_v9  ;;  %v2727_v61 = vpop.permute.xlu0 %448 }
 0x170   :  { %v1054_v40 = vsel %vm926_vm7, 1.0, %v2282_v6  ;;  %1329 = vmatpush.bf16.msra.mxu0 %v1310_v5  ;;  %vm911_vm7 = vcmp.gt.f32.partialorder %v2573_v31, %v2538_v37 }
 0x171   :  { %v1182_v30 = vpack.c.bf16 %v1054_v40, %v1054_v40 }
 0x173   :  { %v2725_v39 = vunpack.c.l.b16 %v1182_v30  ;;  %1388 = vmatpush.bf16.msra.mxu1 %v1373_v59  ;;  %v2783_v59 = vperm.slane %v871_v23, 0 }
 0x174   :  { %1330 = vmatpush.bf16.msra.mxu0 %v1309_v35  ;;  %2187 = vset.pattern.permute.xlu2 %v2388_v49 }
 0x175   :  { %2186 = vset.pattern.permute.xlu1 %v2391_v50  ;;  %v1431_v34 = vpack.c.b16 %v2723_v25, %v2725_v39  ;;  %600 = vperm.xlu0 %2250, %v2527_v26   ;;  %vm940_vm2 = vcmp.gt.f32.partialorder %v2568_v29, %v2783_v59 }
 0x176   :  { %v2755_v62 = vpop.permute.xlu2 %339 }
 0x177   :  { %v2736_v36 = vpop.permute.xlu0 %642  ;;  %vm932_vm6 = vcmp.gt.f32.partialorder %v2755_v62, %v2612_v41  ;;  %v1039_v62 = vsel %vm911_vm7, 1.0, %v2282_v6 }
 0x17c   :  { %430 = vperm.xlu2 %2187, %v2439_v58  }
 0x17d   :  { %424 = vperm.xlu1 %2186, %v2439_v58   ;;  %2253 = vset.pattern.permute.xlu0 %v2427_v56 }
 0x17e   :  { %v2761_v17 = vpop.permute.xlu1 %315 }
 0x184   :  { %2189 = vset.pattern.permute.xlu2 %v2406_v53 }
 0x185   :  { %2188 = vset.pattern.permute.xlu1 %v2379_v48 }
 0x186   :  { %v352_v19 = vpop.permute.xlu2 %351 }
 0x187   :  { %v237_v21 = vpop.permute.xlu0 %236  ;;  %vm934_vm14 = vcmp.gt.f32.partialorder %v352_v19, %v2612_v41 }
 0x188   :  { %vm915_vm9 = vcmp.gt.f32.partialorder %v237_v21, %v2538_v37  ;;  %v1062_v3 = vsel %vm934_vm14, 1.0, %v2282_v6 }
 0x189   :  { %v1043_v20 = vsel %vm915_vm9, 1.0, %v2282_v6  ;;  %v1190_v23 = vpack.c.bf16 %v1062_v3, %v1062_v3  ;;  %v1060_v3 = vsel %vm932_vm6, 1.0, %v2282_v6 }
 0x18a   :  { %v1171_v28 = vpack.c.bf16 %v1043_v20, %v1043_v20 }
 0x18c   :  { %v1360_v11 = vunpack.c.l.b16 %v1171_v28  ;;  %442 = vperm.xlu2 %2189, %v2439_v58   ;;  %v1063_v28 = vsel %vm935_vm13, 1.0, %v2282_v6 }
 0x18d   :  { %436 = vperm.xlu1 %2188, %v2439_v58  }
 0x18e   :  { %v1372_v13 = vpack.c.b16 %v1360_v11, %v1359_v24  ;;  %v2765_v42 = vpop.permute.xlu1 %333 }
 0x18f   :  { %v2759_v0 = vpop.permute.xlu0 %721  ;;  %vm931_vm9 = vcmp.gt.f32.partialorder %v2765_v42, %v2612_v41 }
 0x190   :  { %1389 = vmatpush.bf16.msra.mxu1 %v1372_v13 }
 0x194   :  { %1390 = vmatpush.bf16.msra.mxu1 %v3631_v51  ;;  %2191 = vset.pattern.permute.xlu2 %v2415_v54 }
 0x195   :  { %2190 = vset.pattern.permute.xlu1 %v2418_v55 }
 0x196   :  { %v370_v9 = vpop.permute.xlu2 %369 }
 0x197   :  { %vm937_vm11 = vcmp.gt.f32.partialorder %v370_v9, %v2612_v41  ;;  %v1191_v9 = vpack.c.bf16 %v1063_v28, %v1063_v28 }
 0x198   :  { %v1065_v27 = vsel %vm937_vm11, 1.0, %v2282_v6  ;;  %vm928_vm11 = vcmp.gt.f32.partialorder %v2761_v17, %v2612_v41 }
 0x199   :  { %v1193_v11 = vpack.c.bf16 %v1065_v27, %v1065_v27  ;;  %v1425_v29 = vunpack.c.l.b16 %v1191_v9 }
 0x19c   :  { %460 = vperm.xlu2 %2191, %v2439_v58  }
 0x19d   :  { %454 = vperm.xlu1 %2190, %v2439_v58  }
 0x19e   :  { %v346_v33 = vpop.permute.xlu1 %345 }
 0x19f   :  { %v2767_v43 = vpop.permute.xlu0 %509  ;;  %vm933_vm3 = vcmp.gt.f32.partialorder %v346_v33, %v2612_v41  ;;  %v1068_v33 = vsel %vm940_vm2, 1.0, %v2282_v6 }
 0x1a4   :  { %2193 = vset.pattern.permute.xlu2 %v2430_v57 }
 0x1a5   :  { %2192 = vset.pattern.permute.xlu1 %v2499_v14 }
 0x1a6   :  { %v382_v22 = vpop.permute.xlu2 %381 }
 0x1a7   :  { %v2771_v5 = vpop.permute.xlu0 %703  ;;  %vm939_vm10 = vcmp.gt.f32.partialorder %v382_v22, %v2612_v41 }
 0x1a8   :  { %v1067_v30 = vsel %vm939_vm10, 1.0, %v2282_v6 }
 0x1a9   :  { %v1195_v35 = vpack.c.bf16 %v1067_v30, %v1067_v30  ;;  %v1427_v30 = vunpack.c.l.b16 %v1193_v11 }
 0x1ab   :  { %v1429_v19 = vunpack.c.l.b16 %v1195_v35 }
 0x1ac   :  { %472 = vperm.xlu2 %2193, %v2439_v58  }
 0x1ad   :  { %466 = vperm.xlu1 %2192, %v2439_v58  }
 0x1ae   :  { %v364_v40 = vpop.permute.xlu1 %363 }
 0x1af   :  { %vm936_vm12 = vcmp.gt.f32.partialorder %v364_v40, %v2612_v41 }
 0x1b0   :  { %v1064_v21 = vsel %vm936_vm12, 1.0, %v2282_v6 }
 0x1b1   :  { %v1192_v13 = vpack.c.bf16 %v1064_v21, %v1064_v21  ;;  %v1058_v21 = vsel %vm930_vm1, 1.0, %v2282_v6  ;;  %vm950_vm1 = vcmp.gt.f32.partialorder %v2727_v61, %v2783_v59 }
 0x1b2   :  { %v1186_v42 = vpack.c.bf16 %v1058_v21, %v1058_v21 }
 0x1b4   :  { %2195 = vset.pattern.permute.xlu2 %v2340_v15 }
 0x1b5   :  { %2194 = vset.pattern.permute.xlu1 %v2326_v4 }
 0x1b6   :  { %v2789_v20 = vpop.permute.xlu2 %400 }
 0x1b7   :  { %v419_v58 = vpop.permute.xlu0 %418 }
 0x1b8   :  { %vm945_vm0 = vcmp.gt.f32.partialorder %v419_v58, %v2783_v59  ;;  %v1426_v58 = vunpack.c.l.b16 %v1192_v13 }
 0x1b9   :  { %v1073_v22 = vsel %vm945_vm0, 1.0, %v2282_v6 }
 0x1ba   :  { %v1201_v35 = vpack.c.bf16 %v1073_v22, %v1073_v22  ;;  %v1059_v22 = vsel %vm931_vm9, 1.0, %v2282_v6 }
 0x1bc   :  { %491 = vperm.xlu2 %2195, %v2451_v60  }
 0x1bd   :  { %485 = vperm.xlu1 %2194, %v2451_v60  }
 0x1be   :  { %v376_v63 = vpop.permute.xlu1 %375 }
 0x1bf   :  { %vm938_vm15 = vcmp.gt.f32.partialorder %v376_v63, %v2612_v41  ;;  %v2806_v27 = vpop.permute.xlu0 %806  ;;  %v1061_v63 = vsel %vm933_vm3, 1.0, %v2282_v6 }
 0x1c0   :  { %v1066_v24 = vsel %vm938_vm15, 1.0, %v2282_v6  ;;  %v1189_v13 = vpack.c.bf16 %v1061_v63, %v1061_v63 }
 0x1c1   :  { %v1194_v51 = vpack.c.bf16 %v1066_v24, %v1066_v24  ;;  %v1424_v24 = vunpack.c.l.b16 %v1190_v23  ;;  %v1057_v23 = vsel %vm929_vm8, 1.0, %v2282_v6 }
 0x1c2   :  { %v1185_v17 = vpack.c.bf16 %v1057_v23, %v1057_v23 }
 0x1c3   :  { %v1428_v40 = vunpack.c.l.b16 %v1194_v51  ;;  %v2825_v51 = vunpack.c.l.b16 %v1201_v35  ;;  %v1423_v35 = vunpack.c.l.b16 %v1189_v13  ;;  %v1435_v21 = vpack.c.b16 %v1425_v29, %v1424_v24 }
 0x1c4   :  { %2197 = vset.pattern.permute.xlu2 %v2376_v47 }
 0x1c5   :  { %2196 = vset.pattern.permute.xlu1 %v2336_v10  ;;  %v1437_v38 = vpack.c.b16 %v1429_v19, %v1428_v40  ;;  %v1436_v19 = vpack.c.b16 %v1427_v30, %v1426_v58  ;;  %v1196_v40 = vpack.c.bf16 %v1068_v33, %v1068_v33  ;;  %v1056_v30 = vsel %vm928_vm11, 1.0, %v2282_v6 }
 0x1c6   :  { %v413_v28 = vpop.permute.xlu2 %412  ;;  %v1187_v58 = vpack.c.bf16 %v1059_v22, %v1059_v22  ;;  %v1420_v33 = vunpack.c.l.b16 %v1186_v42 }
 0x1c7   :  { %1446 = vmatpush.bf16.msra.mxu2 %v1437_v38  ;;  %vm944_vm10 = vcmp.gt.f32.partialorder %v413_v28, %v2783_v59  ;;  %v1188_v38 = vpack.c.bf16 %v1060_v3, %v1060_v3  ;;  %v1167_v3 = vpack.c.bf16 %v1039_v62, %v1039_v62  ;;  %v2846_v2 = vunpack.c.l.b16 %v1196_v40 }
 0x1c8   :  { %v1072_v11 = vsel %vm944_vm10, 1.0, %v2282_v6  ;;  %v1421_v29 = vunpack.c.l.b16 %v1187_v58 }
 0x1c9   :  { %v1200_v9 = vpack.c.bf16 %v1072_v11, %v1072_v11  ;;  %v1422_v11 = vunpack.c.l.b16 %v1188_v38  ;;  %v1356_v40 = vunpack.c.l.b16 %v1167_v3 }
 0x1cb   :  { %1447 = vmatpush.bf16.msra.mxu2 %v1436_v19  ;;  %v2828_v28 = vunpack.c.l.b16 %v1200_v9  ;;  %v1184_v19 = vpack.c.bf16 %v1056_v30, %v1056_v30  ;;  %v1434_v42 = vpack.c.b16 %v1423_v35, %v1422_v11  ;;  %v1433_v30 = vpack.c.b16 %v1421_v29, %v1420_v33 }
 0x1cc   :  { %503 = vperm.xlu2 %2197, %v2451_v60   ;;  %v3633_v33 = vpack.c.b16 %v2627_v7, %v2629_v32  ;;  %v3634_v7 = vld [vmem:[#allocation10_spill] sm:$0xff] }
 0x1cd   :  { %497 = vperm.xlu1 %2196, %v2451_v60   ;;  %v1493_v31 = vpack.c.b16 %v2825_v51, %v2828_v28  ;;  %v1418_v23 = vunpack.c.l.b16 %v1184_v19  ;;  %vm955_vm14 = vcmp.gt.f32.partialorder %v3634_v7, %v2783_v59 }
 0x1ce   :  { %v395_v63 = vpop.permute.xlu1 %394  ;;  %v1083_v39 = vsel %vm955_vm14, 1.0, %v2282_v6 }
 0x1cf   :  { %vm941_vm12 = vcmp.gt.f32.partialorder %v395_v63, %v2783_v59  ;;  %v207_v41 = vpop.permute.xlu0 %206  ;;  %1448 = vmatpush.bf16.msra.mxu2 %v1435_v21  ;;  %v1419_v21 = vunpack.c.l.b16 %v1185_v17  ;;  %v3632_v63 = vpack.c.b16 %v2554_v12, %v2556_v16 }
 0x1d0   :  { %v1069_v13 = vsel %vm941_vm12, 1.0, %v2282_v6  ;;  %vm910_vm13 = vcmp.gt.f32.partialorder %v207_v41, %v2538_v37  ;;  %vm942_vm12 = vcmp.gt.f32.partialorder %v2789_v20, %v2783_v59 }
 0x1d1   :  { %v1197_v24 = vpack.c.bf16 %v1069_v13, %v1069_v13  ;;  %v1038_v9 = vsel %vm910_vm13, 1.0, %v2282_v6  ;;  %v1432_v35 = vpack.c.b16 %v1419_v21, %v1418_v23 }
 0x1d2   :  { %v1166_v22 = vpack.c.bf16 %v1038_v9, %v1038_v9 }
 0x1d3   :  { %v2852_v62 = vunpack.c.l.b16 %v1197_v24  ;;  %1449 = vmatpush.bf16.msra.mxu2 %v1434_v42 }
 0x1d4   :  { %v1355_v38 = vunpack.c.l.b16 %v1166_v22  ;;  %2199 = vset.pattern.permute.xlu2 %v2391_v50  ;;  %v3635_v22 = vld [vmem:[#allocation5_spill] sm:$0xff] }
 0x1d5   :  { %2198 = vset.pattern.permute.xlu1 %v2373_v46  ;;  %v1491_v37 = vpack.c.b16 %v2852_v62, %v2846_v2 }
 0x1d6   :  { %v1370_v58 = vpack.c.b16 %v1356_v40, %v1355_v38  ;;  %v431_v12 = vpop.permute.xlu2 %430  ;;  %v1078_v40 = vsel %vm950_vm1, 1.0, %v2282_v6  ;;  %v872_v38 = vrot.slane %v2364_v44, 4 }
 0x1d7   :  { %1450 = vmatpush.bf16.msra.mxu2 %v1433_v30  ;;  %v1206_v30 = vpack.c.bf16 %v1078_v40, %v1078_v40  ;;  %vm947_vm8 = vcmp.gt.f32.partialorder %v431_v12, %v2783_v59 }
 0x1d8   :  { %1391 = vmatpush.bf16.msra.mxu1 %v1370_v58  ;;  %v2907_v7 = vperm.slane %v872_v38, 0 }
 0x1db   :  { %1451 = vmatpush.bf16.msra.mxu2 %v1432_v35 }
 0x1dc   :  { %1392 = vmatpush.bf16.msra.mxu1 %v3632_v63  ;;  %521 = vperm.xlu2 %2199, %v2451_v60  }
 0x1dd   :  { %515 = vperm.xlu1 %2198, %v2451_v60  }
 0x1df   :  { %1452 = vmatpush.bf16.msra.mxu2 %v1431_v34  ;;  %v2879_v25 = vpop.permute.xlu1 %406  ;;  %v1211_v34 = vpack.c.bf16 %v1083_v39, %v1083_v39 }
 0x1e0   :  { %vm943_vm11 = vcmp.gt.f32.partialorder %v2879_v25, %v2783_v59  ;;  %v1070_v25 = vsel %vm942_vm12, 1.0, %v2282_v6  ;;  %vm960_vm12 = vcmp.gt.f32.partialorder %v2767_v43, %v2907_v7 }
 0x1e1   :  { %v1490_v19 = vunpack.c.l.b16 %v1211_v34  ;;  %v1485_v34 = vunpack.c.l.b16 %v1206_v30  ;;  %v1071_v30 = vsel %vm943_vm11, 1.0, %v2282_v6  ;;  %v1088_v43 = vsel %vm960_vm12, 1.0, %v2282_v6 }
 0x1e3   :  { %1453 = vmatpush.bf16.msra.mxu2 %v3633_v33 }
 0x1e4   :  { %2201 = vset.pattern.permute.xlu2 %v2379_v48 }
 0x1e5   :  { %2200 = vset.pattern.permute.xlu1 %v2388_v49 }
 0x1e6   :  { %v443_v16 = vpop.permute.xlu2 %442 }
 0x1e7   :  { %vm949_vm3 = vcmp.gt.f32.partialorder %v443_v16, %v2783_v59 }
 0x1e8   :  { %v1077_v33 = vsel %vm949_vm3, 1.0, %v2282_v6 }
 0x1ec   :  { %533 = vperm.xlu2 %2201, %v2451_v60  }
 0x1ed   :  { %527 = vperm.xlu1 %2200, %v2451_v60  }
 0x1ef   :  { %v425_v11 = vpop.permute.xlu1 %424 }
 0x1f0   :  { %vm946_vm9 = vcmp.gt.f32.partialorder %v425_v11, %v2783_v59 }
 0x1f4   :  { %2204 = vset.pattern.permute.xlu2 %v2418_v55 }
 0x1f5   :  { %2203 = vset.pattern.permute.xlu1 %v2403_v52 }
 0x1f6   :  { %v461_v32 = vpop.permute.xlu2 %460 }
 0x1f7   :  { %vm952_vm0 = vcmp.gt.f32.partialorder %v461_v32, %v2783_v59 }
 0x1f8   :  { %v1080_v42 = vsel %vm952_vm0, 1.0, %v2282_v6 }
 0x1f9   :  { %v1208_v61 = vpack.c.bf16 %v1080_v42, %v1080_v42 }
 0x1fb   :  { %v1487_v16 = vunpack.c.l.b16 %v1208_v61 }
 0x1fc   :  { %551 = vperm.xlu2 %2204, %v2451_v60  }
 0x1fd   :  { %545 = vperm.xlu1 %2203, %v2451_v60  }
 0x1ff   :  { %v437_v24 = vpop.permute.xlu1 %436 }
 0x200   :  { %vm948_vm6 = vcmp.gt.f32.partialorder %v437_v24, %v2783_v59 }
 0x201   :  { %v1076_v32 = vsel %vm948_vm6, 1.0, %v2282_v6 }
 0x204   :  { %2206 = vset.pattern.permute.xlu2 %v2499_v14 }
 0x205   :  { %2205 = vset.pattern.permute.xlu1 %v2415_v54 }
 0x206   :  { %v473_v3 = vpop.permute.xlu2 %472 }
 0x207   :  { %vm954_vm15 = vcmp.gt.f32.partialorder %v473_v3, %v2783_v59  ;;  %v1075_v3 = vsel %vm947_vm8, 1.0, %v2282_v6 }
 0x208   :  { %v1082_v41 = vsel %vm954_vm15, 1.0, %v2282_v6  ;;  %v1203_v11 = vpack.c.bf16 %v1075_v3, %v1075_v3  ;;  %v3636_v3 = vld [vmem:[#allocation6_spill] sm:$0xff] }
 0x209   :  { %v1210_v17 = vpack.c.bf16 %v1082_v41, %v1082_v41  ;;  %v1205_v41 = vpack.c.bf16 %v1077_v33, %v1077_v33  ;;  %vm893_vm14 = vcmp.gt.f32.partialorder %v3636_v3, %v2367_v45 }
 0x20a   :  { %v1482_v38 = vunpack.c.l.b16 %v1203_v11 }
 0x20b   :  { %v1489_v13 = vunpack.c.l.b16 %v1210_v17  ;;  %v1204_v17 = vpack.c.bf16 %v1076_v32, %v1076_v32  ;;  %v1198_v32 = vpack.c.bf16 %v1070_v25, %v1070_v25 }
 0x20c   :  { %563 = vperm.xlu2 %2206, %v2451_v60  }
 0x20d   :  { %557 = vperm.xlu1 %2205, %v2451_v60   ;;  %v1498_v29 = vpack.c.b16 %v1490_v19, %v1489_v13  ;;  %v1483_v42 = vunpack.c.l.b16 %v1204_v17  ;;  %v1021_v17 = vsel %vm893_vm14, 1.0, %v2282_v6 }
 0x20f   :  { %1507 = vmatpush.bf16.msra.mxu3 %v1498_v29  ;;  %v455_v9 = vpop.permute.xlu1 %454  ;;  %v1074_v29 = vsel %vm946_vm9, 1.0, %v2282_v6 }
 0x210   :  { %vm951_vm2 = vcmp.gt.f32.partialorder %v455_v9, %v2783_v59  ;;  %v1202_v24 = vpack.c.bf16 %v1074_v29, %v1074_v29  ;;  %v1484_v9 = vunpack.c.l.b16 %v1205_v41  ;;  %v1477_v41 = vunpack.c.l.b16 %v1198_v32 }
 0x211   :  { %v1079_v21 = vsel %vm951_vm2, 1.0, %v2282_v6  ;;  %v1149_v29 = vpack.c.bf16 %v1021_v17, %v1021_v17 }
 0x212   :  { %v1207_v35 = vpack.c.bf16 %v1079_v21, %v1079_v21  ;;  %v1481_v21 = vunpack.c.l.b16 %v1202_v24  ;;  %v1495_v61 = vpack.c.b16 %v1484_v9, %v1483_v42 }
 0x214   :  { %2210 = vset.pattern.permute.xlu2 %v2430_v57  ;;  %v1486_v19 = vunpack.c.l.b16 %v1207_v35  ;;  %v1494_v20 = vpack.c.b16 %v1482_v38, %v1481_v21  ;;  %v3639_v21 = vld [vmem:[#allocation8_spill] sm:$0xff] }
 0x215   :  { %2209 = vset.pattern.permute.xlu1 %v2427_v56  ;;  %vm965_vm3 = vcmp.gt.f32.partialorder %v3639_v21, %v2907_v7 }
 0x216   :  { %v492_v12 = vpop.permute.xlu2 %491  ;;  %v1093_v3 = vsel %vm965_vm3, 1.0, %v2282_v6 }
 0x217   :  { %vm957_vm10 = vcmp.gt.f32.partialorder %v492_v12, %v2907_v7  ;;  %v3637_v12 = vld [vmem:[#allocation7_spill] sm:$0xff] }
 0x218   :  { %v1085_v40 = vsel %vm957_vm10, 1.0, %v2282_v6  ;;  %vm892_vm15 = vcmp.gt.f32.partialorder %v3637_v12, %v2367_v45  ;;  %v1293_v45 = vunpack.c.l.b16 %v1149_v29 }
 0x21c   :  { %860 = vperm.xlu2 %2210, %v2504_v18  }
 0x21d   :  { %769 = vperm.xlu1 %2209, %v3635_v22  }
 0x21f   :  { %v467_v23 = vpop.permute.xlu1 %466 }
 0x220   :  { %vm953_vm7 = vcmp.gt.f32.partialorder %v467_v23, %v2783_v59  ;;  %v1213_v23 = vpack.c.bf16 %v1085_v40, %v1085_v40 }
 0x221   :  { %v1081_v58 = vsel %vm953_vm7, 1.0, %v2282_v6 }
 0x222   :  { %v1209_v63 = vpack.c.bf16 %v1081_v58, %v1081_v58  ;;  %v2926_v33 = vunpack.c.l.b16 %v1213_v23 }
 0x224   :  { %v1488_v39 = vunpack.c.l.b16 %v1209_v63  ;;  %569 = vperm.xlu2 %2210, %v2451_v60   ;;  %v1496_v60 = vpack.c.b16 %v1486_v19, %v1485_v34  ;;  %v1199_v63 = vpack.c.bf16 %v1071_v30, %v1071_v30  ;;  %v1020_v19 = vsel %vm892_vm15, 1.0, %v2282_v6 }
 0x225   :  { %866 = vperm.xlu1 %2209, %v2504_v18   ;;  %v1148_v11 = vpack.c.bf16 %v1020_v19, %v1020_v19 }
 0x226   :  { %v1497_v13 = vpack.c.b16 %v1488_v39, %v1487_v16  ;;  %v1478_v39 = vunpack.c.l.b16 %v1199_v63  ;;  %v2950_v28 = vpop.permute.xlu2 %503 }
 0x227   :  { %v1292_v24 = vunpack.c.l.b16 %v1148_v11  ;;  %vm959_vm15 = vcmp.gt.f32.partialorder %v2950_v28, %v2907_v7 }
 0x228   :  { %1508 = vmatpush.bf16.msra.mxu3 %v1497_v13  ;;  %v1492_v13 = vpack.c.b16 %v1478_v39, %v1477_v41 }
 0x229   :  { %v1308_v51 = vpack.c.b16 %v1293_v45, %v1292_v24  ;;  %v1221_v45 = vpack.c.bf16 %v1093_v3, %v1093_v3  ;;  %v3640_v24 = vld [vmem:[#allocation9_spill] sm:$0xff] }
 0x22b   :  { %1331 = vmatpush.bf16.msra.mxu0 %v1308_v51 }
 0x22c   :  { %1509 = vmatpush.bf16.msra.mxu3 %v1496_v60  ;;  %2213 = vset.pattern.permute.xlu2 %v2499_v14 }
 0x22d   :  { %2212 = vset.pattern.permute.xlu1 %v2415_v54 }
 0x22f   :  { %v486_v58 = vpop.permute.xlu1 %485 }
 0x230   :  { %vm956_vm13 = vcmp.gt.f32.partialorder %v486_v58, %v2907_v7  ;;  %1510 = vmatpush.bf16.msra.mxu3 %v1495_v61  ;;  %v874_v61 = vrot.slane %v2364_v44, 6 }
 0x231   :  { %v1084_v35 = vsel %vm956_vm13, 1.0, %v2282_v6 }
 0x232   :  { %v1212_v59 = vpack.c.bf16 %v1084_v35, %v1084_v35  ;;  %v2995_v12 = vperm.slane %v874_v61, 0 }
 0x234   :  { %v2928_v16 = vunpack.c.l.b16 %v1212_v59  ;;  %1511 = vmatpush.bf16.msra.mxu3 %v1494_v20  ;;  %757 = vperm.xlu2 %2213, %v3635_v22   ;;  %vm1002_vm11 = vcmp.gt.f32.partialorder %v3640_v24, %v2995_v12 }
 0x235   :  { %751 = vperm.xlu1 %2212, %v3635_v22  }
 0x236   :  { %v1552_v34 = vpack.c.b16 %v2926_v33, %v2928_v16 }
 0x238   :  { %1512 = vmatpush.bf16.msra.mxu3 %v1493_v31 }
 0x23c   :  { %1513 = vmatpush.bf16.msra.mxu3 %v1492_v13  ;;  %2215 = vset.pattern.permute.xlu2 %v2427_v56  ;;  %v2954_v56 = vpop.permute.xlu2 %521 }
 0x23d   :  { %2214 = vset.pattern.permute.xlu1 %v2430_v57  ;;  %vm962_vm13 = vcmp.gt.f32.partialorder %v2954_v56, %v2907_v7 }
 0x23f   :  { %v2960_v31 = vpop.permute.xlu1 %497 }
 0x240   :  { %1514 = vmatpush.bf16.msra.mxu3 %v1491_v37 }
 0x244   :  { %672 = vperm.xlu2 %2215, %v2527_v26  }
 0x245   :  { %666 = vperm.xlu1 %2214, %v2527_v26  }
 0x246   :  { %v534_v57 = vpop.permute.xlu2 %533 }
 0x247   :  { %vm964_vm9 = vcmp.gt.f32.partialorder %v534_v57, %v2907_v7 }
 0x248   :  { %v1092_v11 = vsel %vm964_vm9, 1.0, %v2282_v6 }
 0x249   :  { %v1220_v51 = vpack.c.bf16 %v1092_v11, %v1092_v11 }
 0x24b   :  { %v1544_v56 = vunpack.c.l.b16 %v1220_v51 }
 0x24c   :  { %2218 = vset.pattern.permute.xlu2 %v2403_v52 }
 0x24d   :  { %2217 = vset.pattern.permute.xlu1 %v2499_v14 }
 0x24f   :  { %v2964_v62 = vpop.permute.xlu1 %515 }
 0x250   :  { %vm961_vm14 = vcmp.gt.f32.partialorder %v2964_v62, %v2907_v7 }
 0x251   :  { %v1089_v62 = vsel %vm961_vm14, 1.0, %v2282_v6 }
 0x252   :  { %v1217_v28 = vpack.c.bf16 %v1089_v62, %v1089_v62 }
 0x254   :  { %739 = vperm.xlu2 %2218, %v3635_v22  }
 0x255   :  { %854 = vperm.xlu1 %2217, %v2504_v18  }
 0x256   :  { %v552_v2 = vpop.permute.xlu2 %551 }
 0x257   :  { %vm967_vm2 = vcmp.gt.f32.partialorder %v552_v2, %v2907_v7 }
 0x258   :  { %v1095_v25 = vsel %vm967_vm2, 1.0, %v2282_v6 }
 0x259   :  { %v1223_v41 = vpack.c.bf16 %v1095_v25, %v1095_v25  ;;  %v1087_v25 = vsel %vm959_vm15, 1.0, %v2282_v6 }
 0x25b   :  { %v1547_v57 = vunpack.c.l.b16 %v1223_v41 }
 0x25c   :  { %2220 = vset.pattern.permute.xlu2 %v2415_v54  ;;  %v3638_v54 = vld [vmem:[#allocation11_spill] sm:$0xff] }
 0x25d   :  { %2219 = vset.pattern.permute.xlu1 %v2418_v55  ;;  %vm971_vm0 = vcmp.gt.f32.partialorder %v3638_v54, %v2907_v7  ;;  %v875_v54 = vrot.slane %v2364_v44, 7 }
 0x25e   :  { %v1099_v60 = vsel %vm971_vm0, 1.0, %v2282_v6  ;;  %vm958_vm0 = vcmp.gt.f32.partialorder %v2960_v31, %v2907_v7 }
 0x25f   :  { %v528_v37 = vpop.permute.xlu1 %527  ;;  %v1227_v40 = vpack.c.bf16 %v1099_v60, %v1099_v60  ;;  %v1545_v60 = vunpack.c.l.b16 %v1221_v45 }
 0x260   :  { %vm963_vm10 = vcmp.gt.f32.partialorder %v528_v37, %v2907_v7  ;;  %v1130_v37 = vsel %vm1002_vm11, 1.0, %v2282_v6 }
 0x261   :  { %v1551_v30 = vunpack.c.l.b16 %v1227_v40  ;;  %v1090_v40 = vsel %vm962_vm13, 1.0, %v2282_v6  ;;  %v1258_v21 = vpack.c.bf16 %v1130_v37, %v1130_v37 }
 0x262   :  { %v1218_v61 = vpack.c.bf16 %v1090_v40, %v1090_v40 }
 0x264   :  { %654 = vperm.xlu2 %2220, %v2527_v26   ;;  %v1542_v31 = vunpack.c.l.b16 %v1218_v61 }
 0x265   :  { %745 = vperm.xlu1 %2219, %v3635_v22  }
 0x266   :  { %v564_v14 = vpop.permute.xlu2 %563 }
 0x267   :  { %vm969_vm1 = vcmp.gt.f32.partialorder %v564_v14, %v2907_v7 }
 0x26c   :  { %2223 = vset.pattern.permute.xlu2 %v2418_v55 }
 0x26d   :  { %2222 = vset.pattern.permute.xlu1 %v2403_v52  ;;  %v1097_v52 = vsel %vm969_vm1, 1.0, %v2282_v6 }
 0x26e   :  { %v1225_v35 = vpack.c.bf16 %v1097_v52, %v1097_v52 }
 0x26f   :  { %v546_v42 = vpop.permute.xlu1 %545 }
 0x270   :  { %vm966_vm6 = vcmp.gt.f32.partialorder %v546_v42, %v2907_v7  ;;  %v1549_v17 = vunpack.c.l.b16 %v1225_v35  ;;  %v1091_v42 = vsel %vm963_vm10, 1.0, %v2282_v6 }
 0x271   :  { %v1094_v20 = vsel %vm966_vm6, 1.0, %v2282_v6  ;;  %v1219_v52 = vpack.c.bf16 %v1091_v42, %v1091_v42 }
 0x272   :  { %v1222_v19 = vpack.c.bf16 %v1094_v20, %v1094_v20  ;;  %v1086_v20 = vsel %vm958_vm0, 1.0, %v2282_v6 }
 0x273   :  { %v1543_v35 = vunpack.c.l.b16 %v1219_v52  ;;  %v1214_v41 = vpack.c.bf16 %v1086_v20, %v1086_v20  ;;  %v873_v52 = vrot.slane %v2364_v44, 5 }
 0x274   :  { %842 = vperm.xlu2 %2223, %v2504_v18   ;;  %v1546_v2 = vunpack.c.l.b16 %v1222_v19 }
 0x275   :  { %836 = vperm.xlu1 %2222, %v2504_v18   ;;  %v1538_v24 = vunpack.c.l.b16 %v1214_v41  ;;  %v3046_v61 = vperm.slane %v873_v52, 0 }
 0x276   :  { %v2972_v9 = vpop.permute.xlu2 %860 }
 0x277   :  { %vm985_vm9 = vcmp.gt.f32.partialorder %v2715_v1, %v3046_v61  ;;  %v3641_v1 = vld [vmem:[#allocation12_spill] sm:$0xff] }
 0x27c   :  { %2225 = vset.pattern.permute.xlu2 %v2406_v53 }
 0x27d   :  { %2224 = vset.pattern.permute.xlu1 %v2379_v48 }
 0x27e   :  { %v570_v38 = vpop.permute.xlu2 %569 }
 0x27f   :  { %vm970_vm7 = vcmp.gt.f32.partialorder %v570_v38, %v2907_v7  ;;  %v558_v23 = vpop.permute.xlu1 %557  ;;  %v1557_v38 = vpack.c.b16 %v1547_v57, %v1546_v2 }
 0x280   :  { %v1098_v58 = vsel %vm970_vm7, 1.0, %v2282_v6  ;;  %vm968_vm8 = vcmp.gt.f32.partialorder %v558_v23, %v2907_v7  ;;  %v3018_v23 = vperm.slane %v875_v54, 0 }
 0x281   :  { %v1226_v63 = vpack.c.bf16 %v1098_v58, %v1098_v58  ;;  %v1096_v59 = vsel %vm968_vm8, 1.0, %v2282_v6  ;;  %v1216_v58 = vpack.c.bf16 %v1088_v43, %v1088_v43 }
 0x282   :  { %v1224_v32 = vpack.c.bf16 %v1096_v59, %v1096_v59  ;;  %v1672_v59 = vunpack.c.l.b16 %v1258_v21  ;;  %vm1018_vm2 = vcmp.gt.f32.partialorder %v2972_v9, %v3018_v23  ;;  %vm1016_vm12 = vcmp.gt.f32.partialorder %v3641_v1, %v3018_v23 }
 0x283   :  { %v1550_v39 = vunpack.c.l.b16 %v1226_v63  ;;  %v1556_v63 = vpack.c.b16 %v1545_v60, %v1544_v56  ;;  %v1146_v19 = vsel %vm1018_vm2, 1.0, %v2282_v6 }
 0x284   :  { %733 = vperm.xlu2 %2225, %v3635_v22   ;;  %v1548_v13 = vunpack.c.l.b16 %v1224_v32  ;;  %v1540_v32 = vunpack.c.l.b16 %v1216_v58  ;;  %v1274_v45 = vpack.c.bf16 %v1146_v19, %v1146_v19 }
 0x285   :  { %727 = vperm.xlu1 %2224, %v3635_v22   ;;  %v1559_v29 = vpack.c.b16 %v1551_v30, %v1550_v39  ;;  %v1215_v39 = vpack.c.bf16 %v1087_v25, %v1087_v25 }
 0x286   :  { %v1558_v14 = vpack.c.b16 %v1549_v17, %v1548_v13  ;;  %v1541_v17 = vunpack.c.l.b16 %v1217_v28  ;;  %v1555_v13 = vpack.c.b16 %v1543_v35, %v1542_v31 }
 0x287   :  { %1568 = vmatpush.bf16.msrb.mxu0 %v1559_v29  ;;  %v1539_v9 = vunpack.c.l.b16 %v1215_v39  ;;  %v1144_v39 = vsel %vm1016_vm12, 1.0, %v2282_v6 }
 0x288   :  { %v1554_v57 = vpack.c.b16 %v1541_v17, %v1540_v32  ;;  %v1272_v17 = vpack.c.bf16 %v1144_v39, %v1144_v39 }
 0x289   :  { %v1553_v42 = vpack.c.b16 %v1539_v9, %v1538_v24 }
 0x28b   :  { %1569 = vmatpush.bf16.msrb.mxu0 %v1558_v14  ;;  %v1733_v14 = vunpack.c.l.b16 %v1274_v45 }
 0x28c   :  { %2228 = vset.pattern.permute.xlu2 %v2379_v48 }
 0x28d   :  { %2227 = vset.pattern.permute.xlu1 %v2418_v55 }
 0x28e   :  { %v758_v37 = vpop.permute.xlu2 %757 }
 0x28f   :  { %v770_v30 = vpop.permute.xlu1 %769  ;;  %1570 = vmatpush.bf16.msrb.mxu0 %v1557_v38  ;;  %vm1001_vm6 = vcmp.gt.f32.partialorder %v758_v37, %v2995_v12 }
 0x290   :  { %vm1003_vm1 = vcmp.gt.f32.partialorder %v770_v30, %v2995_v12  ;;  %v1129_v43 = vsel %vm1001_vm6, 1.0, %v2282_v6 }
 0x291   :  { %v1131_v55 = vsel %vm1003_vm1, 1.0, %v2282_v6  ;;  %v1257_v40 = vpack.c.bf16 %v1129_v43, %v1129_v43 }
 0x292   :  { %v1259_v7 = vpack.c.bf16 %v1131_v55, %v1131_v55 }
 0x293   :  { %1571 = vmatpush.bf16.msrb.mxu0 %v1556_v63  ;;  %v1671_v21 = vunpack.c.l.b16 %v1257_v40 }
 0x294   :  { %v1673_v3 = vunpack.c.l.b16 %v1259_v7  ;;  %824 = vperm.xlu2 %2228, %v2504_v18  }
 0x295   :  { %648 = vperm.xlu1 %2227, %v2527_v26  }
 0x296   :  { %v1681_v29 = vpack.c.b16 %v1673_v3, %v1672_v59 }
 0x297   :  { %v867_v11 = vpop.permute.xlu1 %866  ;;  %1572 = vmatpush.bf16.msrb.mxu0 %v1555_v13 }
 0x298   :  { %vm1019_vm3 = vcmp.gt.f32.partialorder %v867_v11, %v3018_v23  ;;  %1690 = vmatpush.bf16.msrb.mxu2 %v1681_v29  ;;  %v1731_v29 = vunpack.c.l.b16 %v1272_v17 }
 0x299   :  { %v1147_v51 = vsel %vm1019_vm3, 1.0, %v2282_v6  ;;  %vm995_vm3 = vcmp.gt.f32.partialorder %v2759_v0, %v2995_v12 }
 0x29a   :  { %v1275_v2 = vpack.c.bf16 %v1147_v51, %v1147_v51 }
 0x29b   :  { %1573 = vmatpush.bf16.msrb.mxu0 %v1554_v57 }
 0x29c   :  { %v1734_v54 = vunpack.c.l.b16 %v1275_v2  ;;  %2230 = vset.pattern.permute.xlu2 %v2391_v50 }
 0x29d   :  { %2229 = vset.pattern.permute.xlu1 %v2406_v53 }
 0x29e   :  { %v1742_v60 = vpack.c.b16 %v1734_v54, %v1733_v14  ;;  %v673_v16 = vpop.permute.xlu2 %672 }
 0x29f   :  { %1574 = vmatpush.bf16.msrb.mxu0 %v1553_v42  ;;  %vm987_vm8 = vcmp.gt.f32.partialorder %v673_v16, %v3046_v61 }
 0x2a0   :  { %1751 = vmatpush.bf16.msrb.mxu3 %v1742_v60  ;;  %v1115_v44 = vsel %vm987_vm8, 1.0, %v2282_v6  ;;  %vm982_vm8 = vcmp.gt.f32.partialorder %v2736_v36, %v3046_v61 }
 0x2a1   :  { %v1243_v30 = vpack.c.bf16 %v1115_v44, %v1115_v44 }
 0x2a3   :  { %1575 = vmatpush.bf16.msrb.mxu0 %v1552_v34  ;;  %v1612_v28 = vunpack.c.l.b16 %v1243_v30 }
 0x2a4   :  { %715 = vperm.xlu2 %2230, %v3635_v22  }
 0x2a5   :  { %830 = vperm.xlu1 %2229, %v2504_v18  }
 0x2a7   :  { %v752_v56 = vpop.permute.xlu1 %751 }
 0x2a8   :  { %vm1000_vm7 = vcmp.gt.f32.partialorder %v752_v56, %v2995_v12 }
 0x2a9   :  { %v1128_v38 = vsel %vm1000_vm7, 1.0, %v2282_v6 }
 0x2aa   :  { %v1256_v62 = vpack.c.bf16 %v1128_v38, %v1128_v38 }
 0x2ac   :  { %v1670_v33 = vunpack.c.l.b16 %v1256_v62  ;;  %2233 = vset.pattern.permute.xlu2 %v2406_v53  ;;  %v1113_v53 = vsel %vm985_vm9, 1.0, %v2282_v6 }
 0x2ad   :  { %2232 = vset.pattern.permute.xlu1 %v2379_v48  ;;  %v1241_v63 = vpack.c.bf16 %v1113_v53, %v1113_v53 }
 0x2ae   :  { %v1680_v34 = vpack.c.b16 %v1671_v21, %v1670_v33  ;;  %v740_v58 = vpop.permute.xlu2 %739 }
 0x2af   :  { %v1610_v31 = vunpack.c.l.b16 %v1241_v63  ;;  %vm998_vm14 = vcmp.gt.f32.partialorder %v740_v58, %v2995_v12  ;;  %v1123_v58 = vsel %vm995_vm3, 1.0, %v2282_v6 }
 0x2b0   :  { %1691 = vmatpush.bf16.msrb.mxu2 %v1680_v34  ;;  %v1126_v24 = vsel %vm998_vm14, 1.0, %v2282_v6 }
 0x2b1   :  { %v1254_v57 = vpack.c.bf16 %v1126_v24, %v1126_v24 }
 0x2b4   :  { %636 = vperm.xlu2 %2233, %v2527_v26  }
 0x2b5   :  { %630 = vperm.xlu1 %2232, %v2527_v26  }
 0x2b7   :  { %v667_v25 = vpop.permute.xlu1 %666 }
 0x2b8   :  { %vm986_vm10 = vcmp.gt.f32.partialorder %v667_v25, %v3046_v61 }
 0x2b9   :  { %v1114_v48 = vsel %vm986_vm10, 1.0, %v2282_v6 }
 0x2ba   :  { %v1242_v35 = vpack.c.bf16 %v1114_v48, %v1114_v48 }
 0x2bc   :  { %v1611_v55 = vunpack.c.l.b16 %v1242_v35  ;;  %2235 = vset.pattern.permute.xlu2 %v2388_v49 }
 0x2bd   :  { %2234 = vset.pattern.permute.xlu1 %v2391_v50 }
 0x2be   :  { %v1620_v59 = vpack.c.b16 %v1612_v28, %v1611_v55  ;;  %v655_v20 = vpop.permute.xlu2 %654  ;;  %v1251_v28 = vpack.c.bf16 %v1123_v58, %v1123_v58 }
 0x2bf   :  { %vm984_vm11 = vcmp.gt.f32.partialorder %v655_v20, %v3046_v61  ;;  %v1110_v20 = vsel %vm982_vm8, 1.0, %v2282_v6 }
 0x2c0   :  { %1629 = vmatpush.bf16.msrb.mxu1 %v1620_v59  ;;  %v1112_v7 = vsel %vm984_vm11, 1.0, %v2282_v6  ;;  %v1665_v63 = vunpack.c.l.b16 %v1251_v28 }
 0x2c1   :  { %v1240_v32 = vpack.c.bf16 %v1112_v7, %v1112_v7 }
 0x2c3   :  { %v1609_v3 = vunpack.c.l.b16 %v1240_v32 }
 0x2c4   :  { %818 = vperm.xlu2 %2235, %v2504_v18  }
 0x2c5   :  { %812 = vperm.xlu1 %2234, %v2504_v18   ;;  %v1619_v41 = vpack.c.b16 %v1610_v31, %v1609_v3 }
 0x2c7   :  { %v855_v19 = vpop.permute.xlu1 %854  ;;  %1630 = vmatpush.bf16.msrb.mxu1 %v1619_v41 }
 0x2c8   :  { %vm1017_vm13 = vcmp.gt.f32.partialorder %v855_v19, %v3018_v23 }
 0x2c9   :  { %v1145_v13 = vsel %vm1017_vm13, 1.0, %v2282_v6 }
 0x2ca   :  { %v1273_v11 = vpack.c.bf16 %v1145_v13, %v1145_v13 }
 0x2cc   :  { %v1732_v45 = vunpack.c.l.b16 %v1273_v11  ;;  %2238 = vset.pattern.permute.xlu2 %v2391_v50  ;;  %v1668_v50 = vunpack.c.l.b16 %v1254_v57 }
 0x2cd   :  { %2237 = vset.pattern.permute.xlu1 %v2373_v46 }
 0x2ce   :  { %v1741_v9 = vpack.c.b16 %v1732_v45, %v1731_v29  ;;  %v843_v42 = vpop.permute.xlu2 %842 }
 0x2cf   :  { %vm1015_vm0 = vcmp.gt.f32.partialorder %v843_v42, %v3018_v23 }
 0x2d0   :  { %1752 = vmatpush.bf16.msrb.mxu3 %v1741_v9  ;;  %v1143_v60 = vsel %vm1015_vm0, 1.0, %v2282_v6 }
 0x2d1   :  { %v1271_v43 = vpack.c.bf16 %v1143_v60, %v1143_v60 }
 0x2d3   :  { %v1730_v52 = vunpack.c.l.b16 %v1271_v43 }
 0x2d4   :  { %618 = vperm.xlu2 %2238, %v2527_v26  }
 0x2d5   :  { %709 = vperm.xlu1 %2237, %v3635_v22  }
 0x2d7   :  { %v746_v51 = vpop.permute.xlu1 %745 }
 0x2d8   :  { %vm999_vm15 = vcmp.gt.f32.partialorder %v746_v51, %v2995_v12 }
 0x2d9   :  { %v1127_v2 = vsel %vm999_vm15, 1.0, %v2282_v6  ;;  %vm1009_vm15 = vcmp.gt.f32.partialorder %v2806_v27, %v3018_v23 }
 0x2da   :  { %v1255_v14 = vpack.c.bf16 %v1127_v2, %v1127_v2 }
 0x2dc   :  { %v1669_v54 = vunpack.c.l.b16 %v1255_v14  ;;  %2240 = vset.pattern.permute.xlu2 %v2332_v8 }
 0x2dd   :  { %2239 = vset.pattern.permute.xlu1 %v2388_v49 }
 0x2de   :  { %v1679_v37 = vpack.c.b16 %v1669_v54, %v1668_v50  ;;  %v734_v21 = vpop.permute.xlu2 %733 }
 0x2df   :  { %vm997_vm2 = vcmp.gt.f32.partialorder %v734_v21, %v2995_v12 }
 0x2e0   :  { %1692 = vmatpush.bf16.msrb.mxu2 %v1679_v37  ;;  %v1125_v33 = vsel %vm997_vm2, 1.0, %v2282_v6  ;;  %vm992_vm2 = vcmp.gt.f32.partialorder %v2771_v5, %v2995_v12 }
 0x2e1   :  { %v1253_v16 = vpack.c.bf16 %v1125_v33, %v1125_v33  ;;  %v1120_v33 = vsel %vm992_vm2, 1.0, %v2282_v6 }
 0x2e3   :  { %v1667_v25 = vunpack.c.l.b16 %v1253_v16 }
 0x2e4   :  { %800 = vperm.xlu2 %2240, %v2504_v18  }
 0x2e5   :  { %624 = vperm.xlu1 %2239, %v2527_v26  }
 0x2e7   :  { %v837_v40 = vpop.permute.xlu1 %836 }
 0x2e8   :  { %vm1014_vm1 = vcmp.gt.f32.partialorder %v837_v40, %v3018_v23 }
 0x2e9   :  { %v1142_v56 = vsel %vm1014_vm1, 1.0, %v2282_v6 }
 0x2ea   :  { %v1270_v38 = vpack.c.bf16 %v1142_v56, %v1142_v56 }
 0x2ec   :  { %v1729_v49 = vunpack.c.l.b16 %v1270_v38  ;;  %2243 = vset.pattern.permute.xlu2 %v2376_v47 }
 0x2ed   :  { %2242 = vset.pattern.permute.xlu1 %v2336_v10 }
 0x2ee   :  { %v1740_v62 = vpack.c.b16 %v1730_v52, %v1729_v49  ;;  %v825_v34 = vpop.permute.xlu2 %824 }
 0x2ef   :  { %vm1012_vm10 = vcmp.gt.f32.partialorder %v825_v34, %v3018_v23 }
 0x2f0   :  { %1753 = vmatpush.bf16.msrb.mxu3 %v1740_v62  ;;  %v1140_v41 = vsel %vm1012_vm10, 1.0, %v2282_v6 }
 0x2f1   :  { %v1268_v19 = vpack.c.bf16 %v1140_v41, %v1140_v41 }
 0x2f3   :  { %v1727_v11 = vunpack.c.l.b16 %v1268_v19 }
 0x2f4   :  { %697 = vperm.xlu2 %2243, %v3635_v22  }
 0x2f5   :  { %691 = vperm.xlu1 %2242, %v3635_v22  }
 0x2f7   :  { %v728_v44 = vpop.permute.xlu1 %727 }
 0x2f8   :  { %vm996_vm6 = vcmp.gt.f32.partialorder %v728_v44, %v2995_v12  ;;  %v1248_v44 = vpack.c.bf16 %v1120_v33, %v1120_v33 }
 0x2f9   :  { %v1124_v30 = vsel %vm996_vm6, 1.0, %v2282_v6 }
 0x2fa   :  { %v1252_v48 = vpack.c.bf16 %v1124_v30, %v1124_v30  ;;  %v1662_v58 = vunpack.c.l.b16 %v1248_v44 }
 0x2fc   :  { %v1666_v53 = vunpack.c.l.b16 %v1252_v48  ;;  %2245 = vset.pattern.permute.xlu2 %v2373_v46  ;;  %v1238_v46 = vpack.c.bf16 %v1110_v20, %v1110_v20 }
 0x2fd   :  { %2244 = vset.pattern.permute.xlu1 %v2332_v8 }
 0x2fe   :  { %v1678_v35 = vpack.c.b16 %v1667_v25, %v1666_v53  ;;  %v716_v55 = vpop.permute.xlu2 %715  ;;  %v1607_v31 = vunpack.c.l.b16 %v1238_v46 }
 0x2ff   :  { %vm994_vm7 = vcmp.gt.f32.partialorder %v716_v55, %v2995_v12 }
 0x300   :  { %1693 = vmatpush.bf16.msrb.mxu2 %v1678_v35  ;;  %v1122_v0 = vsel %vm994_vm7, 1.0, %v2282_v6 }
 0x301   :  { %v1250_v59 = vpack.c.bf16 %v1122_v0, %v1122_v0 }
 0x303   :  { %v1664_v1 = vunpack.c.l.b16 %v1250_v59 }
 0x304   :  { %612 = vperm.xlu2 %2245, %v2527_v26  }
 0x305   :  { %606 = vperm.xlu1 %2244, %v2527_v26   ;;  %v1677_v8 = vpack.c.b16 %v1665_v63, %v1664_v1 }
 0x307   :  { %v649_v7 = vpop.permute.xlu1 %648  ;;  %1694 = vmatpush.bf16.msrb.mxu2 %v1677_v8 }
 0x308   :  { %vm983_vm9 = vcmp.gt.f32.partialorder %v649_v7, %v3046_v61 }
 0x309   :  { %v1111_v36 = vsel %vm983_vm9, 1.0, %v2282_v6 }
 0x30a   :  { %v1239_v32 = vpack.c.bf16 %v1111_v36, %v1111_v36 }
 0x30c   :  { %v1608_v39 = vunpack.c.l.b16 %v1239_v32  ;;  %2247 = vset.pattern.permute.xlu2 %v2326_v4 }
 0x30d   :  { %2246 = vset.pattern.permute.xlu1 %v2376_v47 }
 0x30e   :  { %v1618_v3 = vpack.c.b16 %v1608_v39, %v1607_v31  ;;  %v637_v47 = vpop.permute.xlu2 %636 }
 0x30f   :  { %vm981_vm12 = vcmp.gt.f32.partialorder %v637_v47, %v3046_v61 }
 0x310   :  { %1631 = vmatpush.bf16.msrb.mxu1 %v1618_v3  ;;  %v1109_v24 = vsel %vm981_vm12, 1.0, %v2282_v6 }
 0x311   :  { %v1237_v51 = vpack.c.bf16 %v1109_v24, %v1109_v24 }
 0x314   :  { %679 = vperm.xlu2 %2247, %v3635_v22  }
 0x315   :  { %794 = vperm.xlu1 %2246, %v2504_v18  }
 0x317   :  { %v831_v17 = vpop.permute.xlu1 %830 }
 0x318   :  { %vm1013_vm11 = vcmp.gt.f32.partialorder %v831_v17, %v3018_v23  ;;  %v789_v17 = vpop.permute.xlu0 %788 }
 0x319   :  { %v1141_v13 = vsel %vm1013_vm11, 1.0, %v2282_v6 }
 0x31a   :  { %v1269_v29 = vpack.c.bf16 %v1141_v13, %v1141_v13 }
 0x31c   :  { %v1728_v45 = vunpack.c.l.b16 %v1269_v29  ;;  %2249 = vset.pattern.permute.xlu2 %v2336_v10  ;;  %v1606_v10 = vunpack.c.l.b16 %v1237_v51 }
 0x31d   :  { %2248 = vset.pattern.permute.xlu1 %v2340_v15 }
 0x31e   :  { %v1739_v9 = vpack.c.b16 %v1728_v45, %v1727_v11  ;;  %v819_v54 = vpop.permute.xlu2 %818 }
 0x31f   :  { %vm1011_vm14 = vcmp.gt.f32.partialorder %v819_v54, %v3018_v23 }
 0x320   :  { %1754 = vmatpush.bf16.msrb.mxu3 %v1739_v9  ;;  %v601_v45 = vpop.permute.xlu0 %600 }
 0x321   :  { %vm975_vm12 = vcmp.gt.f32.partialorder %v601_v45, %v3046_v61 }
 0x322   :  { %v1103_v51 = vsel %vm975_vm12, 1.0, %v2282_v6 }
 0x324   :  { %594 = vperm.xlu2 %2249, %v2527_v26  }
 0x325   :  { %685 = vperm.xlu1 %2248, %v3635_v22   ;;  %v1139_v22 = vsel %vm1011_vm14, 1.0, %v2282_v6  ;;  %vm1006_vm14 = vcmp.gt.f32.partialorder %v789_v17, %v3018_v23 }
 0x326   :  { %v1267_v37 = vpack.c.bf16 %v1139_v22, %v1139_v22 }
 0x327   :  { %v631_v57 = vpop.permute.xlu1 %630 }
 0x328   :  { %vm980_vm13 = vcmp.gt.f32.partialorder %v631_v57, %v3046_v61  ;;  %v1726_v40 = vunpack.c.l.b16 %v1267_v37  ;;  %v2283_v57 = vmov 1065369472   ;;  %v1134_v37 = vsel %vm1006_vm14, 1.0, %v2282_v6 }
 0x329   :  { %v1108_v2 = vsel %vm980_vm13, 1.0, %v2282_v6  ;;  %1332 = vmatmul.bf16.vlgmr.msra.gmra.mxu0 %v2283_v57  ;;  %1454 = vmatmul.bf16.vlgmr.msra.gmra.mxu2 %v2283_v57 }
 0x32a   :  { %v1236_v14 = vpack.c.bf16 %v1108_v2, %v1108_v2  ;;  %1515 = vmatmul.bf16.vlgmr.msra.gmra.mxu3 %v2283_v57  ;;  %1393 = vmatmul.bf16.vlgmr.msra.gmra.mxu1 %v2283_v57 }
 0x32c   :  { %v1605_v50 = vunpack.c.l.b16 %v1236_v14  ;;  %2252 = vset.pattern.permute.xlu2 %v2340_v15  ;;  %v1137_v15 = vsel %vm1009_vm15, 1.0, %v2282_v6 }
 0x32d   :  { %2251 = vset.pattern.permute.xlu1 %v2326_v4  ;;  %v1265_v38 = vpack.c.bf16 %v1137_v15, %v1137_v15 }
 0x32e   :  { %v1617_v42 = vpack.c.b16 %v1606_v10, %v1605_v50  ;;  %v619_v60 = vpop.permute.xlu2 %618  ;;  %v1231_v10 = vpack.c.bf16 %v1103_v51, %v1103_v51 }
 0x32f   :  { %v1724_v21 = vunpack.c.l.b16 %v1265_v38  ;;  %vm978_vm6 = vcmp.gt.f32.partialorder %v619_v60, %v3046_v61 }
 0x330   :  { %1632 = vmatpush.bf16.msrb.mxu1 %v1617_v42  ;;  %v1106_v53 = vsel %vm978_vm6, 1.0, %v2282_v6  ;;  %v1600_v22 = vunpack.c.l.b16 %v1231_v10  ;;  %v3226_v10 = vld [vmem:[%s3605_s0 + $0x38] sm:$0xff] }
 0x331   :  { %v1234_v35 = vpack.c.bf16 %v1106_v53, %v1106_v53 }
 0x333   :  { %v1603_v63 = vunpack.c.l.b16 %v1234_v35 }
 0x334   :  { %782 = vperm.xlu2 %2252, %v2504_v18  }
 0x335   :  { %776 = vperm.xlu1 %2251, %v2504_v18  }
 0x337   :  { %v813_v43 = vpop.permute.xlu1 %812 }
 0x338   :  { %vm1010_vm0 = vcmp.gt.f32.partialorder %v813_v43, %v3018_v23 }
 0x339   :  { %v1138_v4 = vsel %vm1010_vm0, 1.0, %v2282_v6  ;;  %1576 = vmatmul.bf16.vlgmr.msrb.gmra.mxu0 %v2283_v57 }
 0x33a   :  { %v1266_v56 = vpack.c.bf16 %v1138_v4, %v1138_v4  ;;  %v1262_v4 = vpack.c.bf16 %v1134_v37, %v1134_v37  ;;  %v3249_v37 = vld [vmem:[%s3608_s2 + $0x10] sm:$0xff] }
 0x33c   :  { %v1725_v52 = vunpack.c.l.b16 %v1266_v56  ;;  %588 = vperm.xlu2 %2252, %v2527_v26  }
 0x33d   :  { %582 = vperm.xlu1 %2251, %v2527_v26  }
 0x33e   :  { %v1738_v18 = vpack.c.b16 %v1726_v40, %v1725_v52  ;;  %v801_v49 = vpop.permute.xlu2 %800  ;;  %v1721_v52 = vunpack.c.l.b16 %v1262_v4 }
 0x33f   :  { %vm1008_vm1 = vcmp.gt.f32.partialorder %v801_v49, %v3018_v23 }
 0x340   :  { %1755 = vmatpush.bf16.msrb.mxu3 %v1738_v18  ;;  %v1136_v27 = vsel %vm1008_vm1, 1.0, %v2282_v6  ;;  %v2110_v18 = vsel %vm48_vm4, 1.0, %v2282_v6 }
 0x341   :  { %v1264_v62 = vpack.c.bf16 %v1136_v27, %v1136_v27  ;;  %1764 = vadd.xlane.f32.xlu0 %v2110_v18 }
 0x343   :  { %v1723_v16 = vunpack.c.l.b16 %v1264_v62 }
 0x345   :  { %v1737_v34 = vpack.c.b16 %v1724_v21, %v1723_v16 }
 0x347   :  { %v710_v30 = vpop.permute.xlu1 %709  ;;  %1756 = vmatpush.bf16.msrb.mxu3 %v1737_v34 }
 0x348   :  { %vm993_vm3 = vcmp.gt.f32.partialorder %v710_v30, %v2995_v12 }
 0x349   :  { %v1121_v26 = vsel %vm993_vm3, 1.0, %v2282_v6 }
 0x34a   :  { %v1249_v25 = vpack.c.bf16 %v1121_v26, %v1121_v26 }
 0x34c   :  { %v1663_v48 = vunpack.c.l.b16 %v1249_v25 }
 0x34e   :  { %v1676_v5 = vpack.c.b16 %v1663_v48, %v1662_v58  ;;  %v698_v20 = vpop.permute.xlu2 %697 }
 0x34f   :  { %vm991_vm8 = vcmp.gt.f32.partialorder %v698_v20, %v2995_v12 }
 0x350   :  { %1695 = vmatpush.bf16.msrb.mxu2 %v1676_v5  ;;  %v1119_v8 = vsel %vm991_vm8, 1.0, %v2282_v6 }
 0x351   :  { %v1247_v46 = vpack.c.bf16 %v1119_v8, %v1119_v8 }
 0x353   :  { %v1661_v31 = vunpack.c.l.b16 %v1247_v46 }
 0x357   :  { %v625_v28 = vpop.permute.xlu1 %624 }
 0x358   :  { %vm979_vm7 = vcmp.gt.f32.partialorder %v625_v28, %v3046_v61 }
 0x359   :  { %v1107_v55 = vsel %vm979_vm7, 1.0, %v2282_v6 }
 0x35a   :  { %v1235_v0 = vpack.c.bf16 %v1107_v55, %v1107_v55 }
 0x35c   :  { %v1604_v59 = vunpack.c.l.b16 %v1235_v0 }
 0x35e   :  { %v1616_v1 = vpack.c.b16 %v1604_v59, %v1603_v63  ;;  %v613_v3 = vpop.permute.xlu2 %612 }
 0x35f   :  { %vm977_vm10 = vcmp.gt.f32.partialorder %v613_v3, %v3046_v61  ;;  %v3203_v3 = vld [vmem:[%s3608_s2 + $0x30] sm:$0xff] }
 0x360   :  { %1633 = vmatpush.bf16.msrb.mxu1 %v1616_v1  ;;  %v1105_v19 = vsel %vm977_vm10, 1.0, %v2282_v6 }
 0x361   :  { %v1233_v13 = vpack.c.bf16 %v1105_v19, %v1105_v19 }
 0x363   :  { %v1602_v9 = vunpack.c.l.b16 %v1233_v13 }
 0x367   :  { %v692_v7 = vpop.permute.xlu1 %691 }
 0x368   :  { %vm990_vm9 = vcmp.gt.f32.partialorder %v692_v7, %v2995_v12 }
 0x369   :  { %v1118_v36 = vsel %vm990_vm9, 1.0, %v2282_v6 }
 0x36a   :  { %v1246_v32 = vpack.c.bf16 %v1118_v36, %v1118_v36  ;;  %v46_v36 = vld [vmem:[%s3607_s4] sm:$0xf] }
 0x36c   :  { %v1660_v39 = vunpack.c.l.b16 %v1246_v32 }
 0x36e   :  { %v1675_v41 = vpack.c.b16 %v1661_v31, %v1660_v39  ;;  %v680_v29 = vpop.permute.xlu2 %679  ;;  %v1930_v31 = vmul.f32 0.1, %v46_v36  ;;  %v3198_v39 = vld [vmem:[%s3608_s2 + $0x28] sm:$0xff] }
 0x36f   :  { %vm988_vm0 = vcmp.gt.f32.partialorder %v680_v29, %v2995_v12  ;;  %v1946_v29 = vperm.slane %v46_v36, 1 }
 0x370   :  { %1696 = vmatpush.bf16.msrb.mxu2 %v1675_v41  ;;  %v1116_v21 = vsel %vm988_vm0, 1.0, %v2282_v6  ;;  %v1941_v32 = vperm.slane %v1930_v31, 3  ;;  %v3208_v41 = vld [vmem:[%s3608_s2 + $0x38] sm:$0xff] }
 0x371   :  { %v1244_v33 = vpack.c.bf16 %v1116_v21, %v1116_v21 }
 0x372   :  { %v1943_v19 = vmul.f32 %v1941_v32, %v3198_v39  ;;  %v1944_v13 = vmul.f32 %v1941_v32, %v3203_v3 }
 0x373   :  { %v1658_v44 = vunpack.c.l.b16 %v1244_v33 }
 0x377   :  { %v607_v11 = vpop.permute.xlu1 %606 }
 0x378   :  { %vm976_vm11 = vcmp.gt.f32.partialorder %v607_v11, %v3046_v61  ;;  %v1945_v11 = vmul.f32 %v1941_v32, %v3208_v41 }
 0x379   :  { %v1104_v47 = vsel %vm976_vm11, 1.0, %v2282_v6  ;;  %vm2284_vm11 = vmmov 1  }
 0x37a   :  { %v1232_v24 = vpack.c.bf16 %v1104_v47, %v1104_v47  ;;  %v1948_v47 = vadd.f32 %v1946_v29, %v1943_v19 }
 0x37c   :  { %v1601_v2 = vunpack.c.l.b16 %v1232_v24  ;;  %v1950_v24 = vadd.f32 %v1946_v29, %v1945_v11 }
 0x37e   :  { %v1615_v14 = vpack.c.b16 %v1602_v9, %v1601_v2  ;;  %v595_v50 = vpop.permute.xlu2 %594  ;;  %v1949_v9 = vadd.f32 %v1946_v29, %v1944_v13  ;;  %v3221_v2 = vld [vmem:[%s3605_s0 + $0x28] sm:$0xff] }
 0x37f   :  { %vm974_vm13 = vcmp.gt.f32.partialorder %v595_v50, %v3046_v61  ;;  %v1931_v50 = vperm.slane %v1930_v31, 2 }
 0x380   :  { %1634 = vmatpush.bf16.msrb.mxu1 %v1615_v14  ;;  %v1102_v54 = vsel %vm974_vm13, 1.0, %v2282_v6  ;;  %v3230_v14 = vsub.f32 %v3226_v10, %v3221_v2 }
 0x381   :  { %v1230_v42 = vpack.c.bf16 %v1102_v54, %v1102_v54 }
 0x383   :  { %v1599_v60 = vunpack.c.l.b16 %v1230_v42  ;;  %v3239_v42 = vld [vmem:[%s3608_s2] sm:$0xff] }
 0x384   :  { %v1932_v4 = vmul.f32 %v1931_v50, %v3239_v42 }
 0x385   :  { %v1614_v43 = vpack.c.b16 %v1600_v22, %v1599_v60  ;;  %v3244_v22 = vld [vmem:[%s3608_s2 + $0x8] sm:$0xff]  ;;  %v2002_v60 = vadd.f32 1e-09, %v3230_v14 }
 0x387   :  { %v795_v15 = vpop.permute.xlu1 %794  ;;  %1635 = vmatpush.bf16.msrb.mxu1 %v1614_v43  ;;  %v3255_v43 = vld [vmem:[%s3608_s2 + $0x18] sm:$0xff]  ;;  %2264 = vrcp.f32 %v2002_v60 }
 0x388   :  { %vm1007_vm15 = vcmp.gt.f32.partialorder %v795_v15, %v3018_v23  ;;  %v1933_v15 = vmul.f32 %v1931_v50, %v3244_v22 }
 0x389   :  { %v1135_v40 = vsel %vm1007_vm15, 1.0, %v2282_v6 }
 0x38a   :  { %v1263_v56 = vpack.c.bf16 %v1135_v40, %v1135_v40  ;;  %v1934_v40 = vmul.f32 %v1931_v50, %v3249_v37 }
 0x38c   :  { %v1722_v49 = vunpack.c.l.b16 %v1263_v56  ;;  %v1936_v56 = vperm.slane %v46_v36, 0 }
 0x38e   :  { %v1736_v27 = vpack.c.b16 %v1722_v49, %v1721_v52  ;;  %v783_v26 = vpop.permute.xlu2 %782  ;;  %v1935_v52 = vmul.f32 %v1931_v50, %v3255_v43  ;;  %v1937_v49 = vadd.f32 %v1936_v56, %v1932_v4  ;;  %v1939_v21 = vadd.f32 %v1936_v56, %v1934_v40 }
 0x38f   :  { %vm1005_vm2 = vcmp.gt.f32.partialorder %v783_v26, %v3018_v23  ;;  %v2265_v26 = vpop.eup %2264 }
 0x390   :  { %1757 = vmatpush.bf16.msrb.mxu3 %v1736_v27  ;;  %v1133_v25 = vsel %vm1005_vm2, 1.0, %v2282_v6  ;;  %v1938_v27 = vadd.f32 %v1936_v56, %v1933_v15 }
 0x391   :  { %v1261_v48 = vpack.c.bf16 %v1133_v25, %v1133_v25 }
 0x392   :  { %v3262_v33 = vmax.f32 %v1938_v27, %v1939_v21 }
 0x393   :  { %v1720_v28 = vunpack.c.l.b16 %v1261_v48 }
 0x396   :  { %v589_v5 = vpop.permute.xlu2 %588 }
 0x397   :  { %v686_v62 = vpop.permute.xlu1 %685  ;;  %vm973_vm6 = vcmp.gt.f32.partialorder %v589_v5, %v3046_v61 }
 0x398   :  { %vm989_vm1 = vcmp.gt.f32.partialorder %v686_v62, %v2995_v12  ;;  %v1101_v0 = vsel %vm973_vm6, 1.0, %v2282_v6  ;;  %v1940_v62 = vadd.f32 %v1936_v56, %v1935_v52 }
 0x399   :  { %v1117_v16 = vsel %vm989_vm1, 1.0, %v2282_v6  ;;  %v1229_v20 = vpack.c.bf16 %v1101_v0, %v1101_v0 }
 0x39a   :  { %v1245_v34 = vpack.c.bf16 %v1117_v16, %v1117_v16  ;;  %v3267_v16 = vld [vmem:[%s3605_s0 + $0x20] sm:$0xff] }
 0x39c   :  { %v1659_v30 = vunpack.c.l.b16 %v1245_v34  ;;  %v3272_v34 = vld [vmem:[%s3605_s0 + $0x30] sm:$0xff] }
 0x39d   :  { %v1969_v4 = vmin.f32 %v3262_v33, %v3272_v34 }
 0x39e   :  { %v1674_v58 = vpack.c.b16 %v1659_v30, %v1658_v44  ;;  %v3274_v44 = vmin.f32 %v1937_v49, %v1940_v62  ;;  %v1957_v30 = vsub.f32 %v3272_v34, %v3267_v16 }
 0x3a0   :  { %1697 = vmatpush.bf16.msrb.mxu2 %v1674_v58  ;;  %v1955_v58 = vsub.f32 %v3262_v33, %v3274_v44  ;;  %v3280_v25 = vmul.f32 %v2265_v26, %v1957_v30  ;;  %v1970_v15 = vmax.f32 %v3274_v44, %v3267_v16 }
 0x3a2   :  { %v3283_v5 = vand.u32 2147483647, %v3280_v25  ;;  %v1971_v49 = vsub.f32 %v1969_v4, %v1970_v15  ;;  %vm2005_vm1 = vcmp.lt.f32.partialorder %v3280_v25, 0.0  ;;  %v41_v15 = vld [vmem:[%s3609_s3 + $0x18] sm:$0xff] }
 0x3a3   :  { %1698 = vmatmul.bf16.vlgmr.msrb.gmra.mxu2 %v2283_v57 }
 0x3a4   :  { %vm2008_vm8 = vcmp.gt.f32.partialorder %v3283_v5, 2.4142137  ;;  %vm2009_vm10 = vcmp.gt.f32.partialorder %v3283_v5, 0.41421357 }
 0x3a5   :  { %vm2010_vm12 = vmxor %vm2008_vm8, %vm2284_vm11 }
 0x3a6   :  { %vm3302_vm14 = vmand %vm2009_vm10, %vm2010_vm12  ;;  %v3334_v62 = vpop.f32.mrf.mxu0 }
 0x3a7   :  { %v777_v53 = vpop.permute.xlu1 %776 }
 0x3a8   :  { %vm1004_vm3 = vcmp.gt.f32.partialorder %v777_v53, %v3018_v23  ;;  %v1598_v23 = vunpack.c.l.b16 %v1229_v20 }
 0x3a9   :  { %v1132_v12 = vsel %vm1004_vm3, 1.0, %v2282_v6 }
 0x3aa   :  { %v1260_v35 = vpack.c.bf16 %v1132_v12, %v1132_v12  ;;  %v2014_v12 = vadd.f32 1.0, %v3283_v5 }
 0x3ac   :  { %v1719_v55 = vunpack.c.l.b16 %v1260_v35  ;;  %v2012_v35 = vmax.f32 %v3283_v5, 1e-30 }
 0x3ae   :  { %v1735_v63 = vpack.c.b16 %v1720_v28, %v1719_v55 }
 0x3af   :  { %v583_v59 = vpop.permute.xlu1 %582 }
 0x3b0   :  { %vm972_vm7 = vcmp.gt.f32.partialorder %v583_v59, %v3046_v61  ;;  %1758 = vmatpush.bf16.msrb.mxu3 %v1735_v63  ;;  %v3193_v61 = vld [vmem:[%s3608_s2 + $0x20] sm:$0xff]  ;;  %v2119_v63 = vadd.f32 -1.0, %v3283_v5 }
 0x3b1   :  { %v1100_v1 = vsel %vm972_vm7, 1.0, %v2282_v6  ;;  %v1942_v17 = vmul.f32 %v1941_v32, %v3193_v61 }
 0x3b2   :  { %v1228_v8 = vpack.c.bf16 %v1100_v1, %v1100_v1 }
 0x3b3   :  { %1759 = vmatmul.bf16.vlgmr.msrb.gmra.mxu3 %v2283_v57  ;;  %v1947_v45 = vadd.f32 %v1946_v29, %v1942_v17 }
 0x3b4   :  { %v1597_v46 = vunpack.c.l.b16 %v1228_v8 }
 0x3b5   :  { %v3214_v51 = vmin.f32 %v1947_v45, %v1948_v47 }
 0x3b6   :  { %v1613_v7 = vpack.c.b16 %v1598_v23, %v1597_v46 }
 0x3b7   :  { %v1974_v56 = vmax.f32 %v3214_v51, %v3221_v2 }
 0x3b8   :  { %1636 = vmatpush.bf16.msrb.mxu1 %v1613_v7 }
 0x3bb   :  { %1637 = vmatmul.bf16.vlgmr.msrb.gmra.mxu1 %v2283_v57  ;;  %v3216_v57 = vmax.f32 %v1949_v9, %v1950_v24 }
 0x3bd   :  { %v3234_v54 = vsub.f32 %v3216_v57, %v3214_v51  ;;  %v1973_v40 = vmin.f32 %v3216_v57, %v3226_v10 }
 0x3bf   :  { %v2035_v18 = vadd.f32 1e-09, %v3234_v54  ;;  %v1975_v27 = vsub.f32 %v1973_v40, %v1974_v56 }
 0x3c1   :  { %2266 = vrcp.f32 %v2035_v18 }
 0x3c2   :  { %2268 = vrcp.f32 %v2014_v12  ;;  %v1959_v12 = vmul.f32 %v3234_v54, %v1955_v58 }
 0x3c3   :  { %2270 = vrcp.f32 %v2012_v35  ;;  %v1960_v35 = vmul.f32 %v3230_v14, %v1957_v30  ;;  %v2021_v14 = vsel %vm3302_vm14, 0.7853982, %v2282_v6  ;;  %v38_v30 = vld [vmem:[%s3609_s3] sm:$0xff] }
 0x3c4   :  { %v2022_v46 = vsel %vm2008_vm8, 1.5707964, %v2021_v14  ;;  %v1857_v40 = vsub.f32 %v3239_v42, %v38_v30  ;;  %v43_v42 = vld [vmem:[%s3609_s3 + $0x28] sm:$0xff] }
 0x3c6   :  { %v1881_v25 = vmul.f32 0.5, %v1857_v40 }
 0x3c7   :  { %v2267_v48 = vpop.eup %2266 }
 0x3c8   :  { %v3285_v53 = vmul.f32 %v2267_v48, %v1955_v58  ;;  %v2269_v59 = vpop.eup %2268  ;;  %v3336_v48 = vpop.f32.mrf.mxu1  ;;  %v39_v58 = vld [vmem:[%s3609_s3 + $0x8] sm:$0xff] }
 0x3c9   :  { %v2271_v1 = vpop.eup %2270  ;;  %v2018_v8 = vmul.f32 %v2269_v59, %v2119_v63  ;;  %v1858_v56 = vsub.f32 %v3244_v22, %v39_v58  ;;  %v1860_v22 = vsub.f32 %v3255_v43, %v41_v15  ;;  %v1979_v43 = vmin.f32 %v3274_v44, %v3267_v16 }
 0x3ca   :  { %v3289_v28 = vand.u32 2147483647, %v3285_v53  ;;  %v2016_v7 = vsub.f32 0.0, %v2271_v1  ;;  %v1994_v1 = vadd.f32 %v1960_v35, %v1959_v12  ;;  %vm2038_vm2 = vcmp.lt.f32.partialorder %v3285_v53, 0.0 }
 0x3cb   :  { %v2019_v31 = vsel %vm3302_vm14, %v2018_v8, %v3283_v5  ;;  %v3342_v8 = vpop.f32.mrf.mxu2  ;;  %v2285_v53 = vmov 1.0   ;;  %v1978_v12 = vmax.f32 %v3262_v33, %v3272_v34 }
 0x3cc   :  { %v2045_v55 = vmax.f32 %v3289_v28, 1e-30  ;;  %v2047_v0 = vadd.f32 1.0, %v3289_v28  ;;  %vm2041_vm9 = vcmp.gt.f32.partialorder %v3289_v28, 2.4142137  ;;  %v2122_v20 = vadd.f32 -1.0, %v3289_v28 }
 0x3cd   :  { %vm2042_vm13 = vcmp.gt.f32.partialorder %v3289_v28, 0.41421357  ;;  %vm2043_vm15 = vmxor %vm2041_vm9, %vm2284_vm11  ;;  %v2020_v17 = vsel %vm2008_vm8, %v2016_v7, %v2019_v31  ;;  %v3344_v7 = vpop.f32.mrf.mxu3  ;;  %v1980_v58 = vsub.f32 %v1978_v12, %v1979_v43 }
 0x3ce   :  { %2272 = vrcp.f32 %v2045_v55  ;;  %vm3313_vm0 = vmand %vm2042_vm13, %vm2043_vm15  ;;  %v2023_v29 = vmul.f32 %v2020_v17, %v2020_v17  ;;  %v1972_v55 = vmax.f32 %v1971_v49, 0.0  ;;  %v42_v49 = vld [vmem:[%s3609_s3 + $0x20] sm:$0xff] }
 0x3cf   :  { %2274 = vrcp.f32 %v2047_v0  ;;  %v1976_v0 = vmax.f32 %v1975_v27, 0.0  ;;  %v44_v27 = vld [vmem:[%s3609_s3 + $0x30] sm:$0xff] }
 0x3d0   :  { %v2024_v45 = vmul.f32 0.080537446, %v2023_v29 }
 0x3d2   :  { %v2120_v24 = vadd.f32 -0.13877685, %v2024_v45 }
 0x3d4   :  { %v2273_v23 = vpop.eup %2272  ;;  %v2026_v50 = vmul.f32 %v2120_v24, %v2023_v29  ;;  %v1457_v24 = vpop.f32.mrf.mxu2 }
 0x3d5   :  { %v2275_v36 = vpop.eup %2274  ;;  %v2049_v32 = vsub.f32 0.0, %v2273_v23  ;;  %v1518_v4 = vpop.f32.mrf.mxu3 }
 0x3d6   :  { %v2051_v13 = vmul.f32 %v2275_v36, %v2122_v20  ;;  %v2027_v52 = vadd.f32 0.19977711, %v2026_v50  ;;  %v3340_v20 = vmul.f32 %v1976_v0, %v1972_v55  ;;  %v1335_v36 = vpop.f32.mrf.mxu0  ;;  %v1882_v55 = vmul.f32 0.5, %v1858_v56 }
 0x3d7   :  { %v1982_v36 = vmax.f32 %v3216_v57, %v3226_v10 }
 0x3d8   :  { %v2052_v11 = vsel %vm3313_vm0, %v2051_v13, %v3289_v28  ;;  %v2028_v21 = vmul.f32 %v2027_v52, %v2023_v29  ;;  %v1995_v13 = vsub.f32 %v1994_v1, %v3340_v20  ;;  %v3391_v28 = vsel %vm2038_vm2, -1.0, %v2285_v53 }
 0x3d9   :  { %v3322_v47 = vsel %vm2041_vm9, %v2049_v32, %v2052_v11  ;;  %v1396_v32 = vpop.f32.mrf.mxu1  ;;  %v40_v11 = vld [vmem:[%s3609_s3 + $0x10] sm:$0xff]  ;;  %v1861_v1 = vsub.f32 %v3193_v61, %v42_v49 }
 0x3da   :  { %v2056_v9 = vmul.f32 %v3322_v47, %v3322_v47  ;;  %v2121_v63 = vadd.f32 -0.3333295, %v2028_v21  ;;  %v1996_v45 = vadd.f32 1e-09, %v1995_v13  ;;  %v1859_v5 = vsub.f32 %v3249_v37, %v40_v11 }
 0x3db   :  { %v3387_v37 = vsel %vm2005_vm1, -1.0, %v2285_v53  ;;  %v1865_v21 = vand.u32 2147483647, %v1857_v40  ;;  %v1868_v32 = vand.u32 2147483647, %v1860_v22  ;;  %v1889_v11 = vmul.f32 %v1881_v25, %v1857_v40 }
 0x3dc   :  { %v2057_v60 = vmul.f32 0.080537446, %v2056_v9  ;;  %v2030_v23 = vmul.f32 %v2121_v63, %v2023_v29  ;;  %2276 = vrcp.f32 %v1996_v45  ;;  %v1867_v35 = vand.u32 2147483647, %v1859_v5 }
 0x3dd   :  { %v1883_v13 = vmul.f32 0.5, %v1859_v5  ;;  %vm3417_vm3 = vcmp.lt.f32.partialorder %v1865_v21, 1.0  ;;  %v1890_v45 = vmul.f32 %v1882_v55, %v1858_v56  ;;  %vm3430_vm8 = vcmp.lt.f32.partialorder %v1868_v32, 1.0 }
 0x3de   :  { %v2123_v18 = vadd.f32 -0.13877685, %v2057_v60  ;;  %v2031_v54 = vmul.f32 %v2030_v23, %v2020_v17  ;;  %v2054_v60 = vsel %vm3313_vm0, 0.7853982, %v2282_v6  ;;  %v3371_v52 = vpop.f32.mrf.mxu0  ;;  %v1862_v23 = vsub.f32 %v3198_v39, %v43_v42 }
 0x3df   :  { %v3376_v19 = vsel %vm2041_vm9, 1.5707964, %v2054_v60  ;;  %v1884_v39 = vmul.f32 0.5, %v1860_v22  ;;  %vm3426_vm7 = vcmp.lt.f32.partialorder %v1867_v35, 1.0  ;;  %v1885_v60 = vmul.f32 0.5, %v1861_v1 }
 0x3e0   :  { %v2059_v26 = vmul.f32 %v2123_v18, %v2056_v9  ;;  %v2032_v50 = vadd.f32 %v2031_v54, %v2020_v17  ;;  %v1765_v18 = vpop.xlane.xlu0 %1764  ;;  %v1983_v54 = vmin.f32 %v3214_v51, %v3221_v2  ;;  %v1891_v4 = vmul.f32 %v1883_v13, %v1859_v5 }
 0x3e1   :  { %v3403_v63 = vmul.f32 3.0, %v1765_v18  ;;  %v2111_v18 = vadd.f32 -0.5, %v1865_v21  ;;  %v1886_v42 = vmul.f32 0.5, %v1862_v23  ;;  %v2113_v53 = vadd.f32 -0.5, %v1867_v35 }
 0x3e2   :  { %v2060_v59 = vadd.f32 0.19977711, %v2059_v26  ;;  %v1866_v26 = vand.u32 2147483647, %v1858_v56  ;;  %v3415_v14 = vpop.eup %2276  ;;  %v1893_v25 = vmul.f32 %v1885_v60, %v1861_v1  ;;  %v1984_v35 = vsub.f32 %v1982_v36, %v1983_v54 }
 0x3e3   :  { %v1905_v40 = vsel %vm3417_vm3, %v1889_v11, %v2111_v18  ;;  %v1894_v13 = vmul.f32 %v1886_v42, %v1862_v23  ;;  %v1961_v36 = vadd.f32 %v3262_v33, %v3274_v44  ;;  %v1981_v54 = vmax.f32 %v1980_v58, 0.0 }
 0x3e4   :  { %v2061_v31 = vmul.f32 %v2060_v59, %v2056_v9  ;;  %v45_v59 = vld [vmem:[%s3609_s3 + $0x38] sm:$0xff]  ;;  %vm3421_vm6 = vcmp.lt.f32.partialorder %v1866_v26, 1.0  ;;  %v2112_v49 = vadd.f32 -0.5, %v1866_v26  ;;  %v1985_v60 = vmax.f32 %v1984_v35, 0.0 }
 0x3e5   :  { %v3469_v33 = vmin.f32 %v3403_v63, 127.0 }
 0x3e6   :  { %v2124_v29 = vadd.f32 -0.3333295, %v2061_v31  ;;  %v1863_v31 = vsub.f32 %v3203_v3, %v44_v27  ;;  %v1579_v24 = vpop.f32.mrf.mxu0  ;;  %v2114_v27 = vadd.f32 -0.5, %v1868_v32  ;;  %v1906_v56 = vsel %vm3421_vm6, %v1890_v45, %v2112_v49 }
 0x3e7   :  { %v1913_v26 = vadd.f32 %v1906_v56, %v1905_v40  ;;  %v3484_v49 = vmul.f32 %v3415_v14, %v3340_v20  ;;  %v1769_v40 = vrot.slane %v3469_v33, 1  ;;  %vm1784_vm3 = vcmp.lt.f32.partialorder %v3334_v62, %v3469_v33 }
 0x3e8   :  { %v2063_v17 = vmul.f32 %v2124_v29, %v2056_v9  ;;  %v3389_v9 = vadd.f32 %v2032_v50, %v2022_v46  ;;  %v1864_v29 = vsub.f32 %v3208_v41, %v45_v59  ;;  %v1869_v46 = vand.u32 2147483647, %v1861_v1 }
 0x3e9   :  { %v1870_v50 = vand.u32 2147483647, %v1862_v23  ;;  %v1871_v15 = vand.u32 2147483647, %v1863_v31  ;;  %v1892_v41 = vmul.f32 %v1884_v39, %v1860_v22  ;;  %v1887_v12 = vmul.f32 0.5, %v1863_v31 }
 0x3ea   :  { %v3401_v0 = vmul.f32 %v2063_v17, %v3322_v47  ;;  %v1888_v43 = vmul.f32 0.5, %v1864_v29  ;;  %v1872_v5 = vand.u32 2147483647, %v1864_v29  ;;  %v2115_v55 = vadd.f32 -0.5, %v1869_v46 }
 0x3eb   :  { %v1907_v59 = vsel %vm3426_vm7, %v1891_v4, %v2113_v53  ;;  %vm3440_vm9 = vcmp.lt.f32.partialorder %v1869_v46, 1.0  ;;  %vm3444_vm10 = vcmp.lt.f32.partialorder %v1870_v50, 1.0  ;;  %vm3448_vm11 = vcmp.lt.f32.partialorder %v1871_v15, 1.0 }
 0x3ec   :  { %v2116_v1 = vadd.f32 -0.5, %v1870_v50  ;;  %v1908_v30 = vsel %vm3430_vm8, %v1892_v41, %v2114_v27  ;;  %v1895_v61 = vmul.f32 %v1887_v12, %v1863_v31  ;;  %v1896_v39 = vmul.f32 %v1888_v43, %v1864_v29 }
 0x3ed   :  { %v2117_v3 = vadd.f32 -0.5, %v1871_v15  ;;  %v1914_v11 = vadd.f32 %v1913_v26, %v1907_v59  ;;  %v2118_v45 = vadd.f32 -0.5, %v1872_v5  ;;  %v1909_v24 = vsel %vm3440_vm9, %v1893_v25, %v2115_v55  ;;  %vm1808_vm9 = vmand %vm1784_vm3, %vm47_vm5 }
 0x3ee   :  { %v1963_v23 = vadd.f32 %v3216_v57, %v3214_v51  ;;  %v1965_v50 = vadd.f32 %v3272_v34, %v3267_v16  ;;  %v1967_v31 = vadd.f32 %v3226_v10, %v3221_v2  ;;  %v1910_v29 = vsel %vm3444_vm10, %v1894_v13, %v2116_v1 }
 0x3ef   :  { %v1915_v46 = vadd.f32 %v1914_v11, %v1908_v30  ;;  %v1991_v4 = vmul.f32 %v1981_v54, %v1981_v54  ;;  %v2065_v15 = vadd.f32 %v3401_v0, %v3322_v47  ;;  %vm3471_vm12 = vcmp.lt.f32.partialorder %v1872_v5, 1.0 }
 0x3f0   :  { %v2034_v57 = vmul.f32 %v3389_v9, %v3387_v37  ;;  %v1911_v2 = vsel %vm3448_vm11, %v1895_v61, %v2117_v3  ;;  %v1962_v10 = vmul.f32 0.5, %v1961_v36  ;;  %v1992_v16 = vmul.f32 %v1985_v60, %v1985_v60 }
 0x3f1   :  { %v1916_v51 = vadd.f32 %v1915_v46, %v1909_v24  ;;  %v2066_v34 = vadd.f32 %v2065_v15, %v3376_v19  ;;  %v1964_v47 = vmul.f32 0.5, %v1963_v23  ;;  %v1966_v0 = vmul.f32 0.5, %v1965_v50 }
 0x3f2   :  { %v1968_v63 = vmul.f32 0.5, %v1967_v31  ;;  %v1912_v17 = vsel %vm3471_vm12, %v1896_v39, %v2118_v45  ;;  %v1993_v18 = vadd.f32 %v1992_v16, %v1991_v4  ;;  %v2286_v9 = vmov 0  }
 0x3f3   :  { %v1917_v58 = vadd.f32 %v1916_v51, %v1910_v29  ;;  %v2067_v37 = vmul.f32 %v2066_v34, %v3391_v28  ;;  %v3490_v42 = vsel %vm47_vm5, 1, %v2286_v9  ;;  %v1986_v12 = vsub.f32 %v1966_v0, %v1962_v10 }
 0x3f4   :  { %v1999_v41 = vadd.f32 1e-09, %v1993_v18  ;;  %v1988_v43 = vsub.f32 %v1968_v63, %v1964_v47  ;;  %v1793_v56 = vrot.slane %v3490_v42, 1  ;;  %v2075_v14 = vsub.f32 1.0, %v3484_v49 }
 0x3f5   :  { %v1918_v19 = vadd.f32 %v1917_v58, %v1911_v2  ;;  %v2068_v53 = vsub.f32 %v2034_v57, %v2067_v37  ;;  %v1770_v25 = vrot.slane %v3469_v33, 2  ;;  %v1794_v55 = vrot.slane %v3490_v42, 2 }
 0x3f6   :  { %2278 = vrcp.f32 %v1999_v41  ;;  %v1987_v21 = vmul.f32 %v1986_v12, %v1986_v12  ;;  %v1989_v22 = vmul.f32 %v1988_v43, %v1988_v43  ;;  %vm3500_vm13 = vcmp.lt.f32.partialorder %v3336_v48, %v1769_v40 }
 0x3f7   :  { %v1919_v27 = vadd.f32 %v1918_v19, %v1912_v17  ;;  %v2069_v20 = vmul.f32 %v2068_v53, %v2068_v53  ;;  %vm3504_vm14 = vcmp.ne.s32.totalorder %v1793_v56, 0  ;;  %vm2071_vm15 = vcmp.gt.f32.partialorder %v3484_v49, 0.5 }
 0x3f8   :  { %v1771_v13 = vrot.slane %v3469_v33, 3  ;;  %v1795_v1 = vrot.slane %v3490_v42, 3  ;;  %vm1809_vm0 = vmand %vm3500_vm13, %vm3504_vm14  ;;  %vm3516_vm1 = vcmp.lt.f32.partialorder %v3342_v8, %v1770_v25  ;;  %vm3520_vm2 = vcmp.ne.s32.totalorder %v1794_v55, 0 }
 0x3f9   :  { %v1920_v28 = vsel %vm48_vm4, %v1919_v27, 0.0  ;;  %v2070_v5 = vmul.f32 0.40528473, %v2069_v20  ;;  %v1990_v39 = vadd.f32 %v1989_v22, %v1987_v21  ;;  %v1796_v11 = vrot.slane %v3490_v42, 4  ;;  %vm1810_vm6 = vmand %vm3516_vm1, %vm3520_vm2 }
 0x3fa   :  { %1921 = vadd.xlane.f32.xlu2 %v1920_v28  ;;  %v2125_v45 = vsel %vm2071_vm15, 1.0, %v2282_v6  ;;  %v1772_v24 = vrot.slane %v3469_v33, 4  ;;  %v1817_v8 = vsel %vm1809_vm0, 1, %v2286_v9  ;;  %vm3535_vm7 = vcmp.lt.f32.partialorder %v3344_v7, %v1771_v13 }
 0x3fb   :  { %v2076_v32 = vadd.f32 %v2075_v14, %v2070_v5  ;;  %vm3539_vm8 = vcmp.ne.s32.totalorder %v1795_v1, 0  ;;  %v2074_v46 = vmul.f32 %v2125_v45, %v2070_v5  ;;  %vm3545_vm10 = vcmp.ne.s32.totalorder %v1796_v11, 0 }
 0x3fc   :  { %v2279_v3 = vpop.eup %2278  ;;  %v1774_v50 = vrot.slane %v3469_v33, 6  ;;  %v1824_v7 = vrot.slane %v1817_v8, 7  ;;  %v1818_v31 = vsel %vm1810_vm6, 1, %v2286_v9  ;;  %vm1811_vm11 = vmand %vm3535_vm7, %vm3539_vm8  ;;  %vm3556_vm12 = vcmp.lt.f32.partialorder %v3371_v52, %v1772_v24 }
 0x3fd   :  { %v2077_v30 = vadd.f32 1e-09, %v2076_v32  ;;  %v2001_v54 = vmul.f32 %v2279_v3, %v1990_v39  ;;  %v1798_v60 = vrot.slane %v3490_v42, 6  ;;  %v1816_v15 = vsel %vm1808_vm9, 1, %v2286_v9  ;;  %vm1812_vm14 = vmand %vm3556_vm12, %vm3545_vm10 }
 0x3fe   :  { %vm1825_vm5 = vcmask 1041409   ;;  %v1799_v44 = vrot.slane %v3490_v42, 7  ;;  %v1827_v2 = vrot.slane %v1818_v31, 6  ;;  %vm1828_vm13 = vcmask 1042434   ;;  %v3686_v31 = vld [vmem:[#allocation3_spill] sm:$0xff] }
 0x3ff   :  { %2280 = vrcp.f32 %v2077_v30  ;;  %v2080_v57 = vsub.f32 %v3484_v49, %v2001_v54  ;;  %v1819_v10 = vsel %vm1811_vm11, 1, %v2286_v9  ;;  %v1797_v52 = vrot.slane %v3490_v42, 5 }
 0x400   :  { %v1826_v16 = vsel %vm1825_vm5, %v1824_v7, %v1816_v15  ;;  %vm3574_vm0 = vcmp.ne.s32.totalorder %v1798_v60, 0  ;;  %v1775_v0 = vrot.slane %v3469_v33, 7  ;;  %vm3579_vm1 = vcmp.ne.s32.totalorder %v1799_v44, 0 }
 0x401   :  { %v1830_v17 = vrot.slane %v1819_v10, 5  ;;  %vm1831_vm2 = vcmask 1043459   ;;  %v1820_v18 = vsel %vm1812_vm14, 1, %v2286_v9  ;;  %v1829_v42 = vsel %vm1828_vm13, %v1827_v2, %v1826_v16 }
 0x402   :  { %v1773_v19 = vrot.slane %v3469_v33, 5  ;;  %vm1805_vm7 = vcmp.ne.s32.totalorder %v1797_v52, 0  ;;  %v1833_v27 = vrot.slane %v1820_v18, 4  ;;  %vm1834_vm10 = vcmask 1044484  }
 0x403   :  { %v1832_v12 = vsel %vm1831_vm2, %v1830_v17, %v1829_v42  ;;  %vm1837_vm12 = vcmask 1045509   ;;  %vm1840_vm5 = vcmask 1046534   ;;  %vm1843_vm13 = vcmask 1047559  }
 0x404   :  { %v1835_v28 = vsel %vm1834_vm10, %v1833_v27, %v1832_v12 }
 0x405   :  { %v2281_v4 = vpop.eup %2280 }
 0x406   :  { %v2079_v51 = vmul.f32 %v2281_v4, %v2074_v46 }
 0x408   :  { %v2081_v47 = vmul.f32 %v2079_v51, %v2070_v5 }
 0x40a   :  { %v2082_v37 = vsub.f32 %v2080_v57, %v2081_v47 }
 0x40c   :  { %v2126_v53 = vclamps-f32 %v2082_v37, 1.0 }
 0x40e   :  { %v2085_v40 = vsub.f32 1.0, %v2126_v53 }
 0x410   :  { %v2086_v14 = vsel %vm48_vm4, %v2085_v40, 0.0 }
 0x411   :  { %2087 = vadd.xlane.f32.xlu2 %v2086_v14 }
 0x426   :  { %v1699_v59 = vpop.f32.mrf.mxu2 }
 0x427   :  { %vm3570_vm15 = vcmp.lt.f32.partialorder %v1699_v59, %v1774_v50 }
 0x428   :  { %vm1814_vm3 = vmand %vm3570_vm15, %vm3574_vm0  ;;  %vm2097_vm0 = vcmp.eq.s32.totalorder %v3686_v31, 1 }
 0x429   :  { %v1822_v43 = vsel %vm1814_vm3, 1, %v2286_v9 }
 0x42a   :  { %v1839_v5 = vrot.slane %v1822_v43, 2 }
 0x42e   :  { %v1701_v6 = vpop.f32.mrf.mxu2 }
 0x436   :  { %v1760_v49 = vpop.f32.mrf.mxu3 }
 0x437   :  { %vm1791_vm6 = vcmp.lt.f32.partialorder %v1760_v49, %v1775_v0 }
 0x438   :  { %vm1815_vm8 = vmand %vm1791_vm6, %vm3579_vm1  ;;  %v1638_v41 = vpop.f32.mrf.mxu1  ;;  %vm2096_vm1 = vcmp.eq.s32.totalorder %v3686_v31, 0 }
 0x439   :  { %vm1789_vm9 = vcmp.lt.f32.partialorder %v1638_v41, %v1773_v19  ;;  %v1823_v56 = vsel %vm1815_vm8, 1, %v2286_v9 }
 0x43a   :  { %vm1813_vm11 = vmand %vm1789_vm9, %vm1805_vm7  ;;  %v1842_v25 = vrot.slane %v1823_v56, 1 }
 0x43b   :  { %v1821_v20 = vsel %vm1813_vm11, 1, %v2286_v9  ;;  %v3685_v9 = vld [vmem:[#allocation4_spill] sm:$0xff] }
 0x43c   :  { %v1836_v33 = vrot.slane %v1821_v20, 3 }
 0x43e   :  { %v1838_v55 = vsel %vm1837_vm12, %v1836_v33, %v1835_v28  ;;  %v1762_v59 = vpop.f32.mrf.mxu3 }
 0x43f   :  { %v1841_v21 = vsel %vm1840_vm5, %v1839_v5, %v1838_v55 }
 0x440   :  { %v1640_v22 = vpop.f32.mrf.mxu1  ;;  %v1844_v26 = vsel %vm1843_vm13, %v1842_v25, %v1841_v21 }
 0x441   :  { %vm1845_vm14 = vcmp.ne.s32.totalorder %v1844_v26, 0 }
 0x442   :  { %vm1846_vm15 = vmor %vm48_vm4, %vm1845_vm14  ;;  %vm2098_vm4 = vcmp.eq.s32.totalorder %v3686_v31, 2 }
 0x443   :  { %v1847_v35 = vsel %vm1846_vm15, %v3685_v9, 0.0 }
 0x444   :  { %1848 = vadd.xlane.f32.xlu1 %v1847_v35 }
 0x46d   :  { %v1922_v32 = vpop.xlane.xlu2 %1921 }
 0x46e   :  { %v1923_v13 = vrot.slane %v1922_v32, 4 }
 0x470   :  { %v1924_v48 = vadd.f32 %v1923_v13, %v1922_v32 }
 0x472   :  { %v1925_v39 = vrot.slane %v1924_v48, 2 }
 0x474   :  { %v1926_v8 = vadd.f32 %v1925_v39, %v1924_v48 }
 0x476   :  { %v1927_v38 = vrot.slane %v1926_v8, 1 }
 0x478   :  { %v1928_v50 = vadd.f32 %v1927_v38, %v1926_v8 }
 0x484   :  { %v2088_v1 = vpop.xlane.xlu2 %2087 }
 0x485   :  { %v2089_v30 = vrot.slane %v2088_v1, 4 }
 0x487   :  { %v2090_v61 = vadd.f32 %v2089_v30, %v2088_v1 }
 0x489   :  { %v2091_v11 = vrot.slane %v2090_v61, 2 }
 0x48b   :  { %v2092_v36 = vadd.f32 %v2091_v11, %v2090_v61 }
 0x48d   :  { %v2093_v46 = vrot.slane %v2092_v36, 1 }
 0x48f   :  { %v2094_v7 = vadd.f32 %v2093_v46, %v2092_v36 }
 0x4b7   :  { %v1849_v3 = vpop.xlane.xlu1 %1848 }
 0x4b8   :  { %v1850_v45 = vrot.slane %v1849_v3, 4 }
 0x4ba   :  { %v1851_v24 = vadd.f32 %v1850_v45, %v1849_v3 }
 0x4bc   :  { %v1852_v62 = vrot.slane %v1851_v24, 2 }
 0x4be   :  { %v1853_v6 = vadd.f32 %v1852_v62, %v1851_v24 }
 0x4c0   :  { %v1854_v54 = vrot.slane %v1853_v6, 1 }
 0x4c2   :  { %v1855_v23 = vadd.f32 %v1854_v54, %v1853_v6 }
 0x4c4   :  { %2127 = vpush %v1855_v23 }
 0x4c5   :  { %2129 = vpush %v1928_v50 }
 0x4c6   :  { %2131 = vpush %v2094_v7 }
 0x4f5   :  { %s2128_s3 = spop %2127 }
 0x4f6   :  { %s2130_s14 = spop %2129  ;;  %v2103_v15 = vstv %s2128_s3 }
 0x4f7   :  { %v2101_v29 = vstv %s2130_s14  ;;  %s2132_s15 = spop %2131 }
 0x4f8   :  { %v2099_v60 = vstv %s2132_s15 }
 0x4f9   :  { %v2100_v4 = vsel %vm2098_vm4, %v2099_v60, 0.0 }
 0x4fa   :  { %v2102_v44 = vsel %vm2097_vm0, %v2101_v29, %v2100_v4 }
 0x4fb   :  { %v2104_v51 = vsel %vm2096_vm1, %v2103_v15, %v2102_v44 }
 0x4fc   :  { %2105 = vst [vmem:[%s3610_s5] sm:$0xff] %v2104_v51 }

</bundles_post_ra>
